<compile_context>
chip_gen: v7x
topology: tpu7x:2x2x1
jax: 0.10.0
libtpu: 0.0.40
codegen_flags: <defaults>
</compile_context>

<pallas_src>
import jax
import jax.numpy as jnp
from jax.experimental import pallas as pl
from jax.experimental.pallas import tpu as pltpu

_HEAD_OUT = 128  # fc3 output (9) zero-padded to one full lane tile -> unmasked store


def _stn3d_kernel(x_ref,
                  w1_ref, b1_ref, w2_ref, b2_ref, w3_ref, b3_ref,
                  w4_ref, b4_ref, w5_ref, b5_ref, w6_ref, b6_ref,
                  out_ref, pool_ref):
    """Fused per-point MLP + running max-pool + FC head for one (batch, point-tile) step."""
    k = pl.program_id(1)

    @pl.when(k == 0)
    def _init():
        # All pooled activations are post-ReLU (>= 0), so 0 is the identity for max.
        pool_ref[...] = jnp.zeros_like(pool_ref)

    # ---- per-point MLP on this tile of points (BN already folded into w/b) ----
    x = x_ref[0].astype(jnp.float32)                                          # (TN, Cp)
    h = jnp.maximum(
        jnp.dot(x, w1_ref[...], preferred_element_type=jnp.float32) + b1_ref[...], 0.0)
    h = jnp.maximum(
        jnp.dot(h, w2_ref[...], preferred_element_type=jnp.float32) + b2_ref[...], 0.0)
    h = jnp.maximum(
        jnp.dot(h, w3_ref[...], preferred_element_type=jnp.float32) + b3_ref[...], 0.0)

    # running max-pool over points, kept on-chip in VMEM scratch
    pool_ref[...] = jnp.maximum(pool_ref[...], jnp.max(h, axis=0, keepdims=True))

    # ---- FC head, once per batch element, at the last point tile --------------
    @pl.when(k == pl.num_programs(1) - 1)
    def _head():
        f = pool_ref[...]                                                     # (1, 1024)
        f = jnp.maximum(
            jnp.dot(f, w4_ref[...], preferred_element_type=jnp.float32) + b4_ref[...], 0.0)
        f = jnp.maximum(
            jnp.dot(f, w5_ref[...], preferred_element_type=jnp.float32) + b5_ref[...], 0.0)
        # fc3: identity (1,0,0,0,1,0,0,0,1) is pre-folded into b6; cols 9..127 are zero pad
        f = jnp.dot(f, w6_ref[...], preferred_element_type=jnp.float32) + b6_ref[...]
        out_ref[0] = f.astype(out_ref.dtype)                                  # (1, 128)


def _fold_bn(w, b, bn_params, eps):
    """Fold inference-mode BatchNorm1d into the preceding (in,out) weight + bias."""
    gamma, beta, mean, var = bn_params
    s = gamma * jax.lax.rsqrt(var + eps)
    w_f = (w * s[None, :]).astype(jnp.float32)
    b_f = ((b - mean) * s + beta).astype(jnp.float32)
    return w_f, b_f.reshape(1, -1)


def stn3d_forward(x, params, *, bn_eps=1e-5, point_tile=512):
    """STN3d forward.  x: (B, C, N) points.  Returns (B, 3, 3) float32."""
    B, C, N = x.shape

    # Fold BN into each conv/linear.  Weights are stored (in, out), i.e. the transpose
    # of PyTorch's Linear.weight / Conv1d.weight[:, :, 0].
    w1, b1 = _fold_bn(params["conv1_w"], params["conv1_b"], params["bn1"], bn_eps)
    w2, b2 = _fold_bn(params["conv2_w"], params["conv2_b"], params["bn2"], bn_eps)
    w3, b3 = _fold_bn(params["conv3_w"], params["conv3_b"], params["bn3"], bn_eps)
    w4, b4 = _fold_bn(params["fc1_w"], params["fc1_b"], params["bn4"], bn_eps)
    w5, b5 = _fold_bn(params["fc2_w"], params["fc2_b"], params["bn5"], bn_eps)

    # fc3 + "+ identity", zero-padded out to 128 lanes for a lane-dense output store.
    iden = jnp.array([1, 0, 0, 0, 1, 0, 0, 0, 1], jnp.float32)
    w6 = params["fc3_w"].astype(jnp.float32)                          # (256, 9)
    b6 = (params["fc3_b"].astype(jnp.float32) + iden).reshape(1, 9)
    w6 = jnp.pad(w6, ((0, 0), (0, _HEAD_OUT - w6.shape[1])))          # (256, 128)
    b6 = jnp.pad(b6, ((0, 0), (0, _HEAD_OUT - b6.shape[1])))          # (1, 128)

    # channels-last layout; zero-pad the tiny channel dim up to a multiple of 8
    x_t = jnp.transpose(x, (0, 2, 1)).astype(jnp.float32)             # (B, N, C)
    c_pad = (-C) % 8
    if c_pad:
        x_t = jnp.pad(x_t, ((0, 0), (0, 0), (0, c_pad)))
        w1 = jnp.pad(w1, ((0, c_pad), (0, 0)))                        # zero rows: no effect
    Cp = C + c_pad

    # point tiling: multiples of 8, up to `point_tile` points per grid step
    tn = min(point_tile, pl.cdiv(N, 8) * 8)
    n_pad = pl.cdiv(N, tn) * tn
    if n_pad != N:  # replicate the last point; max-pool result is unchanged
        x_t = jnp.concatenate(
            [x_t, jnp.broadcast_to(x_t[:, -1:, :], (B, n_pad - N, Cp))], axis=1)
    n_tiles = n_pad // tn

    full = lambda b, k: (0, 0)  # whole-array (weight) blocks, resident across the grid
    out = pl.pallas_call(
        _stn3d_kernel,
        out_shape=jax.ShapeDtypeStruct((B, 1, _HEAD_OUT), jnp.float32),
        grid_spec=pltpu.PrefetchScalarGridSpec(
            num_scalar_prefetch=0,
            grid=(B, n_tiles),
            in_specs=[
                pl.BlockSpec((1, tn, Cp), lambda b, k: (b, k, 0)),
                pl.BlockSpec(w1.shape, full), pl.BlockSpec(b1.shape, full),
                pl.BlockSpec(w2.shape, full), pl.BlockSpec(b2.shape, full),
                pl.BlockSpec(w3.shape, full), pl.BlockSpec(b3.shape, full),
                pl.BlockSpec(w4.shape, full), pl.BlockSpec(b4.shape, full),
                pl.BlockSpec(w5.shape, full), pl.BlockSpec(b5.shape, full),
                pl.BlockSpec(w6.shape, full), pl.BlockSpec(b6.shape, full),
            ],
            out_specs=pl.BlockSpec((1, 1, _HEAD_OUT), lambda b, k: (b, 0, 0)),
            scratch_shapes=[pltpu.VMEM((1, 1024), jnp.float32)],
        ),
        compiler_params=pltpu.CompilerParams(
            dimension_semantics=("parallel", "arbitrary"),
            vmem_limit_bytes=32 * 1024 * 1024),
    )(x_t, w1, b1, w2, b2, w3, b3, w4, b4, w5, b5, w6, b6)

    return out[:, 0, :9].reshape(B, 3, 3)


# ----------------------------- pure-JAX reference ---------------------------------
def stn3d_reference(x, p, bn_eps=1e-5):
    """Pure-JAX mirror of the PyTorch STN3d forward (inference-mode BatchNorm)."""
    B = x.shape[0]
    h = jnp.transpose(x, (0, 2, 1)).astype(jnp.float32)               # (B, N, C)

    def bn(y, bn_params):
        gamma, beta, mean, var = bn_params
        return (y - mean) * (gamma / jnp.sqrt(var + bn_eps)) + beta

    h = jax.nn.relu(bn(h @ p["conv1_w"] + p["conv1_b"], p["bn1"]))
    h = jax.nn.relu(bn(h @ p["conv2_w"] + p["conv2_b"], p["bn2"]))
    h = jax.nn.relu(bn(h @ p["conv3_w"] + p["conv3_b"], p["bn3"]))
    f = jnp.max(h, axis=1)                                            # (B, 1024)
    f = jax.nn.relu(bn(f @ p["fc1_w"] + p["fc1_b"], p["bn4"]))
    f = jax.nn.relu(bn(f @ p["fc2_w"] + p["fc2_b"], p["bn5"]))
    out = f @ p["fc3_w"] + p["fc3_b"]
    iden = jnp.array([1, 0, 0, 0, 1, 0, 0, 0, 1], jnp.float32)
    return (out + iden).reshape(B, 3, 3)


def init_params(key, channel):
    def dense(k, fan_in, fan_out):
        return jax.random.normal(k, (fan_in, fan_out), jnp.float32) / jnp.sqrt(fan_in)

    def bn_fresh(c):
        # freshly-constructed nn.BatchNorm1d: gamma=1, beta=0, running_mean=0, running_var=1
        return (jnp.ones((c,), jnp.float32), jnp.zeros((c,), jnp.float32),
                jnp.zeros((c,), jnp.float32), jnp.ones((c,), jnp.float32))

    ks = jax.random.split(key, 12)
    return {
        "conv1_w": dense(ks[0], channel, 64),
        "conv1_b": 0.1 * jax.random.normal(ks[1], (64,), jnp.float32),
        "conv2_w": dense(ks[2], 64, 128),
        "conv2_b": 0.1 * jax.random.normal(ks[3], (128,), jnp.float32),
        "conv3_w": dense(ks[4], 128, 1024),
        "conv3_b": 0.1 * jax.random.normal(ks[5], (1024,), jnp.float32),
        "fc1_w": dense(ks[6], 1024, 512),
        "fc1_b": 0.1 * jax.random.normal(ks[7], (512,), jnp.float32),
        "fc2_w": dense(ks[8], 512, 256),
        "fc2_b": 0.1 * jax.random.normal(ks[9], (256,), jnp.float32),
        "fc3_w": dense(ks[10], 256, 9),
        "fc3_b": 0.1 * jax.random.normal(ks[11], (9,), jnp.float32),
        "bn1": bn_fresh(64), "bn2": bn_fresh(128), "bn3": bn_fresh(1024),
        "bn4": bn_fresh(512), "bn5": bn_fresh(256),
    }


if __name__ == "__main__":
    key = jax.random.PRNGKey(0)
    k_param, k_x = jax.random.split(key)

    B, C, N = 2, 3, 16            # batch=2, 3 input channels (xyz), 16 points
    params = init_params(k_param, C)
    x = jax.random.normal(k_x, (B, C, N), dtype=jnp.float32)

    out = jax.jit(stn3d_forward)(x, params)
    out = jax.block_until_ready(out)
    assert out.shape == (B, 3, 3)

    ref = stn3d_reference(x, params)
    assert jnp.allclose(out, ref, rtol=1e-2, atol=1e-2), (out, ref)

    print("KERNEL_OK")
</pallas_src>

<mosaic_0001>
module attributes {stable_mosaic.version = 11 : i64} {
  func.func @_stn3d_kernel(%arg0: i32, %arg1: i32, %arg2: memref<1x16x8xf32, #tpu.memory_space<vmem>>, %arg3: memref<8x64xf32, #tpu.memory_space<vmem>>, %arg4: memref<1x64xf32, #tpu.memory_space<vmem>>, %arg5: memref<64x128xf32, #tpu.memory_space<vmem>>, %arg6: memref<1x128xf32, #tpu.memory_space<vmem>>, %arg7: memref<128x1024xf32, #tpu.memory_space<vmem>>, %arg8: memref<1x1024xf32, #tpu.memory_space<vmem>>, %arg9: memref<1024x512xf32, #tpu.memory_space<vmem>>, %arg10: memref<1x512xf32, #tpu.memory_space<vmem>>, %arg11: memref<512x256xf32, #tpu.memory_space<vmem>>, %arg12: memref<1x256xf32, #tpu.memory_space<vmem>>, %arg13: memref<256x128xf32, #tpu.memory_space<vmem>>, %arg14: memref<1x128xf32, #tpu.memory_space<vmem>>, %arg15: memref<1x1x128xf32, #tpu.memory_space<vmem>>, %arg16: memref<1x1024xf32, #tpu.memory_space<vmem>>) attributes {dimension_semantics = [#tpu.dimension_semantics<parallel>, #tpu.dimension_semantics<arbitrary>], iteration_bounds = array<i64: 2, 1>, scalar_prefetch = 0 : i64, scratch_operands = 1 : i64, tpu.core_type = #tpu.core_type<tc>, window_params = [{transform_indices = @transform_0, window_bounds = array<i64: 1, 16, 8>}, {pipeline_mode = #tpu.pipeline_mode<synchronous>, transform_indices = @transform_1, window_bounds = array<i64: 8, 64>}, {pipeline_mode = #tpu.pipeline_mode<synchronous>, transform_indices = @transform_2, window_bounds = array<i64: 1, 64>}, {pipeline_mode = #tpu.pipeline_mode<synchronous>, transform_indices = @transform_3, window_bounds = array<i64: 64, 128>}, {pipeline_mode = #tpu.pipeline_mode<synchronous>, transform_indices = @transform_4, window_bounds = array<i64: 1, 128>}, {pipeline_mode = #tpu.pipeline_mode<synchronous>, transform_indices = @transform_5, window_bounds = array<i64: 128, 1024>}, {pipeline_mode = #tpu.pipeline_mode<synchronous>, transform_indices = @transform_6, window_bounds = array<i64: 1, 1024>}, {pipeline_mode = #tpu.pipeline_mode<synchronous>, transform_indices = @transform_7, window_bounds = array<i64: 1024, 512>}, {pipeline_mode = #tpu.pipeline_mode<synchronous>, transform_indices = @transform_8, window_bounds = array<i64: 1, 512>}, {pipeline_mode = #tpu.pipeline_mode<synchronous>, transform_indices = @transform_9, window_bounds = array<i64: 512, 256>}, {pipeline_mode = #tpu.pipeline_mode<synchronous>, transform_indices = @transform_10, window_bounds = array<i64: 1, 256>}, {pipeline_mode = #tpu.pipeline_mode<synchronous>, transform_indices = @transform_11, window_bounds = array<i64: 256, 128>}, {pipeline_mode = #tpu.pipeline_mode<synchronous>, transform_indices = @transform_12, window_bounds = array<i64: 1, 128>}, {transform_indices = @transform_13, window_bounds = array<i64: 1, 1, 128>}]} {
    %c0_i32 = arith.constant 0 : i32
    %0 = arith.cmpi eq, %arg1, %c0_i32 : i32
    %1 = arith.extui %0 : i1 to i32
    %c0_i32_0 = arith.constant 0 : i32
    %2 = arith.cmpi ne, %1, %c0_i32_0 : i32
    scf.if %2 {
      %cst_27 = arith.constant 0.000000e+00 : f32
      %34 = vector.broadcast %cst_27 : f32 to vector<1x1024xf32>
      %c0_28 = arith.constant 0 : index
      %c0_29 = arith.constant 0 : index
      %35 = vector.load %arg16[%c0_28, %c0_29] : memref<1x1024xf32, #tpu.memory_space<vmem>>, vector<1x1024xf32>
      tpu.vector_store %arg16[%c0_28, %c0_29], %34 {strides = array<i32>} : memref<1x1024xf32, #tpu.memory_space<vmem>>, vector<1x1024xf32>,
    } else {
    }
    %c0 = arith.constant 0 : index
    %c0_1 = arith.constant 0 : index
    %c0_2 = arith.constant 0 : index
    %3 = vector.load %arg2[%c0, %c0_1, %c0_2] : memref<1x16x8xf32, #tpu.memory_space<vmem>>, vector<1x16x8xf32>
    %4 = vector.shape_cast %3 : vector<1x16x8xf32> to vector<16x8xf32>
    %c0_3 = arith.constant 0 : index
    %c0_4 = arith.constant 0 : index
    %5 = vector.load %arg3[%c0_3, %c0_4] : memref<8x64xf32, #tpu.memory_space<vmem>>, vector<8x64xf32>
    %cst = arith.constant dense<0.000000e+00> : vector<16x64xf32>
    %6 = tpu.matmul %4, %5, %cst {dimension_numbers = #tpu.dot_dimension_numbers<[1], [0], [0], [1], [0, 0, 1, 1], [], []>} : vector<16x8xf32>, vector<8x64xf32>, vector<16x64xf32> -> vector<16x64xf32>
    %c0_5 = arith.constant 0 : index
    %c0_6 = arith.constant 0 : index
    %7 = vector.load %arg4[%c0_5, %c0_6] : memref<1x64xf32, #tpu.memory_space<vmem>>, vector<1x64xf32>
    %8 = vector.broadcast %7 : vector<1x64xf32> to vector<16x64xf32>
    %9 = arith.addf %6, %8 : vector<16x64xf32>
    %cst_7 = arith.constant 0.000000e+00 : f32
    %10 = vector.broadcast %cst_7 : f32 to vector<16x64xf32>
    %11 = arith.maximumf %9, %10 : vector<16x64xf32>
    %c0_8 = arith.constant 0 : index
    %c0_9 = arith.constant 0 : index
    %12 = vector.load %arg5[%c0_8, %c0_9] : memref<64x128xf32, #tpu.memory_space<vmem>>, vector<64x128xf32>
    %cst_10 = arith.constant dense<0.000000e+00> : vector<16x128xf32>
    %13 = tpu.matmul %11, %12, %cst_10 {dimension_numbers = #tpu.dot_dimension_numbers<[1], [0], [0], [1], [0, 0, 1, 1], [], []>} : vector<16x64xf32>, vector<64x128xf32>, vector<16x128xf32> -> vector<16x128xf32>
    %c0_11 = arith.constant 0 : index
    %c0_12 = arith.constant 0 : index
    %14 = vector.load %arg6[%c0_11, %c0_12] : memref<1x128xf32, #tpu.memory_space<vmem>>, vector<1x128xf32>
    %15 = vector.broadcast %14 : vector<1x128xf32> to vector<16x128xf32>
    %16 = arith.addf %13, %15 : vector<16x128xf32>
    %cst_13 = arith.constant 0.000000e+00 : f32
    %17 = vector.broadcast %cst_13 : f32 to vector<16x128xf32>
    %18 = arith.maximumf %16, %17 : vector<16x128xf32>
    %c0_14 = arith.constant 0 : index
    %c0_15 = arith.constant 0 : index
    %19 = vector.load %arg7[%c0_14, %c0_15] : memref<128x1024xf32, #tpu.memory_space<vmem>>, vector<128x1024xf32>
    %cst_16 = arith.constant dense<0.000000e+00> : vector<16x1024xf32>
    %20 = tpu.matmul %18, %19, %cst_16 {dimension_numbers = #tpu.dot_dimension_numbers<[1], [0], [0], [1], [0, 0, 1, 1], [], []>} : vector<16x128xf32>, vector<128x1024xf32>, vector<16x1024xf32> -> vector<16x1024xf32>
    %c0_17 = arith.constant 0 : index
    %c0_18 = arith.constant 0 : index
    %21 = vector.load %arg8[%c0_17, %c0_18] : memref<1x1024xf32, #tpu.memory_space<vmem>>, vector<1x1024xf32>
    %22 = vector.broadcast %21 : vector<1x1024xf32> to vector<16x1024xf32>
    %23 = arith.addf %20, %22 : vector<16x1024xf32>
    %cst_19 = arith.constant 0.000000e+00 : f32
    %24 = vector.broadcast %cst_19 : f32 to vector<16x1024xf32>
    %25 = arith.maximumf %23, %24 : vector<16x1024xf32>
    %c0_20 = arith.constant 0 : index
    %c0_21 = arith.constant 0 : index
    %26 = vector.load %arg16[%c0_20, %c0_21] : memref<1x1024xf32, #tpu.memory_space<vmem>>, vector<1x1024xf32>
    %cst_22 = arith.constant dense<0xFF800000> : vector<1024xf32>
    %27 = vector.multi_reduction <maximumf>, %25, %cst_22 [0] : vector<16x1024xf32> to vector<1024xf32>
    %28 = vector.shape_cast %27 : vector<1024xf32> to vector<1x1024xf32>
    %29 = arith.maximumf %26, %28 : vector<1x1024xf32>
    %c0_23 = arith.constant 0 : index
    %c0_24 = arith.constant 0 : index
    %30 = vector.load %arg16[%c0_23, %c0_24] : memref<1x1024xf32, #tpu.memory_space<vmem>>, vector<1x1024xf32>
    tpu.vector_store %arg16[%c0_23, %c0_24], %29 {strides = array<i32>} : memref<1x1024xf32, #tpu.memory_space<vmem>>, vector<1x1024xf32>,
    %c0_i32_25 = arith.constant 0 : i32
    %31 = arith.cmpi eq, %arg1, %c0_i32_25 : i32
    %32 = arith.extui %31 : i1 to i32
    %c0_i32_26 = arith.constant 0 : i32
    %33 = arith.cmpi ne, %32, %c0_i32_26 : i32
    scf.if %33 {
      %c0_27 = arith.constant 0 : index
      %c0_28 = arith.constant 0 : index
      %34 = vector.load %arg16[%c0_27, %c0_28] : memref<1x1024xf32, #tpu.memory_space<vmem>>, vector<1x1024xf32>
      %c0_29 = arith.constant 0 : index
      %c0_30 = arith.constant 0 : index
      %35 = vector.load %arg9[%c0_29, %c0_30] : memref<1024x512xf32, #tpu.memory_space<vmem>>, vector<1024x512xf32>
      %cst_31 = arith.constant dense<0.000000e+00> : vector<1x512xf32>
      %36 = tpu.matmul %34, %35, %cst_31 {dimension_numbers = #tpu.dot_dimension_numbers<[1], [0], [0], [1], [0, 0, 1, 1], [], []>} : vector<1x1024xf32>, vector<1024x512xf32>, vector<1x512xf32> -> vector<1x512xf32>
      %c0_32 = arith.constant 0 : index
      %c0_33 = arith.constant 0 : index
      %37 = vector.load %arg10[%c0_32, %c0_33] : memref<1x512xf32, #tpu.memory_space<vmem>>, vector<1x512xf32>
      %38 = arith.addf %36, %37 : vector<1x512xf32>
      %cst_34 = arith.constant 0.000000e+00 : f32
      %39 = vector.broadcast %cst_34 : f32 to vector<1x512xf32>
      %40 = arith.maximumf %38, %39 : vector<1x512xf32>
      %c0_35 = arith.constant 0 : index
      %c0_36 = arith.constant 0 : index
      %41 = vector.load %arg11[%c0_35, %c0_36] : memref<512x256xf32, #tpu.memory_space<vmem>>, vector<512x256xf32>
      %cst_37 = arith.constant dense<0.000000e+00> : vector<1x256xf32>
      %42 = tpu.matmul %40, %41, %cst_37 {dimension_numbers = #tpu.dot_dimension_numbers<[1], [0], [0], [1], [0, 0, 1, 1], [], []>} : vector<1x512xf32>, vector<512x256xf32>, vector<1x256xf32> -> vector<1x256xf32>
      %c0_38 = arith.constant 0 : index
      %c0_39 = arith.constant 0 : index
      %43 = vector.load %arg12[%c0_38, %c0_39] : memref<1x256xf32, #tpu.memory_space<vmem>>, vector<1x256xf32>
      %44 = arith.addf %42, %43 : vector<1x256xf32>
      %cst_40 = arith.constant 0.000000e+00 : f32
      %45 = vector.broadcast %cst_40 : f32 to vector<1x256xf32>
      %46 = arith.maximumf %44, %45 : vector<1x256xf32>
      %c0_41 = arith.constant 0 : index
      %c0_42 = arith.constant 0 : index
      %47 = vector.load %arg13[%c0_41, %c0_42] : memref<256x128xf32, #tpu.memory_space<vmem>>, vector<256x128xf32>
      %cst_43 = arith.constant dense<0.000000e+00> : vector<1x128xf32>
      %48 = tpu.matmul %46, %47, %cst_43 {dimension_numbers = #tpu.dot_dimension_numbers<[1], [0], [0], [1], [0, 0, 1, 1], [], []>} : vector<1x256xf32>, vector<256x128xf32>, vector<1x128xf32> -> vector<1x128xf32>
      %c0_44 = arith.constant 0 : index
      %c0_45 = arith.constant 0 : index
      %49 = vector.load %arg14[%c0_44, %c0_45] : memref<1x128xf32, #tpu.memory_space<vmem>>, vector<1x128xf32>
      %50 = arith.addf %48, %49 : vector<1x128xf32>
      %c0_46 = arith.constant 0 : index
      %c0_47 = arith.constant 0 : index
      %c0_48 = arith.constant 0 : index
      %51 = vector.load %arg15[%c0_46, %c0_47, %c0_48] : memref<1x1x128xf32, #tpu.memory_space<vmem>>, vector<1x1x128xf32>
      %52 = vector.shape_cast %51 : vector<1x1x128xf32> to vector<1x128xf32>
      %53 = vector.shape_cast %50 : vector<1x128xf32> to vector<1x1x128xf32>
      tpu.vector_store %arg15[%c0_46, %c0_47, %c0_48], %53 {strides = array<i32>} : memref<1x1x128xf32, #tpu.memory_space<vmem>>, vector<1x1x128xf32>,
    } else {
    }
    return
  }
  func.func @transform_0(%arg0: i32, %arg1: i32) -> (i32, i32, i32) {
    %c0_i32 = arith.constant 0 : i32
    %c0_i32_0 = arith.constant 0 : i32
    return %arg0, %arg1, %c0_i32 : i32, i32, i32
  }
  func.func @transform_1(%arg0: i32, %arg1: i32) -> (i32, i32) {
    %c0_i32 = arith.constant 0 : i32
    %c0_i32_0 = arith.constant 0 : i32
    %c0_i32_1 = arith.constant 0 : i32
    return %c0_i32, %c0_i32_0 : i32, i32
  }
  func.func @transform_2(%arg0: i32, %arg1: i32) -> (i32, i32) {
    %c0_i32 = arith.constant 0 : i32
    %c0_i32_0 = arith.constant 0 : i32
    %c0_i32_1 = arith.constant 0 : i32
    return %c0_i32, %c0_i32_0 : i32, i32
  }
  func.func @transform_3(%arg0: i32, %arg1: i32) -> (i32, i32) {
    %c0_i32 = arith.constant 0 : i32
    %c0_i32_0 = arith.constant 0 : i32
    %c0_i32_1 = arith.constant 0 : i32
    return %c0_i32, %c0_i32_0 : i32, i32
  }
  func.func @transform_4(%arg0: i32, %arg1: i32) -> (i32, i32) {
    %c0_i32 = arith.constant 0 : i32
    %c0_i32_0 = arith.constant 0 : i32
    %c0_i32_1 = arith.constant 0 : i32
    return %c0_i32, %c0_i32_0 : i32, i32
  }
  func.func @transform_5(%arg0: i32, %arg1: i32) -> (i32, i32) {
    %c0_i32 = arith.constant 0 : i32
    %c0_i32_0 = arith.constant 0 : i32
    %c0_i32_1 = arith.constant 0 : i32
    return %c0_i32, %c0_i32_0 : i32, i32
  }
  func.func @transform_6(%arg0: i32, %arg1: i32) -> (i32, i32) {
    %c0_i32 = arith.constant 0 : i32
    %c0_i32_0 = arith.constant 0 : i32
    %c0_i32_1 = arith.constant 0 : i32
    return %c0_i32, %c0_i32_0 : i32, i32
  }
  func.func @transform_7(%arg0: i32, %arg1: i32) -> (i32, i32) {
    %c0_i32 = arith.constant 0 : i32
    %c0_i32_0 = arith.constant 0 : i32
    %c0_i32_1 = arith.constant 0 : i32
    return %c0_i32, %c0_i32_0 : i32, i32
  }
  func.func @transform_8(%arg0: i32, %arg1: i32) -> (i32, i32) {
    %c0_i32 = arith.constant 0 : i32
    %c0_i32_0 = arith.constant 0 : i32
    %c0_i32_1 = arith.constant 0 : i32
    return %c0_i32, %c0_i32_0 : i32, i32
  }
  func.func @transform_9(%arg0: i32, %arg1: i32) -> (i32, i32) {
    %c0_i32 = arith.constant 0 : i32
    %c0_i32_0 = arith.constant 0 : i32
    %c0_i32_1 = arith.constant 0 : i32
    return %c0_i32, %c0_i32_0 : i32, i32
  }
  func.func @transform_10(%arg0: i32, %arg1: i32) -> (i32, i32) {
    %c0_i32 = arith.constant 0 : i32
    %c0_i32_0 = arith.constant 0 : i32
    %c0_i32_1 = arith.constant 0 : i32
    return %c0_i32, %c0_i32_0 : i32, i32
  }
  func.func @transform_11(%arg0: i32, %arg1: i32) -> (i32, i32) {
    %c0_i32 = arith.constant 0 : i32
    %c0_i32_0 = arith.constant 0 : i32
    %c0_i32_1 = arith.constant 0 : i32
    return %c0_i32, %c0_i32_0 : i32, i32
  }
  func.func @transform_12(%arg0: i32, %arg1: i32) -> (i32, i32) {
    %c0_i32 = arith.constant 0 : i32
    %c0_i32_0 = arith.constant 0 : i32
    %c0_i32_1 = arith.constant 0 : i32
    return %c0_i32, %c0_i32_0 : i32, i32
  }
  func.func @transform_13(%arg0: i32, %arg1: i32) -> (i32, i32, i32) {
    %c0_i32 = arith.constant 0 : i32
    %c0_i32_0 = arith.constant 0 : i32
    %c0_i32_1 = arith.constant 0 : i32
    return %arg0, %c0_i32, %c0_i32_0 : i32, i32, i32
  }
}

</mosaic_0001>

<bundles_post_ra>
// kernel: squeeze.1
= control target key start
LH: loop header
LB: loop body
LE: loop exit
PB: predicated region body
PF: predicated region fallthrough
CT: control target
= control target key end

     0   :  { %vm7_vm0 = vcmask 23552   ;;  %s36_s8 = smov 122   ;;  %s56_s0 = inlined_call_operand.vmem [shape: f32[2,9], index: 0, kind: input, shape index: {}]   ;;  %s57_s1 = inlined_call_operand.vmem [shape: f32[2,3,3], index: 1, kind: output, shape index: {}]  }
   0x1   :  { %v4_v0 = vld [vmem:[%s56_s0] sm:$0x3]  ;;  %s35_s0 = smov 125  }
   0x2   :  { %5 = vst [vmem:[#allocation1] sm:$0x3] %v4_v0 }
   0x9   :  { %v9_v1 = vld [vmem:[#allocation1] sm:$0x3]  }
   0xa   :  { %v6_v2 = vld [vmem:[#allocation1] sm:$0x3]   ;;  %10 = vrot.lane.b32.xlu0 %v9_v1, %s35_s0 }
   0xb   :  { %8 = vst.msk [vmem:[#allocation0] ss:$8 sm:$0x3] %vm7_vm0, %v6_v2   ;;  %v15_v3 = vld [vmem:[#allocation1] sm:$0x3]  }
   0xe   :  { %16 = vrot.lane.b32.xlu0 %v15_v3, %s36_s8 }
  0x7c   :  { %v11_v4 = vpop.permute.xlu0 %10  }
  0x7d   :  { %14 = vst.msk [vmem:[#allocation0 + $0x1] ss:$8 sm:$0x3] %vm7_vm0, %v11_v4  }
  0x80   :  { %v17_v5 = vpop.permute.xlu0 %16  }
  0x81   :  { %20 = vst.msk [vmem:[#allocation0 + $0x2] ss:$8 sm:$0x3] %vm7_vm0, %v17_v5  }
  0x88   :  { %v24_v6 = vld [vmem:[#allocation0] sm:$0xf]  ;;  %v28_v7 = vld [vmem:[#allocation0 + $0x8] sm:$0xf] }
  0x89   :  { %26 = vst [vmem:[%s57_s1] sm:$0xf] %v24_v6  ;;  %32 = vst [vmem:[%s57_s1 + $0x4] sm:$0xf] %v28_v7 }

// kernel: stn3d_forward.1
= control target key start
LH: loop header
LB: loop body
LE: loop exit
PB: predicated region body
PF: predicated region fallthrough
CT: control target
= control target key end

     0   :  { %s3920_s25 = smov 0   ;;  %s3922_s26 = smov 0   ;;  %s6509_s0 = inlined_call_operand.vmem [shape: f32[2,16,8], index: 0, kind: input, shape index: {}]   ;;  %s6510_s1 = inlined_call_operand.vmem [shape: f32[8,64], index: 1, kind: input, shape index: {}]   ;;  %s6511_s2 = inlined_call_operand.vmem [shape: f32[1,64], index: 2, kind: input, shape index: {}]   ;;  %s6512_s3 = inlined_call_operand.vmem [shape: f32[64,128], index: 3, kind: input, shape index: {}]   ;;  %s6513_s4 = inlined_call_operand.vmem [shape: f32[1,128], index: 4, kind: input, shape index: {}]   ;;  %s6514_s5 = inlined_call_operand.vmem [shape: f32[128,1024], index: 5, kind: input, shape index: {}]   ;;  %s6515_s6 = inlined_call_operand.vmem [shape: f32[1,1024], index: 6, kind: input, shape index: {}]   ;;  %s6516_s7 = inlined_call_operand.vmem [shape: f32[1024,512], index: 7, kind: input, shape index: {}]   ;;  %s6517_s8 = inlined_call_operand.vmem [shape: f32[1,512], index: 8, kind: input, shape index: {}]   ;;  %s6518_s9 = inlined_call_operand.vmem [shape: f32[512,256], index: 9, kind: input, shape index: {}]   ;;  %s6519_s10 = inlined_call_operand.vmem [shape: f32[1,256], index: 10, kind: input, shape index: {}]   ;;  %s6520_s11 = inlined_call_operand.vmem [shape: f32[256,128], index: 11, kind: input, shape index: {}]   ;;  %s6521_s12 = inlined_call_operand.vmem [shape: f32[1,128], index: 12, kind: input, shape index: {}]   ;;  %s6522_s13 = inlined_call_operand.vmem [shape: f32[2,1,128], index: 13, kind: output, shape index: {}]  }
   0x1   :  { %s3924_s27 = smov 0  }
   0x2 LB: > { %s35_s28 = sadd.s32 1, %s3842_s26  ;;  %p2878_p0 = scmp.ge.s32.totalorder %s3846_s27, 1  ;;  %s3846_s27 = sphi %s3924_s27, %s23_s27   ;;  %s3842_s26 = sphi %s3922_s26, %s6524_s26   ;;  %s3838_s25 = sphi %s3920_s25, %s6523_s25  }
   0x3   : > { %p37_p1 = scmp.ge.s32.totalorder %s35_s28, 2  ;;  %p406_p2 = scmp.lt.s32.totalorder %s3846_s27, 3 }
   0x5   : > { %s6526_s28 = smov (%p37_p1, %s35_s28), 0  ;;  %p407_p3 = pnand %p2878_p0, %p406_p2 }
   0x6   : > { %v472_v0 = vld [vmem:[%s6510_s1] sm:$0xff] (!%p407_p3)  ;;  %p453_p4 = scmp.lt.s32.totalorder (!%p407_p3), %s3838_s25, 1  ;;  %v565_v2 = vld [vmem:[%s6512_s3 + $0x8] sm:$0xff] (!%p407_p3)  ;;  %v566_v4 = vld [vmem:[%s6512_s3 + $0x10] sm:$0xff] (!%p407_p3)  ;;  %vm480_vm0 = vcmask (!%p407_p3), 64512   ;;  %vm579_vm1 = vcmask (!%p407_p3), 523264  }
   0x7   : > { %410 = sbr.rel (%p407_p3) target bundleno = 1678 (0x68e), region = 72  ;;  %v564_v1 = vld [vmem:[%s6512_s3] sm:$0xff] (!%p407_p3)  ;;  %2938 = vmatprep.subr.mxu1 (!%p407_p3), %v472_v0  ;;  %v567_v5 = vld [vmem:[%s6512_s3 + $0x18] sm:$0xff] (!%p407_p3)  ;;  %v569_v10 = vld [vmem:[%s6512_s3 + $0x28] sm:$0xff] (!%p407_p3) }
   0x8   : > { %v2962_v3 = vpack.c.bf16 (!%p407_p3), %v565_v2, %v564_v1  ;;  %2939 = vmatpush3.msra.mxu1 (!%p407_p3), %v472_v0  ;;  %v2966_v8 = vpack.c.bf16 (!%p407_p3), %v567_v5, %v566_v4  ;;  %v568_v9 = vld [vmem:[%s6512_s3 + $0x20] sm:$0xff] (!%p407_p3)  ;;  %v570_v12 = vld [vmem:[%s6512_s3 + $0x30] sm:$0xff] (!%p407_p3)  ;;  %v571_v13 = vld [vmem:[%s6512_s3 + $0x38] sm:$0xff] (!%p407_p3) }
   0x9   : > { %v2970_v11 = vpack.c.bf16 (!%p407_p3), %v569_v10, %v568_v9  ;;  %v2974_v14 = vpack.c.bf16 (!%p407_p3), %v571_v13, %v570_v12  ;;  %v664_v15 = vld [vmem:[%s6514_s5 + $0x8] sm:$0xff] (!%p407_p3)  ;;  %v667_v21 = vld [vmem:[%s6514_s5 + $0x20] sm:$0xff] (!%p407_p3) }
   0xa   : > { %2963 = vmatprep.subr.bf16.mxu1 (!%p407_p3), %v2962_v3  ;;  %v672_v16 = vld [vmem:[%s6514_s5 + $0x48] sm:$0xff] (!%p407_p3)  ;;  %v675_v22 = vld [vmem:[%s6514_s5 + $0x60] sm:$0xff] (!%p407_p3) }
   0xb   : > { %v2978_v17 = vpack.c.bf16 (!%p407_p3), %v672_v16, %v664_v15  ;;  %v668_v18 = vld [vmem:[%s6514_s5 + $0x28] sm:$0xff] (!%p407_p3)  ;;  %v3044_v23 = vpack.c.bf16 (!%p407_p3), %v675_v22, %v667_v21  ;;  %v683_v26 = vld [vmem:[%s6514_s5 + $0xa0] sm:$0xff] (!%p407_p3) }
   0xc   : > { %v676_v19 = vld [vmem:[%s6514_s5 + $0x68] sm:$0xff] (!%p407_p3)  ;;  %v691_v28 = vld [vmem:[%s6514_s5 + $0xe0] sm:$0xff] (!%p407_p3) }
   0xd   : > { %v3042_v20 = vpack.c.bf16 (!%p407_p3), %v676_v19, %v668_v18  ;;  %v684_v24 = vld [vmem:[%s6514_s5 + $0xa8] sm:$0xff] (!%p407_p3)  ;;  %v3048_v29 = vpack.c.bf16 (!%p407_p3), %v691_v28, %v683_v26  ;;  %v699_v32 = vld [vmem:[%s6514_s5 + $0x120] sm:$0xff] (!%p407_p3) }
   0xe   : > { %s6528_s25 = smov (!%p453_p4, %s3838_s25), 1  ;;  %v692_v25 = vld [vmem:[%s6514_s5 + $0xe8] sm:$0xff]  ;;  %v707_v34 = vld [vmem:[%s6514_s5 + $0x160] sm:$0xff] }
   0xf   : > { %s2889_s22 = sshll.u32 %s6528_s25, 4  ;;  %3043 = vmatprep.subr.bf16.mxu0 %v3042_v20  ;;  %v3046_v27 = vpack.c.bf16 %v692_v25, %v684_v24  ;;  %v700_v30 = vld [vmem:[%s6514_s5 + $0x128] sm:$0xff]  ;;  %v3052_v35 = vpack.c.bf16 %v707_v34, %v699_v32  ;;  %v715_v38 = vld [vmem:[%s6514_s5 + $0x1a0] sm:$0xff]  ;;  %s464_s23 = scalar_lea.vmem %s6522_s13, %s6528_s25 }
  0x10   : > { %s460_s29 = scalar_lea.vmem %s6509_s0, %s2889_s22  ;;  %3045 = vmatpush1.bf16.msra.mxu0 %v3044_v23  ;;  %v708_v31 = vld [vmem:[%s6514_s5 + $0x168] sm:$0xff]  ;;  %v723_v40 = vld [vmem:[%s6514_s5 + $0x1e0] sm:$0xff] }
  0x11   : > { %v470_v6 = vld [vmem:[%s460_s29] sm:$0xff]  ;;  %v471_v7 = vld [vmem:[%s460_s29 + $0x8] sm:$0xff]  ;;  %3047 = vmatprep.subr.bf16.mxu0 %v3046_v27  ;;  %v3050_v33 = vpack.c.bf16 %v708_v31, %v700_v30  ;;  %v3056_v41 = vpack.c.bf16 %v723_v40, %v715_v38 }
  0x12   : > { %2940 = vmatprep.mubr.msk.f32.mxu1 %vm480_vm0, %v470_v6  ;;  %v716_v36 = vld [vmem:[%s6514_s5 + $0x1a8] sm:$0xff]  ;;  %v731_v44 = vld [vmem:[%s6514_s5 + $0x220] sm:$0xff] }
  0x13   : > { %2941 = vmatmul.mubr.msk.f32.vlgmr.msra.gmra.mrb[0].mxu1 %vm480_vm0, %v471_v7  ;;  %v724_v37 = vld [vmem:[%s6514_s5 + $0x1e8] sm:$0xff]  ;;  %v739_v46 = vld [vmem:[%s6514_s5 + $0x260] sm:$0xff] }
  0x14   : > { %2965 = vmatpush3.bf16.msra.mxu1 %v2962_v3  ;;  %3049 = vmatpush1.bf16.msra.mxu0 %v3048_v29  ;;  %v3054_v39 = vpack.c.bf16 %v724_v37, %v716_v36  ;;  %v732_v42 = vld [vmem:[%s6514_s5 + $0x228] sm:$0xff]  ;;  %v3060_v47 = vpack.c.bf16 %v739_v46, %v731_v44  ;;  %v747_v50 = vld [vmem:[%s6514_s5 + $0x2a0] sm:$0xff] }
  0x15   : > { %2967 = vmatprep.subr.bf16.mxu1 %v2966_v8  ;;  %3051 = vmatprep.subr.bf16.mxu0 %v3050_v33  ;;  %v740_v43 = vld [vmem:[%s6514_s5 + $0x268] sm:$0xff]  ;;  %v755_v52 = vld [vmem:[%s6514_s5 + $0x2e0] sm:$0xff] }
  0x16   : > { %v3058_v45 = vpack.c.bf16 %v740_v43, %v732_v42  ;;  %v748_v48 = vld [vmem:[%s6514_s5 + $0x2a8] sm:$0xff]  ;;  %v3064_v53 = vpack.c.bf16 %v755_v52, %v747_v50  ;;  %v763_v56 = vld [vmem:[%s6514_s5 + $0x320] sm:$0xff] }
  0x17   : > { %v756_v49 = vld [vmem:[%s6514_s5 + $0x2e8] sm:$0xff]  ;;  %v771_v58 = vld [vmem:[%s6514_s5 + $0x360] sm:$0xff] }
  0x18   : > { %2969 = vmatpush3.bf16.msra.mxu1 %v2966_v8  ;;  %3053 = vmatpush1.bf16.msra.mxu0 %v3052_v35  ;;  %v3062_v51 = vpack.c.bf16 %v756_v49, %v748_v48  ;;  %v764_v54 = vld [vmem:[%s6514_s5 + $0x328] sm:$0xff]  ;;  %v3068_v59 = vpack.c.bf16 %v771_v58, %v763_v56  ;;  %v2881_v60 = vld [vmem:[%s6511_s2] ss:$0 sm:$0xff] }
  0x19   : > { %2971 = vmatprep.subr.bf16.mxu1 %v2970_v11  ;;  %3055 = vmatprep.subr.bf16.mxu0 %v3054_v39  ;;  %v772_v55 = vld [vmem:[%s6514_s5 + $0x368] sm:$0xff]  ;;  %v663_v0 = vld [vmem:[%s6514_s5] sm:$0xff] }
  0x1a   : > { %v3066_v57 = vpack.c.bf16 %v772_v55, %v764_v54  ;;  %v671_v1 = vld [vmem:[%s6514_s5 + $0x40] sm:$0xff]  ;;  %v680_v3 = vld [vmem:[%s6514_s5 + $0x88] sm:$0xff]  ;;  %v666_v54 = vld [vmem:[%s6514_s5 + $0x18] sm:$0xff] }
  0x1b   : > { %v688_v4 = vld [vmem:[%s6514_s5 + $0xc8] sm:$0xff]  ;;  %v2980_v6 = vpack.c.bf16 %v671_v1, %v663_v0  ;;  %v679_v9 = vld [vmem:[%s6514_s5 + $0x80] sm:$0xff]  ;;  %v674_v55 = vld [vmem:[%s6514_s5 + $0x58] sm:$0xff] }
  0x1c   : > { %2973 = vmatpush3.bf16.msra.mxu1 %v2970_v11  ;;  %3057 = vmatpush1.bf16.msra.mxu0 %v3056_v41  ;;  %v2982_v8 = vpack.c.bf16 %v688_v4, %v680_v3  ;;  %v687_v10 = vld [vmem:[%s6514_s5 + $0xc0] sm:$0xff]  ;;  %v696_v11 = vld [vmem:[%s6514_s5 + $0x108] sm:$0xff]  ;;  %v3010_v56 = vpack.c.bf16 %v674_v55, %v666_v54  ;;  %v690_v0 = vld [vmem:[%s6514_s5 + $0xd8] sm:$0xff] }
  0x1d   : > { %2975 = vmatprep.subr.bf16.mxu1 %v2974_v14  ;;  %3059 = vmatprep.subr.bf16.mxu0 %v3058_v45  ;;  %v704_v12 = vld [vmem:[%s6514_s5 + $0x148] sm:$0xff]  ;;  %v2984_v13 = vpack.c.bf16 %v687_v10, %v679_v9  ;;  %v695_v15 = vld [vmem:[%s6514_s5 + $0x100] sm:$0xff]  ;;  %v706_v9 = vld [vmem:[%s6514_s5 + $0x158] sm:$0xff] }
  0x1e   : > { %v703_v16 = vld [vmem:[%s6514_s5 + $0x140] sm:$0xff]  ;;  %v720_v18 = vld [vmem:[%s6514_s5 + $0x1c8] sm:$0xff]  ;;  %v685_v55 = vld [vmem:[%s6514_s5 + $0xb0] sm:$0xff] }
  0x1f   : > { %v2988_v19 = vpack.c.bf16 %v703_v16, %v695_v15  ;;  %v711_v21 = vld [vmem:[%s6514_s5 + $0x180] sm:$0xff]  ;;  %v728_v23 = vld [vmem:[%s6514_s5 + $0x208] sm:$0xff]  ;;  %v714_v15 = vld [vmem:[%s6514_s5 + $0x198] sm:$0xff] }
  0x20   : > { %2977 = vmatpush3.bf16.msra.mxu1 %v2974_v14  ;;  %3061 = vmatpush1.bf16.msra.mxu0 %v3060_v47  ;;  %v2986_v14 = vpack.c.bf16 %v704_v12, %v696_v11  ;;  %v719_v22 = vld [vmem:[%s6514_s5 + $0x1c0] sm:$0xff]  ;;  %v736_v24 = vld [vmem:[%s6514_s5 + $0x248] sm:$0xff]  ;;  %v722_v16 = vld [vmem:[%s6514_s5 + $0x1d8] sm:$0xff] }
  0x21   : > { %2979 = vmatprep.subr.bf16.mxu1 %v2978_v17  ;;  %3063 = vmatprep.subr.bf16.mxu0 %v3062_v51  ;;  %v712_v17 = vld [vmem:[%s6514_s5 + $0x188] sm:$0xff]  ;;  %v2992_v25 = vpack.c.bf16 %v719_v22, %v711_v21  ;;  %v2994_v26 = vpack.c.bf16 %v736_v24, %v728_v23  ;;  %v727_v27 = vld [vmem:[%s6514_s5 + $0x200] sm:$0xff]  ;;  %v730_v21 = vld [vmem:[%s6514_s5 + $0x218] sm:$0xff] }
  0x22   : > { %v2990_v20 = vpack.c.bf16 %v720_v18, %v712_v17  ;;  %v735_v28 = vld [vmem:[%s6514_s5 + $0x240] sm:$0xff]  ;;  %v744_v29 = vld [vmem:[%s6514_s5 + $0x288] sm:$0xff]  ;;  %v3022_v18 = vpack.c.bf16 %v722_v16, %v714_v15  ;;  %v738_v22 = vld [vmem:[%s6514_s5 + $0x258] sm:$0xff] }
  0x23   : > { %v752_v30 = vld [vmem:[%s6514_s5 + $0x2c8] sm:$0xff]  ;;  %v2996_v31 = vpack.c.bf16 %v735_v28, %v727_v27  ;;  %v743_v33 = vld [vmem:[%s6514_s5 + $0x280] sm:$0xff]  ;;  %v3026_v24 = vpack.c.bf16 %v738_v22, %v730_v21  ;;  %v746_v27 = vld [vmem:[%s6514_s5 + $0x298] sm:$0xff] }
  0x24   : > { %3065 = vmatpush1.bf16.msra.mxu0 %v3064_v53  ;;  %v2998_v32 = vpack.c.bf16 %v752_v30, %v744_v29  ;;  %v751_v34 = vld [vmem:[%s6514_s5 + $0x2c0] sm:$0xff]  ;;  %v760_v35 = vld [vmem:[%s6514_s5 + $0x308] sm:$0xff]  ;;  %v754_v28 = vld [vmem:[%s6514_s5 + $0x2d8] sm:$0xff] }
  0x25   : > { %3067 = vmatprep.subr.bf16.mxu0 %v3066_v57  ;;  %v768_v36 = vld [vmem:[%s6514_s5 + $0x348] sm:$0xff]  ;;  %v3000_v37 = vpack.c.bf16 %v751_v34, %v743_v33  ;;  %v759_v39 = vld [vmem:[%s6514_s5 + $0x300] sm:$0xff]  ;;  %v3848_v57 = vmov 0.0   ;;  %v3030_v30 = vpack.c.bf16 %v754_v28, %v746_v27  ;;  %v762_v33 = vld [vmem:[%s6514_s5 + $0x318] sm:$0xff] }
  0x26   : > { %v3002_v38 = vpack.c.bf16 %v768_v36, %v760_v35  ;;  %v767_v40 = vld [vmem:[%s6514_s5 + $0x340] sm:$0xff]  ;;  %v776_v42 = vld [vmem:[%s6514_s5 + $0x388] sm:$0xff]  ;;  %1051 = vmatprep.mubr.f32.mxu0 %v3848_v57  ;;  %v770_v34 = vld [vmem:[%s6514_s5 + $0x358] sm:$0xff] }
  0x27   : > { %v3004_v41 = vpack.c.bf16 %v767_v40, %v759_v39  ;;  %v784_v43 = vld [vmem:[%s6514_s5 + $0x3c8] sm:$0xff]  ;;  %v775_v45 = vld [vmem:[%s6514_s5 + $0x380] sm:$0xff]  ;;  %v3034_v36 = vpack.c.bf16 %v770_v34, %v762_v33  ;;  %v778_v39 = vld [vmem:[%s6514_s5 + $0x398] sm:$0xff] }
  0x28   : > { %3069 = vmatpush1.bf16.msra.mxu0 %v3068_v59  ;;  %v3006_v44 = vpack.c.bf16 %v784_v43, %v776_v42  ;;  %v783_v46 = vld [vmem:[%s6514_s5 + $0x3c0] sm:$0xff]  ;;  %v780_v47 = vld [vmem:[%s6514_s5 + $0x3a8] sm:$0xff]  ;;  %v786_v40 = vld [vmem:[%s6514_s5 + $0x3d8] sm:$0xff] }
  0x29   : > { %v3008_v48 = vpack.c.bf16 %v783_v46, %v775_v45  ;;  %v788_v49 = vld [vmem:[%s6514_s5 + $0x3e8] sm:$0xff]  ;;  %v779_v50 = vld [vmem:[%s6514_s5 + $0x3a0] sm:$0xff]  ;;  %v3038_v42 = vpack.c.bf16 %v786_v40, %v778_v39  ;;  %v777_v43 = vld [vmem:[%s6514_s5 + $0x390] sm:$0xff] }
  0x2a   : > { %v3070_v51 = vpack.c.bf16 %v788_v49, %v780_v47  ;;  %v787_v52 = vld [vmem:[%s6514_s5 + $0x3e0] sm:$0xff]  ;;  %v670_v45 = vld [vmem:[%s6514_s5 + $0x38] sm:$0xff]  ;;  %v669_v49 = vld [vmem:[%s6514_s5 + $0x30] sm:$0xff] }
  0x2b   : > { %v3072_v53 = vpack.c.bf16 %v787_v52, %v779_v50  ;;  %v2884_v58 = vld [vmem:[%s6513_s4] ss:$0 sm:$0xff]  ;;  %v678_v46 = vld [vmem:[%s6514_s5 + $0x78] sm:$0xff]  ;;  %v677_v50 = vld [vmem:[%s6514_s5 + $0x70] sm:$0xff] }
  0x2c   : > { %3071 = vmatprep.subr.bf16.mxu0 %v3070_v51  ;;  %v686_v51 = vld [vmem:[%s6514_s5 + $0xb8] sm:$0xff]  ;;  %v1279_v33 = vld [vmem:[%s6516_s7 + $0x8] sm:$0xff]  ;;  %v1280_v39 = vld [vmem:[%s6516_s7 + $0x10] sm:$0xff] }
  0x2d   : > { %3073 = vmatpush1.bf16.msra.mxu0 %v3072_v53  ;;  %v694_v52 = vld [vmem:[%s6514_s5 + $0xf8] sm:$0xff]  ;;  %v3076_v53 = vpack.c.bf16 %v677_v50, %v669_v49  ;;  %v1283_v34 = vld [vmem:[%s6516_s7 + $0x28] sm:$0xff]  ;;  %v1284_v40 = vld [vmem:[%s6516_s7 + $0x30] sm:$0xff] }
  0x2e   : > { %v3078_v54 = vpack.c.bf16 %v694_v52, %v686_v51  ;;  %v758_v15 = vld [vmem:[%s6514_s5 + $0x2f8] sm:$0xff]  ;;  %v1288_v51 = vld [vmem:[%s6516_s7 + $0x50] sm:$0xff] }
  0x2f   : > { %v774_v21 = vld [vmem:[%s6514_s5 + $0x378] sm:$0xff]  ;;  %v1292_v52 = vld [vmem:[%s6516_s7 + $0x70] sm:$0xff] }
  0x30   : > { %v790_v27 = vld [vmem:[%s6514_s5 + $0x3f8] sm:$0xff] }
  0xe6   : > { %v2942_v61 = vpop.f32.mrb[0].mxu1 }
  0xe7   : > { %v559_v62 = vadd.f32 %v2942_v61, %v2881_v60  ;;  %v553_v63 = vpop.f32.mrb[1].mxu1  ;;  %v673_v61 = vld [vmem:[%s6514_s5 + $0x50] sm:$0xff] }
  0xe8   : > { %v554_v2 = vadd.f32 %v2881_v60, %v553_v63  ;;  %v665_v60 = vld [vmem:[%s6514_s5 + $0x10] sm:$0xff]  ;;  %v682_v63 = vld [vmem:[%s6514_s5 + $0x98] sm:$0xff] }
  0xe9   : > { %v563_v7 = vmax.f32 %v559_v62, 0.0 }
  0xea   : > { %v562_v5 = vmax.f32 %v554_v2, 0.0  ;;  %v3012_v2 = vpack.c.bf16 %v673_v61, %v665_v60 }
  0xec   : > { %2959 = vmatprep.mubr.msk.f32.mxu1 %vm579_vm1, %v562_v5  ;;  %v3014_v5 = vpack.c.bf16 %v690_v0, %v682_v63  ;;  %v709_v63 = vld [vmem:[%s6514_s5 + $0x170] sm:$0xff]  ;;  %v718_v0 = vld [vmem:[%s6514_s5 + $0x1b8] sm:$0xff] }
  0xed   : > { %2960 = vmatmul.mubr.msk.f32.vlgmr.msra.gmra.mrb[2].mxu1 %vm579_vm1, %v563_v7  ;;  %v689_v7 = vld [vmem:[%s6514_s5 + $0xd0] sm:$0xff] }
  0xee   : > { %2981 = vmatpush1.bf16.msra.mxu1 %v2980_v6  ;;  %897 = vmatprep.mubr.f32.mxu1 %v3848_v57  ;;  %v681_v6 = vld [vmem:[%s6514_s5 + $0x90] sm:$0xff] }
  0xef   : > { %2983 = vmatprep.subr.bf16.mxu1 %v2982_v8  ;;  %v698_v8 = vld [vmem:[%s6514_s5 + $0x118] sm:$0xff]  ;;  %v3016_v10 = vpack.c.bf16 %v689_v7, %v681_v6  ;;  %v725_v6 = vld [vmem:[%s6514_s5 + $0x1f0] sm:$0xff] }
  0xf0   : > { %v3018_v12 = vpack.c.bf16 %v706_v9, %v698_v8  ;;  %v734_v7 = vld [vmem:[%s6514_s5 + $0x238] sm:$0xff] }
  0xf1   : > { %v742_v8 = vld [vmem:[%s6514_s5 + $0x278] sm:$0xff] }
  0xf2   : > { %2985 = vmatpush1.bf16.msra.mxu1 %v2984_v13  ;;  %v697_v13 = vld [vmem:[%s6514_s5 + $0x110] sm:$0xff] }
  0xf3   : > { %2987 = vmatprep.subr.bf16.mxu1 %v2986_v14  ;;  %v705_v14 = vld [vmem:[%s6514_s5 + $0x150] sm:$0xff] }
  0xf4   : > { %v3020_v17 = vpack.c.bf16 %v705_v14, %v697_v13  ;;  %v741_v13 = vld [vmem:[%s6514_s5 + $0x270] sm:$0xff]  ;;  %v750_v14 = vld [vmem:[%s6514_s5 + $0x2b8] sm:$0xff] }
  0xf6   : > { %2989 = vmatpush1.bf16.msra.mxu1 %v2988_v19  ;;  %v713_v19 = vld [vmem:[%s6514_s5 + $0x190] sm:$0xff] }
  0xf7   : > { %2991 = vmatprep.subr.bf16.mxu1 %v2990_v20  ;;  %v721_v20 = vld [vmem:[%s6514_s5 + $0x1d0] sm:$0xff] }
  0xf8   : > { %v3024_v23 = vpack.c.bf16 %v721_v20, %v713_v19  ;;  %v757_v19 = vld [vmem:[%s6514_s5 + $0x2f0] sm:$0xff]  ;;  %v766_v20 = vld [vmem:[%s6514_s5 + $0x338] sm:$0xff] }
  0xfa   : > { %2993 = vmatpush1.bf16.msra.mxu1 %v2992_v25  ;;  %v729_v25 = vld [vmem:[%s6514_s5 + $0x210] sm:$0xff] }
  0xfb   : > { %2995 = vmatprep.subr.bf16.mxu1 %v2994_v26  ;;  %v737_v26 = vld [vmem:[%s6514_s5 + $0x250] sm:$0xff] }
  0xfc   : > { %v3028_v29 = vpack.c.bf16 %v737_v26, %v729_v25  ;;  %v773_v25 = vld [vmem:[%s6514_s5 + $0x370] sm:$0xff]  ;;  %v782_v26 = vld [vmem:[%s6514_s5 + $0x3b8] sm:$0xff] }
  0xfe   : > { %2997 = vmatpush1.bf16.msra.mxu1 %v2996_v31  ;;  %v745_v31 = vld [vmem:[%s6514_s5 + $0x290] sm:$0xff] }
  0xff   : > { %2999 = vmatprep.subr.bf16.mxu1 %v2998_v32  ;;  %v753_v32 = vld [vmem:[%s6514_s5 + $0x2d0] sm:$0xff] }
 0x100   : > { %v3032_v35 = vpack.c.bf16 %v753_v32, %v745_v31  ;;  %v789_v31 = vld [vmem:[%s6514_s5 + $0x3f0] sm:$0xff] }
 0x102   : > { %3001 = vmatpush1.bf16.msra.mxu1 %v3000_v37  ;;  %v761_v37 = vld [vmem:[%s6514_s5 + $0x310] sm:$0xff] }
 0x103   : > { %3003 = vmatprep.subr.bf16.mxu1 %v3002_v38  ;;  %v769_v38 = vld [vmem:[%s6514_s5 + $0x350] sm:$0xff] }
 0x106   : > { %3005 = vmatpush1.bf16.msra.mxu1 %v3004_v41  ;;  %v3036_v41 = vpack.c.bf16 %v769_v38, %v761_v37 }
 0x107   : > { %3007 = vmatprep.subr.bf16.mxu1 %v3006_v44  ;;  %v785_v44 = vld [vmem:[%s6514_s5 + $0x3d0] sm:$0xff] }
 0x108   : > { %v3040_v47 = vpack.c.bf16 %v785_v44, %v777_v43  ;;  %v1291_v43 = vld [vmem:[%s6516_s7 + $0x68] sm:$0xff]  ;;  %v1289_v44 = vld [vmem:[%s6516_s7 + $0x58] sm:$0xff] }
 0x10a   : > { %3009 = vmatpush1.bf16.msra.mxu1 %v3008_v48  ;;  %v3074_v48 = vpack.c.bf16 %v678_v46, %v670_v45  ;;  %v1293_v46 = vld [vmem:[%s6516_s7 + $0x78] sm:$0xff] }
 0x10b   : > { %3011 = vmatprep.subr.bf16.mxu1 %v3010_v56  ;;  %v693_v56 = vld [vmem:[%s6514_s5 + $0xf0] sm:$0xff]  ;;  %v3366_v49 = vpack.c.bf16 %v1293_v46, %v1289_v44  ;;  %v1330_v44 = vld [vmem:[%s6516_s7 + $0x1a0] sm:$0xff] }
 0x10c   : > { %v3080_v60 = vpack.c.bf16 %v693_v56, %v685_v55  ;;  %v1299_v55 = vld [vmem:[%s6516_s7 + $0xa8] sm:$0xff]  ;;  %v1297_v56 = vld [vmem:[%s6516_s7 + $0x98] sm:$0xff] }
 0x1c0   : > { %v2961_v59 = vpop.f32.mrb[2].mxu1 }
 0x1c1   : > { %v652_v62 = vpop.f32.mrb[3].mxu1  ;;  %v658_v3 = vadd.f32 %v2961_v59, %v2884_v58  ;;  %v710_v59 = vld [vmem:[%s6514_s5 + $0x178] sm:$0xff] }
 0x1c2   : > { %v653_v1 = vadd.f32 %v2884_v58, %v652_v62  ;;  %v702_v58 = vld [vmem:[%s6514_s5 + $0x138] sm:$0xff]  ;;  %v701_v62 = vld [vmem:[%s6514_s5 + $0x130] sm:$0xff] }
 0x1c3   : > { %v4206_v11 = vmax.f32 %v658_v3, 0.0  ;;  %v3082_v61 = vpack.c.bf16 %v710_v59, %v702_v58  ;;  %v1301_v59 = vld [vmem:[%s6516_s7 + $0xb8] sm:$0xff] }
 0x1c4   : > { %v4189_v4 = vmax.f32 %v653_v1, 0.0  ;;  %v726_v1 = vld [vmem:[%s6514_s5 + $0x1f8] sm:$0xff] }
 0x1c5   : > { %v3086_v3 = vpack.c.bf16 %v726_v1, %v718_v0  ;;  %v1296_v0 = vld [vmem:[%s6516_s7 + $0x90] sm:$0xff] }
 0x1c6   : > { %898 = vmatmul.mubr.f32.vlgmr.msra.gmra.mrb[4].mxu1 %v4189_v4  ;;  %1052 = vmatmul.mubr.f32.vlgmr.msra.gmra.mrb[0].mxu0 %v4189_v4  ;;  %v1300_v1 = vld [vmem:[%s6516_s7 + $0xb0] sm:$0xff] }
 0x1c7   : > { %3013 = vmatpush1.bf16.msra.mxu1 %v3012_v2  ;;  %903 = vmatprep.mubr.f32.mxu1 %v3848_v57  ;;  %v3084_v2 = vpack.c.bf16 %v709_v63, %v701_v62  ;;  %v3370_v62 = vpack.c.bf16 %v1301_v59, %v1297_v56  ;;  %v1338_v56 = vld [vmem:[%s6516_s7 + $0x1e0] sm:$0xff] }
 0x1c8   : > { %3015 = vmatprep.subr.bf16.mxu1 %v3014_v5  ;;  %1057 = vmatprep.mubr.f32.mxu0 %v3848_v57  ;;  %v717_v5 = vld [vmem:[%s6514_s5 + $0x1b0] sm:$0xff] }
 0x1c9   : > { %v3088_v9 = vpack.c.bf16 %v725_v6, %v717_v5  ;;  %v1307_v5 = vld [vmem:[%s6516_s7 + $0xe8] sm:$0xff]  ;;  %v1305_v6 = vld [vmem:[%s6516_s7 + $0xd8] sm:$0xff] }
 0x1ca   : > { %904 = vmatmul.mubr.f32.gmra.mrb[6].mxu1 %v4206_v11  ;;  %1058 = vmatmul.mubr.f32.gmra.mrb[2].mxu0 %v4206_v11 }
 0x1cb   : > { %3017 = vmatpush1.bf16.msra.mxu1 %v3016_v10  ;;  %974 = vmatprep.mubr.f32.mxu1 %v3848_v57  ;;  %v3090_v10 = vpack.c.bf16 %v742_v8, %v734_v7  ;;  %v1309_v8 = vld [vmem:[%s6516_s7 + $0xf8] sm:$0xff] }
 0x1cc   : > { %3019 = vmatprep.subr.bf16.mxu1 %v3018_v12  ;;  %v733_v12 = vld [vmem:[%s6514_s5 + $0x230] sm:$0xff] }
 0x1cd   : > { %v3092_v16 = vpack.c.bf16 %v741_v13, %v733_v12  ;;  %v3374_v12 = vpack.c.bf16 %v1309_v8, %v1305_v6  ;;  %v1346_v6 = vld [vmem:[%s6516_s7 + $0x220] sm:$0xff] }
 0x1cf   : > { %3021 = vmatpush1.bf16.msra.mxu1 %v3020_v17  ;;  %v3094_v17 = vpack.c.bf16 %v758_v15, %v750_v14  ;;  %v1304_v14 = vld [vmem:[%s6516_s7 + $0xd0] sm:$0xff] }
 0x1d0   : > { %3023 = vmatprep.subr.bf16.mxu1 %v3022_v18  ;;  %v749_v18 = vld [vmem:[%s6514_s5 + $0x2b0] sm:$0xff] }
 0x1d1   : > { %v3096_v22 = vpack.c.bf16 %v757_v19, %v749_v18  ;;  %v1308_v15 = vld [vmem:[%s6516_s7 + $0xf0] sm:$0xff]  ;;  %v1315_v18 = vld [vmem:[%s6516_s7 + $0x128] sm:$0xff]  ;;  %v1313_v19 = vld [vmem:[%s6516_s7 + $0x118] sm:$0xff] }
 0x1d3   : > { %3025 = vmatpush1.bf16.msra.mxu1 %v3024_v23  ;;  %v3098_v23 = vpack.c.bf16 %v774_v21, %v766_v20  ;;  %v1317_v21 = vld [vmem:[%s6516_s7 + $0x138] sm:$0xff] }
 0x1d4   : > { %3027 = vmatprep.subr.bf16.mxu1 %v3026_v24  ;;  %v765_v24 = vld [vmem:[%s6514_s5 + $0x330] sm:$0xff] }
 0x1d5   : > { %v3100_v28 = vpack.c.bf16 %v773_v25, %v765_v24  ;;  %v3378_v24 = vpack.c.bf16 %v1317_v21, %v1313_v19  ;;  %v1354_v19 = vld [vmem:[%s6516_s7 + $0x260] sm:$0xff] }
 0x1d7   : > { %3029 = vmatpush1.bf16.msra.mxu1 %v3028_v29  ;;  %v3102_v29 = vpack.c.bf16 %v790_v27, %v782_v26  ;;  %v1312_v26 = vld [vmem:[%s6516_s7 + $0x110] sm:$0xff] }
 0x1d8   : > { %3031 = vmatprep.subr.bf16.mxu1 %v3030_v30  ;;  %v781_v30 = vld [vmem:[%s6514_s5 + $0x3b0] sm:$0xff] }
 0x1d9   : > { %v3104_v32 = vpack.c.bf16 %v789_v31, %v781_v30  ;;  %v1316_v27 = vld [vmem:[%s6516_s7 + $0x130] sm:$0xff]  ;;  %v1323_v30 = vld [vmem:[%s6516_s7 + $0x168] sm:$0xff]  ;;  %v1321_v31 = vld [vmem:[%s6516_s7 + $0x158] sm:$0xff] }
 0x1db   : > { %3033 = vmatpush1.bf16.msra.mxu1 %v3032_v35  ;;  %v1281_v35 = vld [vmem:[%s6516_s7 + $0x18] sm:$0xff] }
 0x1dc   : > { %3035 = vmatprep.subr.bf16.mxu1 %v3034_v36  ;;  %v3106_v36 = vpack.c.bf16 %v1283_v34, %v1279_v33  ;;  %v1325_v33 = vld [vmem:[%s6516_s7 + $0x178] sm:$0xff]  ;;  %v1318_v34 = vld [vmem:[%s6516_s7 + $0x140] sm:$0xff] }
 0x1de   : > { %3107 = vmatprep.subr.bf16.mxu0 %v3106_v36  ;;  %v3382_v36 = vpack.c.bf16 %v1325_v33, %v1321_v31  ;;  %v1362_v31 = vld [vmem:[%s6516_s7 + $0x2a0] sm:$0xff] }
 0x1df   : > { %3037 = vmatpush1.bf16.msra.mxu1 %v3036_v41  ;;  %v3364_v41 = vpack.c.bf16 %v1284_v40, %v1280_v39  ;;  %v1331_v39 = vld [vmem:[%s6516_s7 + $0x1a8] sm:$0xff]  ;;  %v1329_v40 = vld [vmem:[%s6516_s7 + $0x198] sm:$0xff] }
 0x1e0   : > { %3039 = vmatprep.subr.bf16.mxu1 %v3038_v42  ;;  %v1287_v42 = vld [vmem:[%s6516_s7 + $0x48] sm:$0xff] }
 0x1e1   : > { %v3110_v45 = vpack.c.bf16 %v1291_v43, %v1287_v42  ;;  %v1333_v42 = vld [vmem:[%s6516_s7 + $0x1b8] sm:$0xff]  ;;  %v1326_v43 = vld [vmem:[%s6516_s7 + $0x180] sm:$0xff] }
 0x1e2   : > { %v3132_v46 = vpack.c.bf16 %v1330_v44, %v1326_v43  ;;  %v1368_v43 = vld [vmem:[%s6516_s7 + $0x2d0] sm:$0xff] }
 0x1e3   : > { %3041 = vmatpush1.bf16.msra.mxu1 %v3040_v47  ;;  %v1286_v47 = vld [vmem:[%s6516_s7 + $0x40] sm:$0xff]  ;;  %v1372_v44 = vld [vmem:[%s6516_s7 + $0x2f0] sm:$0xff] }
 0x1e4   : > { %3075 = vmatprep.subr.bf16.mxu1 %v3074_v48  ;;  %v1290_v48 = vld [vmem:[%s6516_s7 + $0x60] sm:$0xff] }
 0x1e5   : > { %v3112_v50 = vpack.c.bf16 %v1290_v48, %v1286_v47  ;;  %v1328_v47 = vld [vmem:[%s6516_s7 + $0x190] sm:$0xff] }
 0x1e6   : > { %975 = vmatmul.mubr.f32.vlgmr.msra.gmra.mrb[8].mxu1 %v4189_v4  ;;  %v1332_v48 = vld [vmem:[%s6516_s7 + $0x1b0] sm:$0xff] }
 0x1e7   : > { %3077 = vmatpush1.bf16.msra.mxu1 %v3076_v53  ;;  %980 = vmatprep.mubr.f32.mxu1 %v3848_v57  ;;  %v3368_v53 = vpack.c.bf16 %v1292_v52, %v1288_v51  ;;  %v1339_v51 = vld [vmem:[%s6516_s7 + $0x1e8] sm:$0xff]  ;;  %v1337_v52 = vld [vmem:[%s6516_s7 + $0x1d8] sm:$0xff] }
 0x1e8   : > { %3079 = vmatprep.subr.bf16.mxu1 %v3078_v54  ;;  %v1295_v54 = vld [vmem:[%s6516_s7 + $0x88] sm:$0xff] }
 0x1e9   : > { %v3114_v58 = vpack.c.bf16 %v1299_v55, %v1295_v54  ;;  %v1341_v54 = vld [vmem:[%s6516_s7 + $0x1f8] sm:$0xff]  ;;  %v1334_v55 = vld [vmem:[%s6516_s7 + $0x1c0] sm:$0xff] }
 0x1ea   : > { %981 = vmatmul.mubr.f32.gmra.mrb[10].mxu1 %v4206_v11  ;;  %v3136_v59 = vpack.c.bf16 %v1338_v56, %v1334_v55  ;;  %v1376_v55 = vld [vmem:[%s6516_s7 + $0x310] sm:$0xff] }
 0x1eb   : > { %3081 = vmatpush1.bf16.msra.mxu1 %v3080_v60  ;;  %1128 = vmatprep.mubr.f32.mxu1 %v3848_v57  ;;  %v1294_v60 = vld [vmem:[%s6516_s7 + $0x80] sm:$0xff]  ;;  %v1380_v56 = vld [vmem:[%s6516_s7 + $0x330] sm:$0xff] }
 0x1ec   : > { %3083 = vmatprep.subr.bf16.mxu1 %v3082_v61  ;;  %v1298_v61 = vld [vmem:[%s6516_s7 + $0xa0] sm:$0xff] }
 0x1ed   : > { %v3116_v63 = vpack.c.bf16 %v1298_v61, %v1294_v60  ;;  %v1336_v60 = vld [vmem:[%s6516_s7 + $0x1d0] sm:$0xff] }
 0x1ee   : > { %v1340_v61 = vld [vmem:[%s6516_s7 + $0x1f0] sm:$0xff] }
 0x1ef   : > { %3085 = vmatpush1.bf16.msra.mxu1 %v3084_v2  ;;  %v3372_v2 = vpack.c.bf16 %v1300_v1, %v1296_v0  ;;  %v1347_v0 = vld [vmem:[%s6516_s7 + $0x228] sm:$0xff]  ;;  %v1345_v1 = vld [vmem:[%s6516_s7 + $0x218] sm:$0xff] }
 0x1f0   : > { %3087 = vmatprep.subr.bf16.mxu1 %v3086_v3  ;;  %v1303_v3 = vld [vmem:[%s6516_s7 + $0xc8] sm:$0xff] }
 0x1f1   : > { %v3118_v7 = vpack.c.bf16 %v1307_v5, %v1303_v3  ;;  %v1349_v3 = vld [vmem:[%s6516_s7 + $0x238] sm:$0xff]  ;;  %v1342_v5 = vld [vmem:[%s6516_s7 + $0x200] sm:$0xff] }
 0x1f2   : > { %v3140_v8 = vpack.c.bf16 %v1346_v6, %v1342_v5  ;;  %v1384_v5 = vld [vmem:[%s6516_s7 + $0x350] sm:$0xff] }
 0x1f3   : > { %3089 = vmatpush1.bf16.msra.mxu1 %v3088_v9  ;;  %v1302_v9 = vld [vmem:[%s6516_s7 + $0xc0] sm:$0xff]  ;;  %v1388_v6 = vld [vmem:[%s6516_s7 + $0x370] sm:$0xff] }
 0x1f4   : > { %3091 = vmatprep.subr.bf16.mxu1 %v3090_v10  ;;  %v1306_v10 = vld [vmem:[%s6516_s7 + $0xe0] sm:$0xff] }
 0x1f5   : > { %v3120_v13 = vpack.c.bf16 %v1306_v10, %v1302_v9  ;;  %v1344_v9 = vld [vmem:[%s6516_s7 + $0x210] sm:$0xff] }
 0x1f6   : > { %v1348_v10 = vld [vmem:[%s6516_s7 + $0x230] sm:$0xff] }
 0x1f7   : > { %3093 = vmatpush1.bf16.msra.mxu1 %v3092_v16  ;;  %v3376_v16 = vpack.c.bf16 %v1308_v15, %v1304_v14  ;;  %v1355_v14 = vld [vmem:[%s6516_s7 + $0x268] sm:$0xff]  ;;  %v1353_v15 = vld [vmem:[%s6516_s7 + $0x258] sm:$0xff] }
 0x1f8   : > { %3095 = vmatprep.subr.bf16.mxu1 %v3094_v17  ;;  %v1311_v17 = vld [vmem:[%s6516_s7 + $0x108] sm:$0xff] }
 0x1f9   : > { %v3122_v20 = vpack.c.bf16 %v1315_v18, %v1311_v17  ;;  %v1357_v17 = vld [vmem:[%s6516_s7 + $0x278] sm:$0xff]  ;;  %v1350_v18 = vld [vmem:[%s6516_s7 + $0x240] sm:$0xff] }
 0x1fa   : > { %v3144_v21 = vpack.c.bf16 %v1354_v19, %v1350_v18  ;;  %v1392_v18 = vld [vmem:[%s6516_s7 + $0x390] sm:$0xff] }
 0x1fb   : > { %3097 = vmatpush1.bf16.msra.mxu1 %v3096_v22  ;;  %v1310_v22 = vld [vmem:[%s6516_s7 + $0x100] sm:$0xff]  ;;  %v1396_v19 = vld [vmem:[%s6516_s7 + $0x3b0] sm:$0xff] }
 0x1fc   : > { %3099 = vmatprep.subr.bf16.mxu1 %v3098_v23  ;;  %v1314_v23 = vld [vmem:[%s6516_s7 + $0x120] sm:$0xff] }
 0x1fd   : > { %v3124_v25 = vpack.c.bf16 %v1314_v23, %v1310_v22  ;;  %v1352_v22 = vld [vmem:[%s6516_s7 + $0x250] sm:$0xff] }
 0x1fe   : > { %v1356_v23 = vld [vmem:[%s6516_s7 + $0x270] sm:$0xff] }
 0x1ff   : > { %3101 = vmatpush1.bf16.msra.mxu1 %v3100_v28  ;;  %v3380_v28 = vpack.c.bf16 %v1316_v27, %v1312_v26  ;;  %v1363_v26 = vld [vmem:[%s6516_s7 + $0x2a8] sm:$0xff]  ;;  %v1361_v27 = vld [vmem:[%s6516_s7 + $0x298] sm:$0xff] }
 0x200   : > { %3103 = vmatprep.subr.bf16.mxu1 %v3102_v29  ;;  %v1319_v29 = vld [vmem:[%s6516_s7 + $0x148] sm:$0xff] }
 0x203   : > { %3105 = vmatpush1.bf16.msra.mxu1 %v3104_v32  ;;  %v3126_v32 = vpack.c.bf16 %v1323_v30, %v1319_v29  ;;  %v1365_v29 = vld [vmem:[%s6516_s7 + $0x2b8] sm:$0xff]  ;;  %v1358_v30 = vld [vmem:[%s6516_s7 + $0x280] sm:$0xff] }
 0x204   : > { %v3148_v33 = vpack.c.bf16 %v1362_v31, %v1358_v30  ;;  %v1400_v30 = vld [vmem:[%s6516_s7 + $0x3d0] sm:$0xff] }
 0x205   : > { %v1404_v31 = vld [vmem:[%s6516_s7 + $0x3f0] sm:$0xff] }
 0x206   : > { %1129 = vmatmul.mubr.f32.vlgmr.msra.gmra.mrb[12].mxu1 %v4189_v4  ;;  %v1285_v4 = vld [vmem:[%s6516_s7 + $0x38] sm:$0xff] }
 0x207   : > { %1134 = vmatprep.mubr.f32.mxu1 %v3848_v57  ;;  %v1278_v57 = vld [vmem:[%s6516_s7] sm:$0xff]  ;;  %v3362_v37 = vpack.c.bf16 %v1285_v4, %v1281_v35 }
 0x208   : > { %v1322_v35 = vld [vmem:[%s6516_s7 + $0x160] sm:$0xff] }
 0x209   : > { %3363 = vmatprep.subr.bf16.mxu1 %v3362_v37  ;;  %v3128_v4 = vpack.c.bf16 %v1322_v35, %v1318_v34  ;;  %v1360_v34 = vld [vmem:[%s6516_s7 + $0x290] sm:$0xff] }
 0x20a   : > { %1135 = vmatmul.mubr.f32.gmra.mrb[14].mxu1 %v4206_v11  ;;  %v1282_v11 = vld [vmem:[%s6516_s7 + $0x20] sm:$0xff]  ;;  %v1364_v35 = vld [vmem:[%s6516_s7 + $0x2b0] sm:$0xff] }
 0x20b   : > { %v3108_v38 = vpack.c.bf16 %v1282_v11, %v1278_v57  ;;  %3365 = vmatpush1.bf16.msra.mxu1 %v3364_v41  ;;  %v1320_v57 = vld [vmem:[%s6516_s7 + $0x150] sm:$0xff] }
 0x20c   : > { %3367 = vmatprep.subr.bf16.mxu1 %v3366_v49  ;;  %v1324_v11 = vld [vmem:[%s6516_s7 + $0x170] sm:$0xff]  ;;  %v3388_v49 = vpack.c.bf16 %v1332_v48, %v1328_v47  ;;  %v1379_v47 = vld [vmem:[%s6516_s7 + $0x328] sm:$0xff]  ;;  %v1377_v48 = vld [vmem:[%s6516_s7 + $0x318] sm:$0xff] }
 0x20d   : > { %3109 = vmatpush1.bf16.msra.mxu0 %v3108_v38  ;;  %v3384_v37 = vpack.c.bf16 %v1324_v11, %v1320_v57  ;;  %v1327_v38 = vld [vmem:[%s6516_s7 + $0x188] sm:$0xff]  ;;  %v1369_v11 = vld [vmem:[%s6516_s7 + $0x2d8] sm:$0xff] }
 0x20e   : > { %3111 = vmatprep.subr.bf16.mxu0 %v3110_v45  ;;  %v3130_v41 = vpack.c.bf16 %v1331_v39, %v1327_v38  ;;  %v3386_v45 = vpack.c.bf16 %v1333_v42, %v1329_v40  ;;  %v1371_v57 = vld [vmem:[%s6516_s7 + $0x2e8] sm:$0xff]  ;;  %v1373_v38 = vld [vmem:[%s6516_s7 + $0x2f8] sm:$0xff]  ;;  %v1366_v39 = vld [vmem:[%s6516_s7 + $0x2c0] sm:$0xff] }
 0x20f   : > { %3369 = vmatpush1.bf16.msra.mxu1 %v3368_v53  ;;  %v1370_v40 = vld [vmem:[%s6516_s7 + $0x2e0] sm:$0xff] }
 0x210   : > { %3371 = vmatprep.subr.bf16.mxu1 %v3370_v62  ;;  %v3392_v62 = vpack.c.bf16 %v1340_v61, %v1336_v60  ;;  %v3152_v42 = vpack.c.bf16 %v1370_v40, %v1366_v39  ;;  %v1387_v60 = vld [vmem:[%s6516_s7 + $0x368] sm:$0xff]  ;;  %v1385_v61 = vld [vmem:[%s6516_s7 + $0x358] sm:$0xff]  ;;  %v4786_v40 = vld [vmem:[%s6515_s6] sm:$0xff] }
 0x211   : > { %3113 = vmatpush1.bf16.msra.mxu0 %v3112_v50  ;;  %v1335_v50 = vld [vmem:[%s6516_s7 + $0x1c8] sm:$0xff] }
 0x212   : > { %3115 = vmatprep.subr.bf16.mxu0 %v3114_v58  ;;  %v3134_v53 = vpack.c.bf16 %v1339_v51, %v1335_v50  ;;  %v3390_v58 = vpack.c.bf16 %v1341_v54, %v1337_v52  ;;  %v1381_v50 = vld [vmem:[%s6516_s7 + $0x338] sm:$0xff]  ;;  %v1374_v51 = vld [vmem:[%s6516_s7 + $0x300] sm:$0xff] }
 0x213   : > { %3373 = vmatpush1.bf16.msra.mxu1 %v3372_v2  ;;  %v1378_v52 = vld [vmem:[%s6516_s7 + $0x320] sm:$0xff] }
 0x214   : > { %3375 = vmatprep.subr.bf16.mxu1 %v3374_v12  ;;  %v3396_v12 = vpack.c.bf16 %v1348_v10, %v1344_v9  ;;  %v3156_v54 = vpack.c.bf16 %v1378_v52, %v1374_v51  ;;  %v1395_v9 = vld [vmem:[%s6516_s7 + $0x3a8] sm:$0xff]  ;;  %v1393_v10 = vld [vmem:[%s6516_s7 + $0x398] sm:$0xff] }
 0x215   : > { %3117 = vmatpush1.bf16.msra.mxu0 %v3116_v63  ;;  %v1343_v63 = vld [vmem:[%s6516_s7 + $0x208] sm:$0xff] }
 0x216   : > { %3119 = vmatprep.subr.bf16.mxu0 %v3118_v7  ;;  %v3138_v2 = vpack.c.bf16 %v1347_v0, %v1343_v63  ;;  %v3394_v7 = vpack.c.bf16 %v1349_v3, %v1345_v1  ;;  %v1389_v63 = vld [vmem:[%s6516_s7 + $0x378] sm:$0xff]  ;;  %v1382_v0 = vld [vmem:[%s6516_s7 + $0x340] sm:$0xff] }
 0x217   : > { %3377 = vmatpush1.bf16.msra.mxu1 %v3376_v16  ;;  %v1386_v1 = vld [vmem:[%s6516_s7 + $0x360] sm:$0xff] }
 0x218   : > { %3379 = vmatprep.subr.bf16.mxu1 %v3378_v24  ;;  %v3400_v24 = vpack.c.bf16 %v1356_v23, %v1352_v22  ;;  %v3160_v3 = vpack.c.bf16 %v1386_v1, %v1382_v0  ;;  %v1403_v22 = vld [vmem:[%s6516_s7 + $0x3e8] sm:$0xff]  ;;  %v1401_v23 = vld [vmem:[%s6516_s7 + $0x3d8] sm:$0xff] }
 0x219   : > { %3121 = vmatpush1.bf16.msra.mxu0 %v3120_v13  ;;  %v1351_v13 = vld [vmem:[%s6516_s7 + $0x248] sm:$0xff] }
 0x21a   : > { %3123 = vmatprep.subr.bf16.mxu0 %v3122_v20  ;;  %v3142_v16 = vpack.c.bf16 %v1355_v14, %v1351_v13  ;;  %v3398_v20 = vpack.c.bf16 %v1357_v17, %v1353_v15  ;;  %v1397_v13 = vld [vmem:[%s6516_s7 + $0x3b8] sm:$0xff]  ;;  %v1390_v14 = vld [vmem:[%s6516_s7 + $0x380] sm:$0xff] }
 0x21b   : > { %3381 = vmatpush1.bf16.msra.mxu1 %v3380_v28  ;;  %v1394_v15 = vld [vmem:[%s6516_s7 + $0x3a0] sm:$0xff] }
 0x21c   : > { %3383 = vmatprep.subr.bf16.mxu1 %v3382_v36  ;;  %v3404_v36 = vpack.c.bf16 %v1364_v35, %v1360_v34  ;;  %v3164_v17 = vpack.c.bf16 %v1394_v15, %v1390_v14  ;;  %v1411_v34 = vld [vmem:[%s6516_s7 + $0x428] sm:$0xff]  ;;  %v1409_v35 = vld [vmem:[%s6516_s7 + $0x418] sm:$0xff] }
 0x21d   : > { %3125 = vmatpush1.bf16.msra.mxu0 %v3124_v25  ;;  %v1359_v25 = vld [vmem:[%s6516_s7 + $0x288] sm:$0xff] }
 0x21e   : > { %3127 = vmatprep.subr.bf16.mxu0 %v3126_v32  ;;  %v3146_v28 = vpack.c.bf16 %v1363_v26, %v1359_v25  ;;  %v3402_v32 = vpack.c.bf16 %v1365_v29, %v1361_v27  ;;  %v1405_v25 = vld [vmem:[%s6516_s7 + $0x3f8] sm:$0xff]  ;;  %v1398_v26 = vld [vmem:[%s6516_s7 + $0x3c0] sm:$0xff] }
 0x21f   : > { %3385 = vmatpush1.bf16.msra.mxu1 %v3384_v37  ;;  %v1402_v27 = vld [vmem:[%s6516_s7 + $0x3e0] sm:$0xff] }
 0x220   : > { %3387 = vmatprep.subr.bf16.mxu1 %v3386_v45  ;;  %v3408_v45 = vpack.c.bf16 %v1372_v44, %v1368_v43  ;;  %v3168_v29 = vpack.c.bf16 %v1402_v27, %v1398_v26 }
 0x221   : > { %3129 = vmatpush1.bf16.msra.mxu0 %v3128_v4  ;;  %v1367_v4 = vld [vmem:[%s6516_s7 + $0x2c8] sm:$0xff] }
 0x222   : > { %3131 = vmatprep.subr.bf16.mxu0 %v3130_v41  ;;  %v3150_v37 = vpack.c.bf16 %v1371_v57, %v1367_v4  ;;  %v3406_v41 = vpack.c.bf16 %v1373_v38, %v1369_v11  ;;  %v1413_v4 = vld [vmem:[%s6516_s7 + $0x438] sm:$0xff]  ;;  %v793_v11 = vlaneseq }
 0x223   : > { %3389 = vmatpush1.bf16.msra.mxu1 %v3388_v49  ;;  %v3426_v57 = vpack.c.bf16 %v1413_v4, %v1409_v35 }
 0x224   : > { %3391 = vmatprep.subr.bf16.mxu1 %v3390_v58  ;;  %v3412_v58 = vpack.c.bf16 %v1380_v56, %v1376_v55 }
 0x225   : > { %3133 = vmatpush1.bf16.msra.mxu0 %v3132_v46  ;;  %v1375_v46 = vld [vmem:[%s6516_s7 + $0x308] sm:$0xff] }
 0x226   : > { %3135 = vmatprep.subr.bf16.mxu0 %v3134_v53  ;;  %v3154_v49 = vpack.c.bf16 %v1379_v47, %v1375_v46  ;;  %v3410_v53 = vpack.c.bf16 %v1381_v50, %v1377_v48 }
 0x227   : > { %3393 = vmatpush1.bf16.msra.mxu1 %v3392_v62 }
 0x228   : > { %3395 = vmatprep.subr.bf16.mxu1 %v3394_v7  ;;  %v3416_v7 = vpack.c.bf16 %v1388_v6, %v1384_v5 }
 0x229   : > { %3137 = vmatpush1.bf16.msra.mxu0 %v3136_v59  ;;  %v1383_v59 = vld [vmem:[%s6516_s7 + $0x348] sm:$0xff] }
 0x22a   : > { %3139 = vmatprep.subr.bf16.mxu0 %v3138_v2  ;;  %v3158_v62 = vpack.c.bf16 %v1387_v60, %v1383_v59  ;;  %v3414_v2 = vpack.c.bf16 %v1389_v63, %v1385_v61 }
 0x22b   : > { %3397 = vmatpush1.bf16.msra.mxu1 %v3396_v12 }
 0x22c   : > { %3399 = vmatprep.subr.bf16.mxu1 %v3398_v20  ;;  %v3420_v20 = vpack.c.bf16 %v1396_v19, %v1392_v18 }
 0x22d   : > { %3141 = vmatpush1.bf16.msra.mxu0 %v3140_v8  ;;  %v1391_v8 = vld [vmem:[%s6516_s7 + $0x388] sm:$0xff] }
 0x22e   : > { %3143 = vmatprep.subr.bf16.mxu0 %v3142_v16  ;;  %v3162_v12 = vpack.c.bf16 %v1395_v9, %v1391_v8  ;;  %v3418_v16 = vpack.c.bf16 %v1397_v13, %v1393_v10 }
 0x22f   : > { %3401 = vmatpush1.bf16.msra.mxu1 %v3400_v24 }
 0x230   : > { %3403 = vmatprep.subr.bf16.mxu1 %v3402_v32  ;;  %v3424_v32 = vpack.c.bf16 %v1404_v31, %v1400_v30 }
 0x231   : > { %3145 = vmatpush1.bf16.msra.mxu0 %v3144_v21  ;;  %v1399_v21 = vld [vmem:[%s6516_s7 + $0x3c8] sm:$0xff] }
 0x232   : > { %3147 = vmatprep.subr.bf16.mxu0 %v3146_v28  ;;  %v3166_v24 = vpack.c.bf16 %v1403_v22, %v1399_v21  ;;  %v3422_v28 = vpack.c.bf16 %v1405_v25, %v1401_v23 }
 0x233   : > { %3405 = vmatpush1.bf16.msra.mxu1 %v3404_v36 }
 0x234   : > { %3407 = vmatprep.subr.bf16.mxu1 %v3406_v41 }
 0x235   : > { %3149 = vmatpush1.bf16.msra.mxu0 %v3148_v33  ;;  %v1407_v33 = vld [vmem:[%s6516_s7 + $0x408] sm:$0xff] }
 0x236   : > { %3151 = vmatprep.subr.bf16.mxu0 %v3150_v37  ;;  %v3170_v36 = vpack.c.bf16 %v1411_v34, %v1407_v33  ;;  %v4777_v37 = vshrl.u32 %v793_v11, 7 }
 0x237   : > { %3409 = vmatpush1.bf16.msra.mxu1 %v3408_v45 }
 0x238   : > { %3411 = vmatprep.subr.bf16.mxu1 %v3410_v53  ;;  %v4780_v38 = vsub.s32 0, %v4777_v37  ;;  %v811_v39 = vsub.s32 4, %v4777_v37  ;;  %v4789_v41 = vsub.s32 1, %v4777_v37 }
 0x239   : > { %3153 = vmatpush1.bf16.msra.mxu0 %v3152_v42  ;;  %v815_v42 = vsub.s32 5, %v4777_v37 }
 0x23a   : > { %3155 = vmatprep.subr.bf16.mxu0 %v3154_v49  ;;  %v796_v43 = vrot.slane %v4786_v40, %v4780_v38  ;;  %v812_v44 = vrot.slane %v4786_v40, %v811_v39  ;;  %v800_v47 = vrot.slane %v4786_v40, %v4789_v41 }
 0x23b   : > { %3413 = vmatpush1.bf16.msra.mxu1 %v3412_v58  ;;  %v816_v48 = vrot.slane %v4786_v40, %v815_v42 }
 0x23c   : > { %3415 = vmatprep.subr.bf16.mxu1 %v3414_v2 }
 0x23d   : > { %3157 = vmatpush1.bf16.msra.mxu0 %v3156_v54 }
 0x23e   : > { %3159 = vmatprep.subr.bf16.mxu0 %v3158_v62 }
 0x23f   : > { %3417 = vmatpush1.bf16.msra.mxu1 %v3416_v7 }
 0x240   : > { %3419 = vmatprep.subr.bf16.mxu1 %v3418_v16 }
 0x241   : > { %3161 = vmatpush1.bf16.msra.mxu0 %v3160_v3 }
 0x242   : > { %3163 = vmatprep.subr.bf16.mxu0 %v3162_v12 }
 0x243   : > { %3421 = vmatpush1.bf16.msra.mxu1 %v3420_v20 }
 0x244   : > { %3423 = vmatprep.subr.bf16.mxu1 %v3422_v28 }
 0x245   : > { %3165 = vmatpush1.bf16.msra.mxu0 %v3164_v17 }
 0x246   : > { %3167 = vmatprep.subr.bf16.mxu0 %v3166_v24 }
 0x247   : > { %3425 = vmatpush1.bf16.msra.mxu1 %v3424_v32 }
 0x248   : > { %3427 = vmatprep.subr.bf16.mxu1 %v3426_v57 }
 0x249   : > { %3169 = vmatpush1.bf16.msra.mxu0 %v3168_v29 }
 0x24a   : > { %3171 = vmatprep.subr.bf16.mxu0 %v3170_v36 }
 0x299   : > { %v899_v45 = vpop.f32.mrb[4].mxu1  ;;  %v1053_v46 = vpop.f32.mrb[0].mxu0 }
 0x29a   : > { %v901_v49 = vpop.f32.mrb[5].mxu1  ;;  %v1055_v50 = vpop.f32.mrb[1].mxu0  ;;  %v900_v51 = vadd.f32 %v899_v45, %v796_v43  ;;  %v1054_v52 = vadd.f32 %v1053_v46, %v812_v44 }
 0x29b   : > { %v902_v53 = vadd.f32 %v901_v49, %v800_v47  ;;  %v1056_v54 = vadd.f32 %v1055_v50, %v816_v48 }
 0x29c   : > { %v1141_v0 = vmax.f32 %v900_v51, 0.0  ;;  %v1145_v1 = vmax.f32 %v1054_v52, 0.0 }
 0x29d   : > { %v905_v55 = vpop.f32.mrb[6].mxu1  ;;  %v1059_v56 = vpop.f32.mrb[2].mxu0  ;;  %v1142_v5 = vmax.f32 %v902_v53, 0.0  ;;  %v1146_v6 = vmax.f32 %v1056_v54, 0.0 }
 0x29e   : > { %v906_v58 = vadd.f32 %v905_v55, %v796_v43  ;;  %v1060_v59 = vadd.f32 %v1059_v56, %v812_v44  ;;  %v907_v60 = vpop.f32.mrb[7].mxu1  ;;  %v1061_v61 = vpop.f32.mrb[3].mxu0  ;;  %v4809_v43 = vsub.s32 2, %v4777_v37  ;;  %v4812_v44 = vsub.s32 3, %v4777_v37 }
 0x29f   : > { %v908_v62 = vadd.f32 %v907_v60, %v800_v47  ;;  %v1062_v63 = vadd.f32 %v1061_v61, %v816_v48 }
 0x2a0   : > { %v1149_v2 = vmax.f32 %v906_v58, 0.0  ;;  %v1153_v3 = vmax.f32 %v1060_v59, 0.0  ;;  %v804_v45 = vrot.slane %v4786_v40, %v4809_v43  ;;  %v808_v47 = vrot.slane %v4786_v40, %v4812_v44 }
 0x2a1   : > { %v1150_v7 = vmax.f32 %v908_v62, 0.0  ;;  %v1154_v8 = vmax.f32 %v1062_v63, 0.0 }
 0x2a2   : > { %v1158_v9 = vmax.f32 %v1141_v0, %v1149_v2  ;;  %v1186_v10 = vmax.f32 %v1145_v1, %v1153_v3  ;;  %v3849_v1 = vmov 1966171168  }
 0x2a3   : > { %v1165_v12 = vmax.f32 %v1142_v5, %v1150_v7  ;;  %v1193_v13 = vmax.f32 %v1146_v6, %v1154_v8  ;;  %v1227_v2 = vunpack.c.l.s4 %v3849_v1  ;;  %v1406_v1 = vld [vmem:[%s6516_s7 + $0x400] sm:$0xff] }
 0x2a4   : > { %v1159_v14 = vrot.slane %v1158_v9, 4  ;;  %v1187_v15 = vrot.slane %v1186_v10, 4 }
 0x2a5   : > { %v1166_v16 = vrot.slane %v1165_v12, 4  ;;  %v1194_v17 = vrot.slane %v1193_v13, 4  ;;  %v1228_v8 = vunpack.c.0.s8 %v1227_v2  ;;  %v1410_v2 = vld [vmem:[%s6516_s7 + $0x420] sm:$0xff] }
 0x2a6   : > { %v1160_v18 = vmax.f32 %v1158_v9, %v1159_v14  ;;  %v1188_v19 = vmax.f32 %v1186_v10, %v1187_v15 }
 0x2a7   : > { %v1167_v20 = vmax.f32 %v1165_v12, %v1166_v16  ;;  %v1195_v21 = vmax.f32 %v1193_v13, %v1194_v17  ;;  %v1231_v14 = vsub.s32 %v1228_v8, %v4777_v37 }
 0x2a8   : > { %v1161_v22 = vrot.slane %v1160_v18, 2  ;;  %v1189_v23 = vrot.slane %v1188_v19, 2 }
 0x2a9   : > { %v1168_v24 = vrot.slane %v1167_v20, 2  ;;  %v1196_v25 = vrot.slane %v1195_v21, 2 }
 0x2aa   : > { %v1162_v26 = vmax.f32 %v1160_v18, %v1161_v22  ;;  %v1190_v27 = vmax.f32 %v1188_v19, %v1189_v23  ;;  %v819_v19 = vsub.s32 6, %v4777_v37 }
 0x2ab   : > { %v1169_v28 = vmax.f32 %v1167_v20, %v1168_v24  ;;  %v1197_v29 = vmax.f32 %v1195_v21, %v1196_v25  ;;  %v823_v21 = vsub.s32 7, %v4777_v37  ;;  %v2436_v37 = vld [vmem:[%s6518_s9 + $0x58] sm:$0xff] }
 0x2ac   : > { %v1163_v30 = vrot.slane %v1162_v26, 1  ;;  %v1191_v31 = vrot.slane %v1190_v27, 1  ;;  %v820_v22 = vrot.slane %v4786_v40, %v819_v19 }
 0x2ad   : > { %v1170_v32 = vrot.slane %v1169_v28, 1  ;;  %v1198_v33 = vrot.slane %v1197_v29, 1  ;;  %v824_v24 = vrot.slane %v4786_v40, %v823_v21 }
 0x2ae   : > { %v1164_v34 = vmax.f32 %v1162_v26, %v1163_v30  ;;  %v4802_v35 = vmax.f32 %v1190_v27, %v1191_v31 }
 0x2af   : > { %v1171_v36 = vmax.f32 %v1169_v28, %v1170_v32  ;;  %v4804_v4 = vmax.f32 %v1197_v29, %v1198_v33 }
 0x2b1   : > { %v1222_v57 = vcombine.low %v1164_v34, %v1171_v36  ;;  %v1224_v11 = vcombine.low %v4802_v35, %v4804_v4  ;;  %v1412_v35 = vld [vmem:[%s6516_s7 + $0x430] sm:$0xff] }
 0x2b3   : > { %v1232_v17 = vrot.slane %v1222_v57, %v1231_v14 }
 0x2b9   : > { %v976_v46 = vpop.f32.mrb[8].mxu1 }
 0x2ba   : > { %v978_v48 = vpop.f32.mrb[9].mxu1  ;;  %v977_v49 = vadd.f32 %v976_v46, %v804_v45 }
 0x2bb   : > { %v979_v50 = vadd.f32 %v978_v48, %v808_v47 }
 0x2bc   : > { %v1143_v55 = vmax.f32 %v977_v49, 0.0 }
 0x2bd   : > { %v982_v51 = vpop.f32.mrb[10].mxu1  ;;  %v1144_v58 = vmax.f32 %v979_v50, 0.0 }
 0x2be   : > { %v983_v52 = vadd.f32 %v982_v51, %v804_v45  ;;  %v984_v53 = vpop.f32.mrb[11].mxu1 }
 0x2bf   : > { %v985_v54 = vadd.f32 %v984_v53, %v808_v47 }
 0x2c0   : > { %v1151_v56 = vmax.f32 %v983_v52, 0.0 }
 0x2c1   : > { %v1152_v59 = vmax.f32 %v985_v54, 0.0 }
 0x2c2   : > { %v1172_v60 = vmax.f32 %v1143_v55, %v1151_v56 }
 0x2c3   : > { %v1179_v61 = vmax.f32 %v1144_v58, %v1152_v59  ;;  %v1246_v59 = vrot.slane %v1224_v11, %v1231_v14  ;;  %v1415_v11 = vld [vmem:[%s6516_s7 + $0x448] sm:$0xff] }
 0x2c4   : > { %v1173_v62 = vrot.slane %v1172_v60, 4 }
 0x2c5   : > { %v1180_v63 = vrot.slane %v1179_v61, 4 }
 0x2c6   : > { %v1174_v0 = vmax.f32 %v1172_v60, %v1173_v62 }
 0x2c7   : > { %v1181_v3 = vmax.f32 %v1179_v61, %v1180_v63 }
 0x2c8   : > { %v1175_v5 = vrot.slane %v1174_v0, 2 }
 0x2c9   : > { %v1182_v6 = vrot.slane %v1181_v3, 2 }
 0x2ca   : > { %v1176_v7 = vmax.f32 %v1174_v0, %v1175_v5  ;;  %v1419_v5 = vld [vmem:[%s6516_s7 + $0x468] sm:$0xff] }
 0x2cb   : > { %v1183_v9 = vmax.f32 %v1181_v3, %v1182_v6  ;;  %v1408_v3 = vld [vmem:[%s6516_s7 + $0x410] sm:$0xff]  ;;  %v1417_v6 = vld [vmem:[%s6516_s7 + $0x458] sm:$0xff] }
 0x2cc   : > { %v1177_v10 = vrot.slane %v1176_v7, 1 }
 0x2cd   : > { %v1184_v12 = vrot.slane %v1183_v9, 1 }
 0x2ce   : > { %v1178_v13 = vmax.f32 %v1176_v7, %v1177_v10  ;;  %v1421_v7 = vld [vmem:[%s6516_s7 + $0x478] sm:$0xff]  ;;  %v3172_v10 = vpack.c.bf16 %v1410_v2, %v1406_v1  ;;  %v1444_v1 = vld [vmem:[%s6516_s7 + $0x530] sm:$0xff]  ;;  %v1447_v2 = vld [vmem:[%s6516_s7 + $0x548] sm:$0xff] }
 0x2cf   : > { %v1185_v15 = vmax.f32 %v1183_v9, %v1184_v12  ;;  %v3428_v12 = vpack.c.bf16 %v1412_v35, %v1408_v3  ;;  %v1451_v3 = vld [vmem:[%s6516_s7 + $0x568] sm:$0xff]  ;;  %v1449_v35 = vld [vmem:[%s6516_s7 + $0x558] sm:$0xff] }
 0x2d1   : > { %v1223_v16 = vcombine.low %v1178_v13, %v1185_v15  ;;  %v1414_v13 = vld [vmem:[%s6516_s7 + $0x440] sm:$0xff]  ;;  %v1416_v15 = vld [vmem:[%s6516_s7 + $0x450] sm:$0xff] }
 0x2d3   : > { %v1239_v18 = vrot.slane %v1223_v16, %v1231_v14  ;;  %v1420_v16 = vld [vmem:[%s6516_s7 + $0x470] sm:$0xff] }
 0x2d5   : > { %v1254_v20 = vcombine.low %v1232_v17, %v1239_v18  ;;  %v1423_v17 = vld [vmem:[%s6516_s7 + $0x488] sm:$0xff]  ;;  %v3174_v18 = vpack.c.bf16 %v1419_v5, %v1415_v11  ;;  %v1453_v11 = vld [vmem:[%s6516_s7 + $0x578] sm:$0xff] }
 0x2d7   : > { %v1262_v62 = vrot.slane %v1254_v20, %v1231_v14  ;;  %v3430_v20 = vpack.c.bf16 %v1421_v7, %v1417_v6  ;;  %v1446_v7 = vld [vmem:[%s6516_s7 + $0x540] sm:$0xff] }
 0x2d9   : > { %v1130_v23 = vpop.f32.mrb[12].mxu1 }
 0x2da   : > { %v1132_v25 = vpop.f32.mrb[13].mxu1  ;;  %v1131_v26 = vadd.f32 %v1130_v23, %v820_v22  ;;  %v1425_v23 = vld [vmem:[%s6516_s7 + $0x498] sm:$0xff] }
 0x2db   : > { %v1133_v27 = vadd.f32 %v1132_v25, %v824_v24 }
 0x2dc   : > { %v1147_v32 = vmax.f32 %v1131_v26, 0.0 }
 0x2dd   : > { %v1136_v28 = vpop.f32.mrb[14].mxu1  ;;  %v1148_v34 = vmax.f32 %v1133_v27, 0.0  ;;  %v3432_v27 = vpack.c.bf16 %v1420_v16, %v1416_v15  ;;  %v1459_v15 = vld [vmem:[%s6516_s7 + $0x5a8] sm:$0xff]  ;;  %v1457_v16 = vld [vmem:[%s6516_s7 + $0x598] sm:$0xff] }
 0x2de   : > { %v1137_v29 = vadd.f32 %v1136_v28, %v820_v22  ;;  %v1138_v30 = vpop.f32.mrb[15].mxu1  ;;  %v1427_v22 = vld [vmem:[%s6516_s7 + $0x4a8] sm:$0xff]  ;;  %v1422_v28 = vld [vmem:[%s6516_s7 + $0x480] sm:$0xff] }
 0x2df   : > { %v1139_v31 = vadd.f32 %v1138_v30, %v824_v24  ;;  %v1429_v24 = vld [vmem:[%s6516_s7 + $0x4b8] sm:$0xff]  ;;  %v3178_v30 = vpack.c.bf16 %v1427_v22, %v1423_v17  ;;  %v1454_v22 = vld [vmem:[%s6516_s7 + $0x580] sm:$0xff] }
 0x2e0   : > { %v1155_v33 = vmax.f32 %v1137_v29, 0.0  ;;  %v1426_v29 = vld [vmem:[%s6516_s7 + $0x4a0] sm:$0xff]  ;;  %v1461_v17 = vld [vmem:[%s6516_s7 + $0x5b8] sm:$0xff] }
 0x2e1   : > { %v1156_v36 = vmax.f32 %v1139_v31, 0.0  ;;  %v3434_v31 = vpack.c.bf16 %v1429_v24, %v1425_v23  ;;  %v1458_v23 = vld [vmem:[%s6516_s7 + $0x5a0] sm:$0xff] }
 0x2e2   : > { %v1200_v57 = vmax.f32 %v1147_v32, %v1155_v33  ;;  %v1424_v32 = vld [vmem:[%s6516_s7 + $0x490] sm:$0xff] }
 0x2e3   : > { %v1207_v45 = vmax.f32 %v1148_v34, %v1156_v36  ;;  %v1428_v33 = vld [vmem:[%s6516_s7 + $0x4b0] sm:$0xff]  ;;  %v1431_v34 = vld [vmem:[%s6516_s7 + $0x4c8] sm:$0xff] }
 0x2e4   : > { %v1201_v46 = vrot.slane %v1200_v57, 4  ;;  %v1435_v36 = vld [vmem:[%s6516_s7 + $0x4e8] sm:$0xff] }
 0x2e5   : > { %v1208_v47 = vrot.slane %v1207_v45, 4 }
 0x2e6   : > { %v1202_v48 = vmax.f32 %v1200_v57, %v1201_v46  ;;  %v1433_v57 = vld [vmem:[%s6516_s7 + $0x4d8] sm:$0xff]  ;;  %v3180_v46 = vpack.c.bf16 %v1426_v29, %v1422_v28  ;;  %v1463_v28 = vld [vmem:[%s6516_s7 + $0x5c8] sm:$0xff] }
 0x2e7   : > { %v1209_v49 = vmax.f32 %v1207_v45, %v1208_v47  ;;  %v1437_v45 = vld [vmem:[%s6516_s7 + $0x4f8] sm:$0xff]  ;;  %v3436_v47 = vpack.c.bf16 %v1428_v33, %v1424_v32  ;;  %v1467_v29 = vld [vmem:[%s6516_s7 + $0x5e8] sm:$0xff]  ;;  %v3196_v32 = vpack.c.bf16 %v1458_v23, %v1454_v22 }
 0x2e8   : > { %v1203_v50 = vrot.slane %v1202_v48, 2  ;;  %v1495_v22 = vld [vmem:[%s6516_s7 + $0x6c8] sm:$0xff] }
 0x2e9   : > { %v1210_v51 = vrot.slane %v1209_v49, 2  ;;  %v1499_v23 = vld [vmem:[%s6516_s7 + $0x6e8] sm:$0xff] }
 0x2ea   : > { %v1204_v40 = vmax.f32 %v1202_v48, %v1203_v50  ;;  %v1430_v48 = vld [vmem:[%s6516_s7 + $0x4c0] sm:$0xff]  ;;  %v3182_v50 = vpack.c.bf16 %v1435_v36, %v1431_v34 }
 0x2eb   : > { %v1211_v52 = vmax.f32 %v1209_v49, %v1210_v51  ;;  %v1434_v49 = vld [vmem:[%s6516_s7 + $0x4e0] sm:$0xff]  ;;  %v3438_v51 = vpack.c.bf16 %v1437_v45, %v1433_v57  ;;  %v3198_v57 = vpack.c.bf16 %v1467_v29, %v1463_v28 }
 0x2ec   : > { %v1205_v53 = vrot.slane %v1204_v40, 1  ;;  %v1462_v34 = vld [vmem:[%s6516_s7 + $0x5c0] sm:$0xff] }
 0x2ed   : > { %v1212_v54 = vrot.slane %v1211_v52, 1  ;;  %v1466_v36 = vld [vmem:[%s6516_s7 + $0x5e0] sm:$0xff] }
 0x2ee   : > { %v1206_v55 = vmax.f32 %v1204_v40, %v1205_v53  ;;  %v1432_v40 = vld [vmem:[%s6516_s7 + $0x4d0] sm:$0xff]  ;;  %v1439_v53 = vld [vmem:[%s6516_s7 + $0x508] sm:$0xff]  ;;  %v1494_v28 = vld [vmem:[%s6516_s7 + $0x6c0] sm:$0xff] }
 0x2ef   : > { %v1213_v56 = vmax.f32 %v1211_v52, %v1212_v54  ;;  %v1436_v52 = vld [vmem:[%s6516_s7 + $0x4f0] sm:$0xff]  ;;  %v1443_v54 = vld [vmem:[%s6516_s7 + $0x528] sm:$0xff]  ;;  %v1498_v29 = vld [vmem:[%s6516_s7 + $0x6e0] sm:$0xff] }
 0x2f1   : > { %v1225_v58 = vcombine.low %v1206_v55, %v1213_v56  ;;  %v1441_v55 = vld [vmem:[%s6516_s7 + $0x518] sm:$0xff] }
 0x2f2   : > { %v1445_v56 = vld [vmem:[%s6516_s7 + $0x538] sm:$0xff] }
 0x2f3   : > { %v1253_v60 = vrot.slane %v1225_v58, %v1231_v14  ;;  %v3184_v58 = vpack.c.bf16 %v1434_v49, %v1430_v48  ;;  %v1471_v48 = vld [vmem:[%s6516_s7 + $0x608] sm:$0xff] }
 0x2f4   : > { %v1475_v49 = vld [vmem:[%s6516_s7 + $0x628] sm:$0xff] }
 0x2f5   : > { %v1255_v61 = vcombine.low %v1246_v59, %v1253_v60  ;;  %v3440_v59 = vpack.c.bf16 %v1436_v52, %v1432_v40  ;;  %v1438_v60 = vld [vmem:[%s6516_s7 + $0x500] sm:$0xff]  ;;  %v3200_v40 = vpack.c.bf16 %v1466_v36, %v1462_v34  ;;  %v1503_v34 = vld [vmem:[%s6516_s7 + $0x708] sm:$0xff] }
 0x2f6   : > { %v1507_v36 = vld [vmem:[%s6516_s7 + $0x728] sm:$0xff] }
 0x2f7   : > { %v1269_v63 = vrot.slane %v1255_v61, %v1231_v14  ;;  %v1418_v14 = vld [vmem:[%s6516_s7 + $0x460] sm:$0xff] }
 0x2f8   : > { %v3176_v26 = vpack.c.bf16 %v1418_v14, %v1414_v13  ;;  %v1442_v61 = vld [vmem:[%s6516_s7 + $0x520] sm:$0xff]  ;;  %v1452_v13 = vld [vmem:[%s6516_s7 + $0x570] sm:$0xff]  ;;  %v1455_v14 = vld [vmem:[%s6516_s7 + $0x588] sm:$0xff] }
 0x2f9   : > { %v1270_v0 = vcombine.low %v1262_v62, %v1269_v63  ;;  %v3186_v62 = vpack.c.bf16 %v1443_v54, %v1439_v53  ;;  %v3442_v63 = vpack.c.bf16 %v1445_v56, %v1441_v55  ;;  %v3188_v5 = vpack.c.bf16 %v1442_v61, %v1438_v60  ;;  %v1470_v53 = vld [vmem:[%s6516_s7 + $0x600] sm:$0xff]  ;;  %v1479_v60 = vld [vmem:[%s6516_s7 + $0x648] sm:$0xff] }
 0x2fa   : > { %v3194_v24 = vpack.c.bf16 %v1459_v15, %v1455_v14  ;;  %v1474_v54 = vld [vmem:[%s6516_s7 + $0x620] sm:$0xff]  ;;  %v3202_v55 = vpack.c.bf16 %v1475_v49, %v1471_v48  ;;  %v1483_v61 = vld [vmem:[%s6516_s7 + $0x668] sm:$0xff] }
 0x2fb   : > { %v4842_v4 = vmax.f32 %v1270_v0, 0.0  ;;  %v1440_v0 = vld [vmem:[%s6516_s7 + $0x510] sm:$0xff]  ;;  %v1486_v14 = vld [vmem:[%s6516_s7 + $0x680] sm:$0xff] }
 0x2fc   : > { %v3444_v6 = vpack.c.bf16 %v1444_v1, %v1440_v0  ;;  %v3204_v0 = vpack.c.bf16 %v1474_v54, %v1470_v53  ;;  %v1490_v15 = vld [vmem:[%s6516_s7 + $0x6a0] sm:$0xff]  ;;  %v1511_v53 = vld [vmem:[%s6516_s7 + $0x748] sm:$0xff] }
 0x2fd   : > { %v1799_v8 = vrot.slane %v4842_v4, %v4789_v41  ;;  %v1795_v9 = vrot.slane %v4842_v4, %v4780_v38  ;;  %v1807_v25 = vrot.slane %v4842_v4, %v4812_v44  ;;  %v1502_v48 = vld [vmem:[%s6516_s7 + $0x700] sm:$0xff]  ;;  %v1515_v54 = vld [vmem:[%s6516_s7 + $0x768] sm:$0xff] }
 0x2fe   : > { %v1506_v49 = vld [vmem:[%s6516_s7 + $0x720] sm:$0xff] }
 0x2ff   : > { %1917 = vmatprep.mubr.f32.mxu0 %v1799_v8  ;;  %2201 = vmatprep.mubr.f32.mxu1 %v1799_v8  ;;  %v1450_v8 = vld [vmem:[%s6516_s7 + $0x560] sm:$0xff] }
 0x300   : > { %1918 = vmatmul.mubr.f32.vlgmr.msra.gmra.mrb[4].mxu0 %v1795_v9  ;;  %2202 = vmatmul.mubr.f32.vlgmr.msra.gmra.mrb[16].mxu1 %v1795_v9  ;;  %v3190_v9 = vpack.c.bf16 %v1451_v3, %v1447_v2  ;;  %v1478_v2 = vld [vmem:[%s6516_s7 + $0x640] sm:$0xff] }
 0x301   : > { %3173 = vmatpush1.bf16.msra.mxu0 %v3172_v10  ;;  %3429 = vmatpush1.bf16.msra.mxu1 %v3428_v12  ;;  %v3446_v10 = vpack.c.bf16 %v1453_v11, %v1449_v35  ;;  %v1448_v12 = vld [vmem:[%s6516_s7 + $0x550] sm:$0xff]  ;;  %v1482_v3 = vld [vmem:[%s6516_s7 + $0x660] sm:$0xff]  ;;  %v3206_v35 = vpack.c.bf16 %v1483_v61, %v1479_v60 }
 0x302   : > { %1988 = vmatprep.mubr.f32.mxu0 %v1807_v25  ;;  %2272 = vmatprep.mubr.f32.mxu1 %v1807_v25  ;;  %v3450_v25 = vpack.c.bf16 %v1461_v17, %v1457_v16  ;;  %v1510_v60 = vld [vmem:[%s6516_s7 + $0x740] sm:$0xff] }
 0x303   : > { %3175 = vmatprep.subr.bf16.mxu0 %v3174_v18  ;;  %3431 = vmatprep.subr.bf16.mxu1 %v3430_v20  ;;  %v3192_v18 = vpack.c.bf16 %v1450_v8, %v1446_v7  ;;  %v3448_v20 = vpack.c.bf16 %v1452_v13, %v1448_v12  ;;  %v1487_v7 = vld [vmem:[%s6516_s7 + $0x688] sm:$0xff]  ;;  %v3208_v12 = vpack.c.bf16 %v1482_v3, %v1478_v2  ;;  %v1514_v61 = vld [vmem:[%s6516_s7 + $0x760] sm:$0xff] }
 0x304   : > { %v1491_v8 = vld [vmem:[%s6516_s7 + $0x6a8] sm:$0xff] }
 0x305   : > { %3177 = vmatpush1.bf16.msra.mxu0 %v3176_v26  ;;  %3433 = vmatpush1.bf16.msra.mxu1 %v3432_v27  ;;  %v1456_v26 = vld [vmem:[%s6516_s7 + $0x590] sm:$0xff]  ;;  %v3210_v16 = vpack.c.bf16 %v1491_v8, %v1487_v7  ;;  %v1519_v2 = vld [vmem:[%s6516_s7 + $0x788] sm:$0xff]  ;;  %v1518_v7 = vld [vmem:[%s6516_s7 + $0x780] sm:$0xff] }
 0x306   : > { %3179 = vmatprep.subr.bf16.mxu0 %v3178_v30  ;;  %3435 = vmatprep.subr.bf16.mxu1 %v3434_v31  ;;  %v1460_v27 = vld [vmem:[%s6516_s7 + $0x5b0] sm:$0xff]  ;;  %v1465_v30 = vld [vmem:[%s6516_s7 + $0x5d8] sm:$0xff]  ;;  %v1523_v3 = vld [vmem:[%s6516_s7 + $0x7a8] sm:$0xff] }
 0x307   : > { %v1469_v31 = vld [vmem:[%s6516_s7 + $0x5f8] sm:$0xff]  ;;  %v3452_v33 = vpack.c.bf16 %v1460_v27, %v1456_v26  ;;  %v3212_v26 = vpack.c.bf16 %v1490_v15, %v1486_v14  ;;  %v1522_v8 = vld [vmem:[%s6516_s7 + $0x7a0] sm:$0xff]  ;;  %v1527_v14 = vld [vmem:[%s6516_s7 + $0x7c8] sm:$0xff] }
 0x308   : > { %v3454_v45 = vpack.c.bf16 %v1469_v31, %v1465_v30  ;;  %v3214_v30 = vpack.c.bf16 %v1499_v23, %v1495_v22  ;;  %v1531_v15 = vld [vmem:[%s6516_s7 + $0x7e8] sm:$0xff]  ;;  %v1526_v22 = vld [vmem:[%s6516_s7 + $0x7c0] sm:$0xff] }
 0x309   : > { %3181 = vmatpush1.bf16.msra.mxu0 %v3180_v46  ;;  %3437 = vmatpush1.bf16.msra.mxu1 %v3436_v47  ;;  %v1464_v46 = vld [vmem:[%s6516_s7 + $0x5d0] sm:$0xff]  ;;  %v1530_v23 = vld [vmem:[%s6516_s7 + $0x7e0] sm:$0xff] }
 0x30a   : > { %3183 = vmatprep.subr.bf16.mxu0 %v3182_v50  ;;  %3439 = vmatprep.subr.bf16.mxu1 %v3438_v51  ;;  %v1468_v47 = vld [vmem:[%s6516_s7 + $0x5f0] sm:$0xff]  ;;  %v1473_v50 = vld [vmem:[%s6516_s7 + $0x618] sm:$0xff] }
 0x30b   : > { %v1477_v51 = vld [vmem:[%s6516_s7 + $0x638] sm:$0xff]  ;;  %v3456_v52 = vpack.c.bf16 %v1468_v47, %v1464_v46  ;;  %v3216_v46 = vpack.c.bf16 %v1498_v29, %v1494_v28  ;;  %v1535_v28 = vld [vmem:[%s6516_s7 + $0x808] sm:$0xff] }
 0x30c   : > { %v3458_v56 = vpack.c.bf16 %v1477_v51, %v1473_v50  ;;  %v3218_v50 = vpack.c.bf16 %v1507_v36, %v1503_v34  ;;  %v1539_v29 = vld [vmem:[%s6516_s7 + $0x828] sm:$0xff] }
 0x30d   : > { %3185 = vmatpush1.bf16.msra.mxu0 %v3184_v58  ;;  %3441 = vmatpush1.bf16.msra.mxu1 %v3440_v59  ;;  %v1472_v58 = vld [vmem:[%s6516_s7 + $0x610] sm:$0xff]  ;;  %v3234_v34 = vpack.c.bf16 %v1539_v29, %v1535_v28 }
 0x30e   : > { %3187 = vmatprep.subr.bf16.mxu0 %v3186_v62  ;;  %3443 = vmatprep.subr.bf16.mxu1 %v3442_v63  ;;  %v1476_v59 = vld [vmem:[%s6516_s7 + $0x630] sm:$0xff]  ;;  %v1481_v62 = vld [vmem:[%s6516_s7 + $0x658] sm:$0xff] }
 0x30f   : > { %v1485_v63 = vld [vmem:[%s6516_s7 + $0x678] sm:$0xff]  ;;  %v3460_v1 = vpack.c.bf16 %v1476_v59, %v1472_v58  ;;  %v3220_v58 = vpack.c.bf16 %v1506_v49, %v1502_v48  ;;  %v1543_v48 = vld [vmem:[%s6516_s7 + $0x848] sm:$0xff] }
 0x310   : > { %v3462_v11 = vpack.c.bf16 %v1485_v63, %v1481_v62  ;;  %v3222_v62 = vpack.c.bf16 %v1515_v54, %v1511_v53  ;;  %v1547_v49 = vld [vmem:[%s6516_s7 + $0x868] sm:$0xff]  ;;  %v1542_v54 = vld [vmem:[%s6516_s7 + $0x840] sm:$0xff] }
 0x311   : > { %3189 = vmatpush1.bf16.msra.mxu0 %v3188_v5  ;;  %3445 = vmatpush1.bf16.msra.mxu1 %v3444_v6  ;;  %v1480_v5 = vld [vmem:[%s6516_s7 + $0x650] sm:$0xff] }
 0x312   : > { %3191 = vmatprep.subr.bf16.mxu0 %v3190_v9  ;;  %3447 = vmatprep.subr.bf16.mxu1 %v3446_v10  ;;  %v1484_v6 = vld [vmem:[%s6516_s7 + $0x670] sm:$0xff]  ;;  %v1489_v9 = vld [vmem:[%s6516_s7 + $0x698] sm:$0xff] }
 0x313   : > { %v1493_v10 = vld [vmem:[%s6516_s7 + $0x6b8] sm:$0xff]  ;;  %v3464_v13 = vpack.c.bf16 %v1484_v6, %v1480_v5  ;;  %v3224_v5 = vpack.c.bf16 %v1514_v61, %v1510_v60  ;;  %v1548_v61 = vld [vmem:[%s6516_s7 + $0x870] sm:$0xff] }
 0x314   : > { %v3466_v17 = vpack.c.bf16 %v1493_v10, %v1489_v9  ;;  %v3226_v9 = vpack.c.bf16 %v1523_v3, %v1519_v2 }
 0x315   : > { %3193 = vmatpush1.bf16.msra.mxu0 %v3192_v18  ;;  %3449 = vmatpush1.bf16.msra.mxu1 %v3448_v20  ;;  %v1488_v18 = vld [vmem:[%s6516_s7 + $0x690] sm:$0xff] }
 0x316   : > { %3195 = vmatprep.subr.bf16.mxu0 %v3194_v24  ;;  %3451 = vmatprep.subr.bf16.mxu1 %v3450_v25  ;;  %v1492_v20 = vld [vmem:[%s6516_s7 + $0x6b0] sm:$0xff]  ;;  %v1497_v24 = vld [vmem:[%s6516_s7 + $0x6d8] sm:$0xff] }
 0x317   : > { %v1501_v25 = vld [vmem:[%s6516_s7 + $0x6f8] sm:$0xff]  ;;  %v3468_v27 = vpack.c.bf16 %v1492_v20, %v1488_v18  ;;  %v3228_v18 = vpack.c.bf16 %v1522_v8, %v1518_v7  ;;  %v1556_v7 = vld [vmem:[%s6516_s7 + $0x8b0] sm:$0xff]  ;;  %v1559_v8 = vld [vmem:[%s6516_s7 + $0x8c8] sm:$0xff] }
 0x318   : > { %v3470_v31 = vpack.c.bf16 %v1501_v25, %v1497_v24  ;;  %v3230_v24 = vpack.c.bf16 %v1531_v15, %v1527_v14 }
 0x319   : > { %3197 = vmatpush1.bf16.msra.mxu0 %v3196_v32  ;;  %3453 = vmatpush1.bf16.msra.mxu1 %v3452_v33  ;;  %v1496_v32 = vld [vmem:[%s6516_s7 + $0x6d0] sm:$0xff] }
 0x31a   : > { %3199 = vmatprep.subr.bf16.mxu0 %v3198_v57  ;;  %3455 = vmatprep.subr.bf16.mxu1 %v3454_v45  ;;  %v1500_v33 = vld [vmem:[%s6516_s7 + $0x6f0] sm:$0xff]  ;;  %v1505_v57 = vld [vmem:[%s6516_s7 + $0x718] sm:$0xff] }
 0x31b   : > { %v1509_v45 = vld [vmem:[%s6516_s7 + $0x738] sm:$0xff]  ;;  %v3472_v47 = vpack.c.bf16 %v1500_v33, %v1496_v32  ;;  %v3232_v32 = vpack.c.bf16 %v1530_v23, %v1526_v22  ;;  %v1564_v22 = vld [vmem:[%s6516_s7 + $0x8f0] sm:$0xff]  ;;  %v1567_v23 = vld [vmem:[%s6516_s7 + $0x908] sm:$0xff] }
 0x31c   : > { %v3474_v51 = vpack.c.bf16 %v1509_v45, %v1505_v57  ;;  %v1534_v57 = vld [vmem:[%s6516_s7 + $0x800] sm:$0xff] }
 0x31d   : > { %3201 = vmatpush1.bf16.msra.mxu0 %v3200_v40  ;;  %3457 = vmatpush1.bf16.msra.mxu1 %v3456_v52  ;;  %v1504_v40 = vld [vmem:[%s6516_s7 + $0x710] sm:$0xff]  ;;  %v1538_v45 = vld [vmem:[%s6516_s7 + $0x820] sm:$0xff] }
 0x31e   : > { %3203 = vmatprep.subr.bf16.mxu0 %v3202_v55  ;;  %3459 = vmatprep.subr.bf16.mxu1 %v3458_v56  ;;  %v1508_v52 = vld [vmem:[%s6516_s7 + $0x730] sm:$0xff]  ;;  %v1513_v55 = vld [vmem:[%s6516_s7 + $0x758] sm:$0xff] }
 0x31f   : > { %v1517_v56 = vld [vmem:[%s6516_s7 + $0x778] sm:$0xff]  ;;  %v3476_v59 = vpack.c.bf16 %v1508_v52, %v1504_v40  ;;  %v3236_v40 = vpack.c.bf16 %v1538_v45, %v1534_v57  ;;  %v1803_v52 = vrot.slane %v4842_v4, %v4809_v43  ;;  %v1579_v57 = vld [vmem:[%s6516_s7 + $0x968] sm:$0xff] }
 0x320   : > { %v3478_v63 = vpack.c.bf16 %v1517_v56, %v1513_v55  ;;  %v1546_v55 = vld [vmem:[%s6516_s7 + $0x860] sm:$0xff]  ;;  %v1544_v56 = vld [vmem:[%s6516_s7 + $0x850] sm:$0xff]  ;;  %v1577_v45 = vld [vmem:[%s6516_s7 + $0x958] sm:$0xff] }
 0x321   : > { %3205 = vmatpush1.bf16.msra.mxu0 %v3204_v0  ;;  %3461 = vmatpush1.bf16.msra.mxu1 %v3460_v1  ;;  %v1512_v0 = vld [vmem:[%s6516_s7 + $0x750] sm:$0xff]  ;;  %v3496_v2 = vpack.c.bf16 %v1548_v61, %v1544_v56  ;;  %v1585_v56 = vld [vmem:[%s6516_s7 + $0x998] sm:$0xff] }
 0x322   : > { %3207 = vmatprep.subr.bf16.mxu0 %v3206_v35  ;;  %3463 = vmatprep.subr.bf16.mxu1 %v3462_v11  ;;  %v1516_v1 = vld [vmem:[%s6516_s7 + $0x770] sm:$0xff]  ;;  %v1521_v35 = vld [vmem:[%s6516_s7 + $0x798] sm:$0xff] }
 0x323   : > { %v1525_v11 = vld [vmem:[%s6516_s7 + $0x7b8] sm:$0xff]  ;;  %v3480_v6 = vpack.c.bf16 %v1516_v1, %v1512_v0  ;;  %v3240_v1 = vpack.c.bf16 %v1546_v55, %v1542_v54  ;;  %v1583_v54 = vld [vmem:[%s6516_s7 + $0x988] sm:$0xff] }
 0x324   : > { %v3482_v10 = vpack.c.bf16 %v1525_v11, %v1521_v35  ;;  %v1557_v0 = vld [vmem:[%s6516_s7 + $0x8b8] sm:$0xff]  ;;  %v1550_v35 = vld [vmem:[%s6516_s7 + $0x880] sm:$0xff]  ;;  %v1587_v55 = vld [vmem:[%s6516_s7 + $0x9a8] sm:$0xff] }
 0x325   : > { %3209 = vmatpush1.bf16.msra.mxu0 %v3208_v12  ;;  %3465 = vmatpush1.bf16.msra.mxu1 %v3464_v13  ;;  %v1520_v12 = vld [vmem:[%s6516_s7 + $0x790] sm:$0xff]  ;;  %v1554_v11 = vld [vmem:[%s6516_s7 + $0x8a0] sm:$0xff]  ;;  %v3258_v61 = vpack.c.bf16 %v1587_v55, %v1583_v54 }
 0x326   : > { %3211 = vmatprep.subr.bf16.mxu0 %v3210_v16  ;;  %3467 = vmatprep.subr.bf16.mxu1 %v3466_v17  ;;  %v1524_v13 = vld [vmem:[%s6516_s7 + $0x7b0] sm:$0xff]  ;;  %v1529_v16 = vld [vmem:[%s6516_s7 + $0x7d8] sm:$0xff]  ;;  %v1614_v54 = vld [vmem:[%s6516_s7 + $0xa80] sm:$0xff] }
 0x327   : > { %v1533_v17 = vld [vmem:[%s6516_s7 + $0x7f8] sm:$0xff]  ;;  %v3484_v20 = vpack.c.bf16 %v1524_v13, %v1520_v12  ;;  %v3244_v13 = vpack.c.bf16 %v1554_v11, %v1550_v35  ;;  %v1618_v55 = vld [vmem:[%s6516_s7 + $0xaa0] sm:$0xff] }
 0x328   : > { %v3486_v25 = vpack.c.bf16 %v1533_v17, %v1529_v16  ;;  %v1565_v12 = vld [vmem:[%s6516_s7 + $0x8f8] sm:$0xff]  ;;  %v1558_v16 = vld [vmem:[%s6516_s7 + $0x8c0] sm:$0xff] }
 0x329   : > { %3213 = vmatpush1.bf16.msra.mxu0 %v3212_v26  ;;  %3469 = vmatpush1.bf16.msra.mxu1 %v3468_v27  ;;  %v1528_v26 = vld [vmem:[%s6516_s7 + $0x7d0] sm:$0xff]  ;;  %v1562_v17 = vld [vmem:[%s6516_s7 + $0x8e0] sm:$0xff]  ;;  %v1593_v35 = vld [vmem:[%s6516_s7 + $0x9d8] sm:$0xff] }
 0x32a   : > { %3215 = vmatprep.subr.bf16.mxu0 %v3214_v30  ;;  %3471 = vmatprep.subr.bf16.mxu1 %v3470_v31  ;;  %v1532_v27 = vld [vmem:[%s6516_s7 + $0x7f0] sm:$0xff]  ;;  %v1537_v30 = vld [vmem:[%s6516_s7 + $0x818] sm:$0xff] }
 0x32b   : > { %v1541_v31 = vld [vmem:[%s6516_s7 + $0x838] sm:$0xff]  ;;  %v3488_v33 = vpack.c.bf16 %v1532_v27, %v1528_v26  ;;  %v3248_v27 = vpack.c.bf16 %v1562_v17, %v1558_v16 }
 0x32c   : > { %v3490_v36 = vpack.c.bf16 %v1541_v31, %v1537_v30  ;;  %v1573_v26 = vld [vmem:[%s6516_s7 + $0x938] sm:$0xff]  ;;  %v1566_v30 = vld [vmem:[%s6516_s7 + $0x900] sm:$0xff] }
 0x32d   : > { %3217 = vmatpush1.bf16.msra.mxu0 %v3216_v46  ;;  %3473 = vmatpush1.bf16.msra.mxu1 %v3472_v47  ;;  %v1536_v46 = vld [vmem:[%s6516_s7 + $0x810] sm:$0xff]  ;;  %v1570_v31 = vld [vmem:[%s6516_s7 + $0x920] sm:$0xff]  ;;  %v1597_v11 = vld [vmem:[%s6516_s7 + $0x9f8] sm:$0xff] }
 0x32e   : > { %3219 = vmatprep.subr.bf16.mxu0 %v3218_v50  ;;  %3475 = vmatprep.subr.bf16.mxu1 %v3474_v51  ;;  %v1540_v47 = vld [vmem:[%s6516_s7 + $0x830] sm:$0xff]  ;;  %v1545_v50 = vld [vmem:[%s6516_s7 + $0x858] sm:$0xff] }
 0x32f   : > { %v1549_v51 = vld [vmem:[%s6516_s7 + $0x878] sm:$0xff]  ;;  %v3492_v53 = vpack.c.bf16 %v1540_v47, %v1536_v46  ;;  %v3252_v47 = vpack.c.bf16 %v1570_v31, %v1566_v30 }
 0x330   : > { %v3494_v60 = vpack.c.bf16 %v1549_v51, %v1545_v50  ;;  %v1581_v46 = vld [vmem:[%s6516_s7 + $0x978] sm:$0xff]  ;;  %v1574_v50 = vld [vmem:[%s6516_s7 + $0x940] sm:$0xff] }
 0x331   : > { %3221 = vmatpush1.bf16.msra.mxu0 %v3220_v58  ;;  %3477 = vmatpush1.bf16.msra.mxu1 %v3476_v59  ;;  %v1815_v58 = vrot.slane %v4842_v4, %v815_v42  ;;  %v3238_v59 = vpack.c.bf16 %v1547_v49, %v1543_v48  ;;  %v1553_v42 = vld [vmem:[%s6516_s7 + $0x898] sm:$0xff]  ;;  %v1578_v51 = vld [vmem:[%s6516_s7 + $0x960] sm:$0xff] }
 0x332   : > { %3223 = vmatprep.subr.bf16.mxu0 %v3222_v62  ;;  %3479 = vmatprep.subr.bf16.mxu1 %v3478_v63  ;;  %v1551_v62 = vld [vmem:[%s6516_s7 + $0x888] sm:$0xff]  ;;  %v1601_v16 = vld [vmem:[%s6516_s7 + $0xa18] sm:$0xff] }
 0x333   : > { %v1555_v63 = vld [vmem:[%s6516_s7 + $0x8a8] sm:$0xff]  ;;  %v1605_v17 = vld [vmem:[%s6516_s7 + $0xa38] sm:$0xff] }
 0x334   : > { %v3242_v3 = vpack.c.bf16 %v1555_v63, %v1551_v62  ;;  %v1582_v62 = vld [vmem:[%s6516_s7 + $0x980] sm:$0xff]  ;;  %v1609_v30 = vld [vmem:[%s6516_s7 + $0xa58] sm:$0xff] }
 0x335   : > { %3225 = vmatpush1.bf16.msra.mxu0 %v3224_v5  ;;  %3481 = vmatpush1.bf16.msra.mxu1 %v3480_v6  ;;  %v1552_v5 = vld [vmem:[%s6516_s7 + $0x890] sm:$0xff]  ;;  %v3498_v6 = vpack.c.bf16 %v1557_v0, %v1553_v42  ;;  %v1586_v63 = vld [vmem:[%s6516_s7 + $0x9a0] sm:$0xff]  ;;  %v1613_v31 = vld [vmem:[%s6516_s7 + $0xa78] sm:$0xff] }
 0x336   : > { %3227 = vmatprep.subr.bf16.mxu0 %v3226_v9  ;;  %3483 = vmatprep.subr.bf16.mxu1 %v3482_v10  ;;  %v1563_v9 = vld [vmem:[%s6516_s7 + $0x8e8] sm:$0xff]  ;;  %v1561_v10 = vld [vmem:[%s6516_s7 + $0x8d8] sm:$0xff]  ;;  %v3500_v14 = vpack.c.bf16 %v1556_v7, %v1552_v5  ;;  %v1584_v42 = vld [vmem:[%s6516_s7 + $0x990] sm:$0xff]  ;;  %v3260_v5 = vpack.c.bf16 %v1586_v63, %v1582_v62 }
 0x337   : > { %v3246_v15 = vpack.c.bf16 %v1563_v9, %v1559_v8  ;;  %v1590_v8 = vld [vmem:[%s6516_s7 + $0x9c0] sm:$0xff]  ;;  %v1625_v62 = vld [vmem:[%s6516_s7 + $0xad8] sm:$0xff] }
 0x338   : > { %v1594_v9 = vld [vmem:[%s6516_s7 + $0x9e0] sm:$0xff]  ;;  %v1629_v63 = vld [vmem:[%s6516_s7 + $0xaf8] sm:$0xff] }
 0x339   : > { %3229 = vmatpush1.bf16.msra.mxu0 %v3228_v18  ;;  %3485 = vmatpush1.bf16.msra.mxu1 %v3484_v20  ;;  %v1560_v18 = vld [vmem:[%s6516_s7 + $0x8d0] sm:$0xff]  ;;  %v3502_v20 = vpack.c.bf16 %v1565_v12, %v1561_v10  ;;  %v3518_v12 = vpack.c.bf16 %v1597_v11, %v1593_v35  ;;  %v3534_v11 = vpack.c.bf16 %v1629_v63, %v1625_v62 }
 0x33a   : > { %3231 = vmatprep.subr.bf16.mxu0 %v3230_v24  ;;  %3487 = vmatprep.subr.bf16.mxu1 %v3486_v25  ;;  %v1571_v24 = vld [vmem:[%s6516_s7 + $0x928] sm:$0xff]  ;;  %v1569_v25 = vld [vmem:[%s6516_s7 + $0x918] sm:$0xff]  ;;  %v3504_v28 = vpack.c.bf16 %v1564_v22, %v1560_v18  ;;  %v1592_v10 = vld [vmem:[%s6516_s7 + $0x9d0] sm:$0xff]  ;;  %v3264_v18 = vpack.c.bf16 %v1594_v9, %v1590_v8 }
 0x33b   : > { %v3250_v29 = vpack.c.bf16 %v1571_v24, %v1567_v23  ;;  %v1598_v23 = vld [vmem:[%s6516_s7 + $0xa00] sm:$0xff]  ;;  %v1624_v35 = vld [vmem:[%s6516_s7 + $0xad0] sm:$0xff]  ;;  %v1633_v8 = vld [vmem:[%s6516_s7 + $0xb18] sm:$0xff] }
 0x33c   : > { %v1602_v24 = vld [vmem:[%s6516_s7 + $0xa20] sm:$0xff]  ;;  %v1637_v9 = vld [vmem:[%s6516_s7 + $0xb38] sm:$0xff]  ;;  %v1656_v62 = vld [vmem:[%s6516_s7 + $0xbd0] sm:$0xff] }
 0x33d   : > { %3233 = vmatpush1.bf16.msra.mxu0 %v3232_v32  ;;  %3489 = vmatpush1.bf16.msra.mxu1 %v3488_v33  ;;  %v1568_v32 = vld [vmem:[%s6516_s7 + $0x910] sm:$0xff]  ;;  %v3506_v33 = vpack.c.bf16 %v1573_v26, %v1569_v25  ;;  %v3522_v26 = vpack.c.bf16 %v1605_v17, %v1601_v16  ;;  %v3538_v17 = vpack.c.bf16 %v1637_v9, %v1633_v8 }
 0x33e   : > { %3235 = vmatprep.subr.bf16.mxu0 %v3234_v34  ;;  %3491 = vmatprep.subr.bf16.mxu1 %v3490_v36  ;;  %v1572_v34 = vld [vmem:[%s6516_s7 + $0x930] sm:$0xff]  ;;  %v1575_v36 = vld [vmem:[%s6516_s7 + $0x948] sm:$0xff] }
 0x33f   : > { %v3508_v48 = vpack.c.bf16 %v1572_v34, %v1568_v32  ;;  %v3254_v49 = vpack.c.bf16 %v1579_v57, %v1575_v36  ;;  %v1600_v25 = vld [vmem:[%s6516_s7 + $0xa10] sm:$0xff]  ;;  %v3268_v32 = vpack.c.bf16 %v1602_v24, %v1598_v23  ;;  %v1606_v36 = vld [vmem:[%s6516_s7 + $0xa40] sm:$0xff]  ;;  %v1641_v23 = vld [vmem:[%s6516_s7 + $0xb58] sm:$0xff] }
 0x340   : > { %1989 = vmatmul.mubr.f32.vlgmr.msra.gmra.mrb[4].mxu0 %v1803_v52  ;;  %2273 = vmatmul.mubr.f32.vlgmr.msra.gmra.mrb[16].mxu1 %v1803_v52  ;;  %v3510_v52 = vpack.c.bf16 %v1581_v46, %v1577_v45  ;;  %v1610_v57 = vld [vmem:[%s6516_s7 + $0xa60] sm:$0xff]  ;;  %v1608_v45 = vld [vmem:[%s6516_s7 + $0xa50] sm:$0xff]  ;;  %v3526_v46 = vpack.c.bf16 %v1613_v31, %v1609_v30  ;;  %v1645_v24 = vld [vmem:[%s6516_s7 + $0xb78] sm:$0xff] }
 0x341   : > { %3237 = vmatpush1.bf16.msra.mxu0 %v3236_v40  ;;  %2059 = vmatprep.mubr.f32.mxu0 %v1815_v58  ;;  %v1576_v40 = vld [vmem:[%s6516_s7 + $0x950] sm:$0xff]  ;;  %v3542_v31 = vpack.c.bf16 %v1645_v24, %v1641_v23 }
 0x342   : > { %3493 = vmatpush1.bf16.msra.mxu1 %v3492_v53  ;;  %2343 = vmatprep.mubr.f32.mxu1 %v1815_v58  ;;  %v1580_v53 = vld [vmem:[%s6516_s7 + $0x970] sm:$0xff]  ;;  %v1589_v58 = vld [vmem:[%s6516_s7 + $0x9b8] sm:$0xff] }
 0x343   : > { %3239 = vmatprep.subr.bf16.mxu0 %v3238_v59  ;;  %3495 = vmatprep.subr.bf16.mxu1 %v3494_v60  ;;  %v3256_v59 = vpack.c.bf16 %v1578_v51, %v1574_v50  ;;  %v3512_v60 = vpack.c.bf16 %v1580_v53, %v1576_v40  ;;  %v3514_v0 = vpack.c.bf16 %v1589_v58, %v1585_v56  ;;  %v1617_v50 = vld [vmem:[%s6516_s7 + $0xa98] sm:$0xff]  ;;  %v1616_v56 = vld [vmem:[%s6516_s7 + $0xa90] sm:$0xff] }
 0x344   : > { %v1621_v51 = vld [vmem:[%s6516_s7 + $0xab8] sm:$0xff]  ;;  %v3272_v40 = vpack.c.bf16 %v1610_v57, %v1606_v36  ;;  %v1632_v16 = vld [vmem:[%s6516_s7 + $0xb10] sm:$0xff] }
 0x345   : > { %3241 = vmatpush1.bf16.msra.mxu0 %v3240_v1  ;;  %v1588_v1 = vld [vmem:[%s6516_s7 + $0x9b0] sm:$0xff]  ;;  %v3530_v58 = vpack.c.bf16 %v1621_v51, %v1617_v50  ;;  %v1649_v36 = vld [vmem:[%s6516_s7 + $0xb98] sm:$0xff] }
 0x346   : > { %3497 = vmatpush1.bf16.msra.mxu1 %v3496_v2  ;;  %3243 = vmatprep.subr.bf16.mxu0 %v3242_v3  ;;  %v1591_v2 = vld [vmem:[%s6516_s7 + $0x9c8] sm:$0xff]  ;;  %v1640_v30 = vld [vmem:[%s6516_s7 + $0xb50] sm:$0xff]  ;;  %v1653_v57 = vld [vmem:[%s6516_s7 + $0xbb8] sm:$0xff] }
 0x347   : > { %3499 = vmatprep.subr.bf16.mxu1 %v3498_v6  ;;  %v1595_v3 = vld [vmem:[%s6516_s7 + $0x9e8] sm:$0xff]  ;;  %v3516_v6 = vpack.c.bf16 %v1588_v1, %v1584_v42  ;;  %v3276_v42 = vpack.c.bf16 %v1618_v55, %v1614_v54  ;;  %v1648_v50 = vld [vmem:[%s6516_s7 + $0xb90] sm:$0xff]  ;;  %v3546_v51 = vpack.c.bf16 %v1653_v57, %v1649_v36  ;;  %v1657_v54 = vld [vmem:[%s6516_s7 + $0xbd8] sm:$0xff] }
 0x348   : > { %v3262_v7 = vpack.c.bf16 %v1595_v3, %v1591_v2  ;;  %v1622_v2 = vld [vmem:[%s6516_s7 + $0xac0] sm:$0xff]  ;;  %v1661_v55 = vld [vmem:[%s6516_s7 + $0xbf8] sm:$0xff]  ;;  %v1664_v9 = vld [vmem:[%s6516_s7 + $0xc10] sm:$0xff] }
 0x349   : > { %3245 = vmatpush1.bf16.msra.mxu0 %v3244_v13  ;;  %v1596_v13 = vld [vmem:[%s6516_s7 + $0x9f0] sm:$0xff]  ;;  %v1626_v3 = vld [vmem:[%s6516_s7 + $0xae0] sm:$0xff]  ;;  %v3550_v63 = vpack.c.bf16 %v1661_v55, %v1657_v54 }
 0x34a   : > { %3501 = vmatpush1.bf16.msra.mxu1 %v3500_v14  ;;  %3247 = vmatprep.subr.bf16.mxu0 %v3246_v15  ;;  %v1599_v14 = vld [vmem:[%s6516_s7 + $0xa08] sm:$0xff]  ;;  %v1672_v23 = vld [vmem:[%s6516_s7 + $0xc50] sm:$0xff] }
 0x34b   : > { %3503 = vmatprep.subr.bf16.mxu1 %v3502_v20  ;;  %v1603_v15 = vld [vmem:[%s6516_s7 + $0xa28] sm:$0xff]  ;;  %v3520_v20 = vpack.c.bf16 %v1596_v13, %v1592_v10  ;;  %v3280_v10 = vpack.c.bf16 %v1626_v3, %v1622_v2  ;;  %v1665_v2 = vld [vmem:[%s6516_s7 + $0xc18] sm:$0xff]  ;;  %v1680_v36 = vld [vmem:[%s6516_s7 + $0xc90] sm:$0xff] }
 0x34c   : > { %v3266_v22 = vpack.c.bf16 %v1603_v15, %v1599_v14  ;;  %v1630_v14 = vld [vmem:[%s6516_s7 + $0xb00] sm:$0xff]  ;;  %v1669_v3 = vld [vmem:[%s6516_s7 + $0xc38] sm:$0xff]  ;;  %v1688_v54 = vld [vmem:[%s6516_s7 + $0xcd0] sm:$0xff] }
 0x34d   : > { %3249 = vmatpush1.bf16.msra.mxu0 %v3248_v27  ;;  %v1604_v27 = vld [vmem:[%s6516_s7 + $0xa30] sm:$0xff]  ;;  %v1634_v15 = vld [vmem:[%s6516_s7 + $0xb20] sm:$0xff]  ;;  %v3554_v8 = vpack.c.bf16 %v1669_v3, %v1665_v2 }
 0x34e   : > { %3505 = vmatpush1.bf16.msra.mxu1 %v3504_v28  ;;  %3251 = vmatprep.subr.bf16.mxu0 %v3250_v29  ;;  %v1607_v28 = vld [vmem:[%s6516_s7 + $0xa48] sm:$0xff]  ;;  %v1696_v2 = vld [vmem:[%s6516_s7 + $0xd10] sm:$0xff] }
 0x34f   : > { %3507 = vmatprep.subr.bf16.mxu1 %v3506_v33  ;;  %v1611_v29 = vld [vmem:[%s6516_s7 + $0xa68] sm:$0xff]  ;;  %v3524_v33 = vpack.c.bf16 %v1604_v27, %v1600_v25  ;;  %v3284_v25 = vpack.c.bf16 %v1634_v15, %v1630_v14  ;;  %v1673_v15 = vld [vmem:[%s6516_s7 + $0xc58] sm:$0xff] }
 0x350   : > { %v3270_v34 = vpack.c.bf16 %v1611_v29, %v1607_v28  ;;  %v1638_v28 = vld [vmem:[%s6516_s7 + $0xb40] sm:$0xff] }
 0x351   : > { %3253 = vmatpush1.bf16.msra.mxu0 %v3252_v47  ;;  %v1612_v47 = vld [vmem:[%s6516_s7 + $0xa70] sm:$0xff]  ;;  %v1642_v29 = vld [vmem:[%s6516_s7 + $0xb60] sm:$0xff] }
 0x352   : > { %3509 = vmatpush1.bf16.msra.mxu1 %v3508_v48  ;;  %3255 = vmatprep.subr.bf16.mxu0 %v3254_v49  ;;  %v1615_v48 = vld [vmem:[%s6516_s7 + $0xa88] sm:$0xff] }
 0x353   : > { %3511 = vmatprep.subr.bf16.mxu1 %v3510_v52  ;;  %v1619_v49 = vld [vmem:[%s6516_s7 + $0xaa8] sm:$0xff]  ;;  %v3528_v52 = vpack.c.bf16 %v1612_v47, %v1608_v45  ;;  %v3288_v45 = vpack.c.bf16 %v1642_v29, %v1638_v28  ;;  %v1681_v29 = vld [vmem:[%s6516_s7 + $0xc98] sm:$0xff] }
 0x354   : > { %v3274_v53 = vpack.c.bf16 %v1619_v49, %v1615_v48  ;;  %v1646_v48 = vld [vmem:[%s6516_s7 + $0xb80] sm:$0xff] }
 0x355   : > { %3257 = vmatpush1.bf16.msra.mxu0 %v3256_v59  ;;  %v1620_v59 = vld [vmem:[%s6516_s7 + $0xab0] sm:$0xff]  ;;  %v1650_v49 = vld [vmem:[%s6516_s7 + $0xba0] sm:$0xff] }
 0x356   : > { %3513 = vmatpush1.bf16.msra.mxu1 %v3512_v60  ;;  %3259 = vmatprep.subr.bf16.mxu0 %v3258_v61  ;;  %v1623_v60 = vld [vmem:[%s6516_s7 + $0xac8] sm:$0xff] }
 0x357   : > { %3515 = vmatprep.subr.bf16.mxu1 %v3514_v0  ;;  %v1627_v61 = vld [vmem:[%s6516_s7 + $0xae8] sm:$0xff]  ;;  %v3532_v0 = vpack.c.bf16 %v1620_v59, %v1616_v56  ;;  %v3292_v56 = vpack.c.bf16 %v1650_v49, %v1646_v48  ;;  %v1689_v48 = vld [vmem:[%s6516_s7 + $0xcd8] sm:$0xff] }
 0x358   : > { %v3278_v1 = vpack.c.bf16 %v1627_v61, %v1623_v60  ;;  %v1654_v60 = vld [vmem:[%s6516_s7 + $0xbc0] sm:$0xff]  ;;  %v1693_v49 = vld [vmem:[%s6516_s7 + $0xcf8] sm:$0xff] }
 0x359   : > { %3261 = vmatpush1.bf16.msra.mxu0 %v3260_v5  ;;  %v1628_v5 = vld [vmem:[%s6516_s7 + $0xaf0] sm:$0xff]  ;;  %v1658_v61 = vld [vmem:[%s6516_s7 + $0xbe0] sm:$0xff]  ;;  %v3566_v55 = vpack.c.bf16 %v1693_v49, %v1689_v48  ;;  %v1727_v49 = vld [vmem:[%s6516_s7 + $0xe08] sm:$0xff] }
 0x35a   : > { %3517 = vmatpush1.bf16.msra.mxu1 %v3516_v6  ;;  %3263 = vmatprep.subr.bf16.mxu0 %v3262_v7  ;;  %v1631_v6 = vld [vmem:[%s6516_s7 + $0xb08] sm:$0xff]  ;;  %v1724_v48 = vld [vmem:[%s6516_s7 + $0xdf0] sm:$0xff] }
 0x35b   : > { %3519 = vmatprep.subr.bf16.mxu1 %v3518_v12  ;;  %v1635_v7 = vld [vmem:[%s6516_s7 + $0xb28] sm:$0xff]  ;;  %v3536_v12 = vpack.c.bf16 %v1628_v5, %v1624_v35  ;;  %v3296_v35 = vpack.c.bf16 %v1658_v61, %v1654_v60  ;;  %v1697_v60 = vld [vmem:[%s6516_s7 + $0xd18] sm:$0xff] }
 0x35c   : > { %v3282_v13 = vpack.c.bf16 %v1635_v7, %v1631_v6  ;;  %v1662_v6 = vld [vmem:[%s6516_s7 + $0xc00] sm:$0xff]  ;;  %v1701_v61 = vld [vmem:[%s6516_s7 + $0xd38] sm:$0xff] }
 0x35d   : > { %3265 = vmatpush1.bf16.msra.mxu0 %v3264_v18  ;;  %v1636_v18 = vld [vmem:[%s6516_s7 + $0xb30] sm:$0xff]  ;;  %v1666_v7 = vld [vmem:[%s6516_s7 + $0xc20] sm:$0xff]  ;;  %v3570_v3 = vpack.c.bf16 %v1701_v61, %v1697_v60  ;;  %v1735_v61 = vld [vmem:[%s6516_s7 + $0xe48] sm:$0xff] }
 0x35e   : > { %3521 = vmatpush1.bf16.msra.mxu1 %v3520_v20  ;;  %3267 = vmatprep.subr.bf16.mxu0 %v3266_v22  ;;  %v1639_v20 = vld [vmem:[%s6516_s7 + $0xb48] sm:$0xff]  ;;  %v3300_v14 = vpack.c.bf16 %v1666_v7, %v1662_v6  ;;  %v1705_v6 = vld [vmem:[%s6516_s7 + $0xd58] sm:$0xff]  ;;  %v1732_v60 = vld [vmem:[%s6516_s7 + $0xe30] sm:$0xff] }
 0x35f   : > { %3523 = vmatprep.subr.bf16.mxu1 %v3522_v26  ;;  %v1643_v22 = vld [vmem:[%s6516_s7 + $0xb68] sm:$0xff]  ;;  %v3540_v26 = vpack.c.bf16 %v1636_v18, %v1632_v16  ;;  %v1677_v16 = vld [vmem:[%s6516_s7 + $0xc78] sm:$0xff] }
 0x360   : > { %v3286_v27 = vpack.c.bf16 %v1643_v22, %v1639_v20  ;;  %v1670_v20 = vld [vmem:[%s6516_s7 + $0xc40] sm:$0xff]  ;;  %v3558_v28 = vpack.c.bf16 %v1677_v16, %v1673_v15  ;;  %v1709_v7 = vld [vmem:[%s6516_s7 + $0xd78] sm:$0xff]  ;;  %v1708_v16 = vld [vmem:[%s6516_s7 + $0xd70] sm:$0xff] }
 0x361   : > { %3269 = vmatpush1.bf16.msra.mxu0 %v3268_v32  ;;  %v1644_v32 = vld [vmem:[%s6516_s7 + $0xb70] sm:$0xff]  ;;  %v1674_v22 = vld [vmem:[%s6516_s7 + $0xc60] sm:$0xff]  ;;  %v3574_v15 = vpack.c.bf16 %v1709_v7, %v1705_v6  ;;  %v1743_v7 = vld [vmem:[%s6516_s7 + $0xe88] sm:$0xff] }
 0x362   : > { %3525 = vmatpush1.bf16.msra.mxu1 %v3524_v33  ;;  %3271 = vmatprep.subr.bf16.mxu0 %v3270_v34  ;;  %v1647_v33 = vld [vmem:[%s6516_s7 + $0xb88] sm:$0xff]  ;;  %v1740_v6 = vld [vmem:[%s6516_s7 + $0xe70] sm:$0xff] }
 0x363   : > { %3527 = vmatprep.subr.bf16.mxu1 %v3526_v46  ;;  %v1651_v34 = vld [vmem:[%s6516_s7 + $0xba8] sm:$0xff]  ;;  %v3544_v46 = vpack.c.bf16 %v1644_v32, %v1640_v30  ;;  %v1685_v30 = vld [vmem:[%s6516_s7 + $0xcb8] sm:$0xff] }
 0x364   : > { %v3290_v47 = vpack.c.bf16 %v1651_v34, %v1647_v33  ;;  %v1682_v34 = vld [vmem:[%s6516_s7 + $0xca0] sm:$0xff]  ;;  %v3562_v57 = vpack.c.bf16 %v1685_v30, %v1681_v29  ;;  %v1716_v29 = vld [vmem:[%s6516_s7 + $0xdb0] sm:$0xff]  ;;  %v1719_v30 = vld [vmem:[%s6516_s7 + $0xdc8] sm:$0xff] }
 0x365   : > { %3273 = vmatpush1.bf16.msra.mxu0 %v3272_v40  ;;  %v1652_v40 = vld [vmem:[%s6516_s7 + $0xbb0] sm:$0xff] }
 0x366   : > { %3529 = vmatpush1.bf16.msra.mxu1 %v3528_v52  ;;  %3275 = vmatprep.subr.bf16.mxu0 %v3274_v53  ;;  %v1655_v52 = vld [vmem:[%s6516_s7 + $0xbc8] sm:$0xff] }
 0x367   : > { %3531 = vmatprep.subr.bf16.mxu1 %v3530_v58  ;;  %v1659_v53 = vld [vmem:[%s6516_s7 + $0xbe8] sm:$0xff]  ;;  %v3548_v58 = vpack.c.bf16 %v1652_v40, %v1648_v50 }
 0x368   : > { %v3294_v59 = vpack.c.bf16 %v1659_v53, %v1655_v52  ;;  %v1686_v52 = vld [vmem:[%s6516_s7 + $0xcc0] sm:$0xff] }
 0x369   : > { %3277 = vmatpush1.bf16.msra.mxu0 %v3276_v42  ;;  %v1660_v42 = vld [vmem:[%s6516_s7 + $0xbf0] sm:$0xff]  ;;  %v1690_v53 = vld [vmem:[%s6516_s7 + $0xce0] sm:$0xff] }
 0x36a   : > { %3533 = vmatpush1.bf16.msra.mxu1 %v3532_v0  ;;  %3279 = vmatprep.subr.bf16.mxu0 %v3278_v1  ;;  %v1663_v0 = vld [vmem:[%s6516_s7 + $0xc08] sm:$0xff] }
 0x36b   : > { %3535 = vmatprep.subr.bf16.mxu1 %v3534_v11  ;;  %v1667_v1 = vld [vmem:[%s6516_s7 + $0xc28] sm:$0xff]  ;;  %v3552_v11 = vpack.c.bf16 %v1660_v42, %v1656_v62  ;;  %v3312_v62 = vpack.c.bf16 %v1690_v53, %v1686_v52 }
 0x36c   : > { %v3298_v5 = vpack.c.bf16 %v1667_v1, %v1663_v0  ;;  %v1694_v0 = vld [vmem:[%s6516_s7 + $0xd00] sm:$0xff] }
 0x36d   : > { %3281 = vmatpush1.bf16.msra.mxu0 %v3280_v10  ;;  %v1668_v10 = vld [vmem:[%s6516_s7 + $0xc30] sm:$0xff]  ;;  %v1698_v1 = vld [vmem:[%s6516_s7 + $0xd20] sm:$0xff] }
 0x36e   : > { %3537 = vmatpush1.bf16.msra.mxu1 %v3536_v12  ;;  %3283 = vmatprep.subr.bf16.mxu0 %v3282_v13  ;;  %v1671_v12 = vld [vmem:[%s6516_s7 + $0xc48] sm:$0xff]  ;;  %v3556_v18 = vpack.c.bf16 %v1668_v10, %v1664_v9 }
 0x36f   : > { %3539 = vmatprep.subr.bf16.mxu1 %v3538_v17  ;;  %v1675_v13 = vld [vmem:[%s6516_s7 + $0xc68] sm:$0xff]  ;;  %v1811_v17 = vrot.slane %v4842_v4, %v811_v39  ;;  %v1676_v39 = vld [vmem:[%s6516_s7 + $0xc70] sm:$0xff] }
 0x370   : > { %v3302_v24 = vpack.c.bf16 %v1675_v13, %v1671_v12  ;;  %v3560_v32 = vpack.c.bf16 %v1676_v39, %v1672_v23  ;;  %v1702_v12 = vld [vmem:[%s6516_s7 + $0xd40] sm:$0xff] }
 0x371   : > { %3285 = vmatpush1.bf16.msra.mxu0 %v3284_v25  ;;  %v1679_v25 = vld [vmem:[%s6516_s7 + $0xc88] sm:$0xff]  ;;  %v1706_v13 = vld [vmem:[%s6516_s7 + $0xd60] sm:$0xff] }
 0x372   : > { %3541 = vmatpush1.bf16.msra.mxu1 %v3540_v26  ;;  %3287 = vmatprep.subr.bf16.mxu0 %v3286_v27  ;;  %v1683_v26 = vld [vmem:[%s6516_s7 + $0xca8] sm:$0xff]  ;;  %v1823_v27 = vrot.slane %v4842_v4, %v823_v21  ;;  %v1678_v21 = vld [vmem:[%s6516_s7 + $0xc80] sm:$0xff]  ;;  %v3320_v23 = vpack.c.bf16 %v1706_v13, %v1702_v12 }
 0x373   : > { %3543 = vmatprep.subr.bf16.mxu1 %v3542_v31  ;;  %v3304_v31 = vpack.c.bf16 %v1674_v22, %v1670_v20  ;;  %v3306_v33 = vpack.c.bf16 %v1683_v26, %v1679_v25  ;;  %v3308_v50 = vpack.c.bf16 %v1682_v34, %v1678_v21  ;;  %v1713_v20 = vld [vmem:[%s6516_s7 + $0xd98] sm:$0xff]  ;;  %v1710_v25 = vld [vmem:[%s6516_s7 + $0xd80] sm:$0xff] }
 0x374   : > { %v1717_v22 = vld [vmem:[%s6516_s7 + $0xdb8] sm:$0xff]  ;;  %v1714_v26 = vld [vmem:[%s6516_s7 + $0xda0] sm:$0xff] }
 0x375   : > { %3289 = vmatpush1.bf16.msra.mxu0 %v3288_v45  ;;  %v1684_v45 = vld [vmem:[%s6516_s7 + $0xcb0] sm:$0xff]  ;;  %v3324_v21 = vpack.c.bf16 %v1714_v26, %v1710_v25 }
 0x376   : > { %3545 = vmatpush1.bf16.msra.mxu1 %v3544_v46  ;;  %3291 = vmatprep.subr.bf16.mxu0 %v3290_v47  ;;  %v1687_v46 = vld [vmem:[%s6516_s7 + $0xcc8] sm:$0xff] }
 0x377   : > { %3547 = vmatprep.subr.bf16.mxu1 %v3546_v51  ;;  %v1691_v47 = vld [vmem:[%s6516_s7 + $0xce8] sm:$0xff]  ;;  %v3564_v51 = vpack.c.bf16 %v1684_v45, %v1680_v36  ;;  %v1722_v45 = vld [vmem:[%s6516_s7 + $0xde0] sm:$0xff] }
 0x378   : > { %v3310_v40 = vpack.c.bf16 %v1691_v47, %v1687_v46  ;;  %v1720_v46 = vld [vmem:[%s6516_s7 + $0xdd0] sm:$0xff] }
 0x379   : > { %3293 = vmatpush1.bf16.msra.mxu0 %v3292_v56  ;;  %v1692_v56 = vld [vmem:[%s6516_s7 + $0xcf0] sm:$0xff]  ;;  %v3584_v53 = vpack.c.bf16 %v1724_v48, %v1720_v46  ;;  %v1762_v48 = vld [vmem:[%s6516_s7 + $0xf20] sm:$0xff] }
 0x37a   : > { %3549 = vmatpush1.bf16.msra.mxu1 %v3548_v58  ;;  %3295 = vmatprep.subr.bf16.mxu0 %v3294_v59  ;;  %v1695_v58 = vld [vmem:[%s6516_s7 + $0xd08] sm:$0xff] }
 0x37b   : > { %3551 = vmatprep.subr.bf16.mxu1 %v3550_v63  ;;  %v1699_v59 = vld [vmem:[%s6516_s7 + $0xd28] sm:$0xff]  ;;  %v3568_v63 = vpack.c.bf16 %v1692_v56, %v1688_v54  ;;  %v1730_v56 = vld [vmem:[%s6516_s7 + $0xe20] sm:$0xff] }
 0x37c   : > { %v3314_v42 = vpack.c.bf16 %v1699_v59, %v1695_v58  ;;  %v1728_v58 = vld [vmem:[%s6516_s7 + $0xe10] sm:$0xff] }
 0x37d   : > { %3297 = vmatpush1.bf16.msra.mxu0 %v3296_v35  ;;  %v1700_v35 = vld [vmem:[%s6516_s7 + $0xd30] sm:$0xff] }
 0x37e   : > { %3553 = vmatpush1.bf16.msra.mxu1 %v3552_v11  ;;  %3299 = vmatprep.subr.bf16.mxu0 %v3298_v5  ;;  %v1703_v11 = vld [vmem:[%s6516_s7 + $0xd48] sm:$0xff]  ;;  %v3572_v9 = vpack.c.bf16 %v1700_v35, %v1696_v2  ;;  %v1738_v35 = vld [vmem:[%s6516_s7 + $0xe60] sm:$0xff] }
 0x37f   : > { %3555 = vmatprep.subr.bf16.mxu1 %v3554_v8  ;;  %v1707_v5 = vld [vmem:[%s6516_s7 + $0xd68] sm:$0xff]  ;;  %v3316_v8 = vpack.c.bf16 %v1698_v1, %v1694_v0  ;;  %v3588_v1 = vpack.c.bf16 %v1732_v60, %v1728_v58  ;;  %v1770_v60 = vld [vmem:[%s6516_s7 + $0xf60] sm:$0xff] }
 0x380   : > { %2060 = vmatmul.mubr.f32.vlgmr.msra.gmra.mrb[4].mxu0 %v1811_v17  ;;  %v3318_v10 = vpack.c.bf16 %v1707_v5, %v1703_v11  ;;  %v1736_v11 = vld [vmem:[%s6516_s7 + $0xe50] sm:$0xff] }
 0x381   : > { %2344 = vmatmul.mubr.f32.vlgmr.msra.gmra.mrb[16].mxu1 %v1811_v17  ;;  %3301 = vmatpush1.bf16.msra.mxu0 %v3300_v14  ;;  %v1704_v14 = vld [vmem:[%s6516_s7 + $0xd50] sm:$0xff]  ;;  %v1711_v17 = vld [vmem:[%s6516_s7 + $0xd88] sm:$0xff]  ;;  %v3592_v13 = vpack.c.bf16 %v1740_v6, %v1736_v11  ;;  %v1778_v6 = vld [vmem:[%s6516_s7 + $0xfa0] sm:$0xff] }
 0x382   : > { %2130 = vmatprep.mubr.f32.mxu0 %v1823_v27  ;;  %3557 = vmatpush1.bf16.msra.mxu1 %v3556_v18  ;;  %v1715_v18 = vld [vmem:[%s6516_s7 + $0xda8] sm:$0xff] }
 0x383   : > { %2414 = vmatprep.mubr.f32.mxu1 %v1823_v27  ;;  %3303 = vmatprep.subr.bf16.mxu0 %v3302_v24  ;;  %v3576_v24 = vpack.c.bf16 %v1708_v16, %v1704_v14  ;;  %v3322_v39 = vpack.c.bf16 %v1715_v18, %v1711_v17  ;;  %v1712_v27 = vld [vmem:[%s6516_s7 + $0xd90] sm:$0xff]  ;;  %v1746_v16 = vld [vmem:[%s6516_s7 + $0xea0] sm:$0xff] }
 0x384   : > { %3559 = vmatprep.subr.bf16.mxu1 %v3558_v28  ;;  %v3578_v28 = vpack.c.bf16 %v1717_v22, %v1713_v20  ;;  %v3580_v34 = vpack.c.bf16 %v1716_v29, %v1712_v27  ;;  %v1744_v17 = vld [vmem:[%s6516_s7 + $0xe90] sm:$0xff]  ;;  %v1751_v22 = vld [vmem:[%s6516_s7 + $0xec8] sm:$0xff]  ;;  %v1754_v29 = vld [vmem:[%s6516_s7 + $0xee0] sm:$0xff] }
 0x385   : > { %3305 = vmatpush1.bf16.msra.mxu0 %v3304_v31  ;;  %v1723_v31 = vld [vmem:[%s6516_s7 + $0xde8] sm:$0xff]  ;;  %v1748_v20 = vld [vmem:[%s6516_s7 + $0xeb0] sm:$0xff] }
 0x386   : > { %3561 = vmatpush1.bf16.msra.mxu1 %v3560_v32  ;;  %3307 = vmatprep.subr.bf16.mxu0 %v3306_v33  ;;  %v1721_v32 = vld [vmem:[%s6516_s7 + $0xdd8] sm:$0xff]  ;;  %v3326_v36 = vpack.c.bf16 %v1723_v31, %v1719_v30  ;;  %v3596_v26 = vpack.c.bf16 %v1748_v20, %v1744_v17  ;;  %v1752_v30 = vld [vmem:[%s6516_s7 + $0xed0] sm:$0xff]  ;;  %v1786_v20 = vld [vmem:[%s6516_s7 + $0xfe0] sm:$0xff] }
 0x387   : > { %3563 = vmatprep.subr.bf16.mxu1 %v3562_v57  ;;  %v1725_v33 = vld [vmem:[%s6516_s7 + $0xdf8] sm:$0xff]  ;;  %v1718_v57 = vld [vmem:[%s6516_s7 + $0xdc0] sm:$0xff] }
 0x388   : > { %v3582_v47 = vpack.c.bf16 %v1725_v33, %v1721_v32  ;;  %v3328_v52 = vpack.c.bf16 %v1722_v45, %v1718_v57  ;;  %v1756_v32 = vld [vmem:[%s6516_s7 + $0xef0] sm:$0xff]  ;;  %v1759_v33 = vld [vmem:[%s6516_s7 + $0xf08] sm:$0xff] }
 0x389   : > { %3309 = vmatpush1.bf16.msra.mxu0 %v3308_v50  ;;  %v1731_v50 = vld [vmem:[%s6516_s7 + $0xe28] sm:$0xff]  ;;  %v3600_v45 = vpack.c.bf16 %v1756_v32, %v1752_v30  ;;  %v2427_v30 = vld [vmem:[%s6518_s9 + $0x10] sm:$0xff]  ;;  %v2432_v32 = vld [vmem:[%s6518_s9 + $0x38] sm:$0xff] }
 0x38a   : > { %3565 = vmatpush1.bf16.msra.mxu1 %v3564_v51  ;;  %3311 = vmatprep.subr.bf16.mxu0 %v3310_v40  ;;  %v1729_v51 = vld [vmem:[%s6516_s7 + $0xe18] sm:$0xff]  ;;  %v3330_v54 = vpack.c.bf16 %v1731_v50, %v1727_v49  ;;  %v1760_v49 = vld [vmem:[%s6516_s7 + $0xf10] sm:$0xff] }
 0x38b   : > { %3567 = vmatprep.subr.bf16.mxu1 %v3566_v55  ;;  %v1733_v40 = vld [vmem:[%s6516_s7 + $0xe38] sm:$0xff]  ;;  %v1726_v55 = vld [vmem:[%s6516_s7 + $0xe00] sm:$0xff] }
 0x38c   : > { %v3586_v59 = vpack.c.bf16 %v1733_v40, %v1729_v51  ;;  %v3332_v0 = vpack.c.bf16 %v1730_v56, %v1726_v55  ;;  %v1764_v51 = vld [vmem:[%s6516_s7 + $0xf30] sm:$0xff]  ;;  %v1767_v40 = vld [vmem:[%s6516_s7 + $0xf48] sm:$0xff] }
 0x38d   : > { %3313 = vmatpush1.bf16.msra.mxu0 %v3312_v62  ;;  %v1739_v62 = vld [vmem:[%s6516_s7 + $0xe68] sm:$0xff]  ;;  %v3604_v56 = vpack.c.bf16 %v1764_v51, %v1760_v49  ;;  %v2440_v49 = vld [vmem:[%s6518_s9 + $0x78] sm:$0xff] }
 0x38e   : > { %3569 = vmatpush1.bf16.msra.mxu1 %v3568_v63  ;;  %3315 = vmatprep.subr.bf16.mxu0 %v3314_v42  ;;  %v1737_v63 = vld [vmem:[%s6516_s7 + $0xe58] sm:$0xff]  ;;  %v3334_v2 = vpack.c.bf16 %v1739_v62, %v1735_v61  ;;  %v1768_v61 = vld [vmem:[%s6516_s7 + $0xf50] sm:$0xff] }
 0x38f   : > { %3571 = vmatprep.subr.bf16.mxu1 %v3570_v3  ;;  %v1741_v42 = vld [vmem:[%s6516_s7 + $0xe78] sm:$0xff]  ;;  %v1734_v3 = vld [vmem:[%s6516_s7 + $0xe40] sm:$0xff] }
 0x390   : > { %v3590_v5 = vpack.c.bf16 %v1741_v42, %v1737_v63  ;;  %v3336_v12 = vpack.c.bf16 %v1738_v35, %v1734_v3  ;;  %v1772_v63 = vld [vmem:[%s6516_s7 + $0xf70] sm:$0xff]  ;;  %v1775_v42 = vld [vmem:[%s6516_s7 + $0xf88] sm:$0xff] }
 0x391   : > { %3317 = vmatpush1.bf16.msra.mxu0 %v3316_v8  ;;  %v1747_v8 = vld [vmem:[%s6516_s7 + $0xea8] sm:$0xff]  ;;  %v3608_v35 = vpack.c.bf16 %v1772_v63, %v1768_v61  ;;  %v2448_v61 = vld [vmem:[%s6518_s9 + $0xb8] sm:$0xff] }
 0x392   : > { %3573 = vmatpush1.bf16.msra.mxu1 %v3572_v9  ;;  %3319 = vmatprep.subr.bf16.mxu0 %v3318_v10  ;;  %v1745_v9 = vld [vmem:[%s6516_s7 + $0xe98] sm:$0xff]  ;;  %v3338_v14 = vpack.c.bf16 %v1747_v8, %v1743_v7  ;;  %v1776_v7 = vld [vmem:[%s6516_s7 + $0xf90] sm:$0xff] }
 0x393   : > { %3575 = vmatprep.subr.bf16.mxu1 %v3574_v15  ;;  %v1749_v10 = vld [vmem:[%s6516_s7 + $0xeb8] sm:$0xff]  ;;  %v1742_v15 = vld [vmem:[%s6516_s7 + $0xe80] sm:$0xff] }
 0x394   : > { %v3594_v18 = vpack.c.bf16 %v1749_v10, %v1745_v9  ;;  %v3340_v25 = vpack.c.bf16 %v1746_v16, %v1742_v15  ;;  %v1780_v9 = vld [vmem:[%s6516_s7 + $0xfb0] sm:$0xff]  ;;  %v1783_v10 = vld [vmem:[%s6516_s7 + $0xfc8] sm:$0xff] }
 0x395   : > { %3321 = vmatpush1.bf16.msra.mxu0 %v3320_v23  ;;  %v1755_v23 = vld [vmem:[%s6516_s7 + $0xee8] sm:$0xff]  ;;  %v3612_v16 = vpack.c.bf16 %v1780_v9, %v1776_v7  ;;  %v2456_v7 = vld [vmem:[%s6518_s9 + $0xf8] sm:$0xff] }
 0x396   : > { %3577 = vmatpush1.bf16.msra.mxu1 %v3576_v24  ;;  %3323 = vmatprep.subr.bf16.mxu0 %v3322_v39  ;;  %v1753_v24 = vld [vmem:[%s6516_s7 + $0xed8] sm:$0xff]  ;;  %v3342_v27 = vpack.c.bf16 %v1755_v23, %v1751_v22  ;;  %v1784_v22 = vld [vmem:[%s6516_s7 + $0xfd0] sm:$0xff] }
 0x397   : > { %3579 = vmatprep.subr.bf16.mxu1 %v3578_v28  ;;  %v1757_v39 = vld [vmem:[%s6516_s7 + $0xef8] sm:$0xff]  ;;  %v1750_v28 = vld [vmem:[%s6516_s7 + $0xec0] sm:$0xff] }
 0x398   : > { %v3598_v31 = vpack.c.bf16 %v1757_v39, %v1753_v24  ;;  %v3344_v57 = vpack.c.bf16 %v1754_v29, %v1750_v28  ;;  %v1788_v24 = vld [vmem:[%s6516_s7 + $0xff0] sm:$0xff]  ;;  %v2426_v39 = vld [vmem:[%s6518_s9 + $0x8] sm:$0xff]  ;;  %v2425_v29 = vld [vmem:[%s6518_s9] sm:$0xff] }
 0x399   : > { %3325 = vmatpush1.bf16.msra.mxu0 %v3324_v21  ;;  %v1763_v21 = vld [vmem:[%s6516_s7 + $0xf28] sm:$0xff] }
 0x39a   : > { %3581 = vmatpush1.bf16.msra.mxu1 %v3580_v34  ;;  %3327 = vmatprep.subr.bf16.mxu0 %v3326_v36  ;;  %v1761_v34 = vld [vmem:[%s6516_s7 + $0xf18] sm:$0xff]  ;;  %v3346_v46 = vpack.c.bf16 %v1763_v21, %v1759_v33  ;;  %v3620_v33 = vpack.c.bf16 %v2427_v30, %v2425_v29  ;;  %v1819_v21 = vrot.slane %v4842_v4, %v819_v19  ;;  %v2465_v30 = vld [vmem:[%s6518_s9 + $0x140] sm:$0xff] }
 0x39b   : > { %3583 = vmatprep.subr.bf16.mxu1 %v3582_v47  ;;  %v1765_v36 = vld [vmem:[%s6516_s7 + $0xf38] sm:$0xff]  ;;  %v1758_v47 = vld [vmem:[%s6516_s7 + $0xf00] sm:$0xff] }
 0x39c   : > { %v3602_v50 = vpack.c.bf16 %v1765_v36, %v1761_v34  ;;  %v3348_v55 = vpack.c.bf16 %v1762_v48, %v1758_v47  ;;  %v2429_v36 = vld [vmem:[%s6518_s9 + $0x20] sm:$0xff]  ;;  %v2435_v47 = vld [vmem:[%s6518_s9 + $0x50] sm:$0xff]  ;;  %v2438_v48 = vld [vmem:[%s6518_s9 + $0x68] sm:$0xff] }
 0x39d   : > { %3329 = vmatpush1.bf16.msra.mxu0 %v3328_v52  ;;  %v1771_v52 = vld [vmem:[%s6516_s7 + $0xf68] sm:$0xff]  ;;  %v3630_v51 = vpack.c.bf16 %v2440_v49, %v2438_v48  ;;  %v2480_v49 = vld [vmem:[%s6518_s9 + $0x1b8] sm:$0xff] }
 0x39e   : > { %3585 = vmatpush1.bf16.msra.mxu1 %v3584_v53  ;;  %3331 = vmatprep.subr.bf16.mxu0 %v3330_v54  ;;  %v1769_v53 = vld [vmem:[%s6516_s7 + $0xf58] sm:$0xff]  ;;  %v3350_v58 = vpack.c.bf16 %v1771_v52, %v1767_v40  ;;  %v2437_v40 = vld [vmem:[%s6518_s9 + $0x60] sm:$0xff]  ;;  %v2439_v52 = vld [vmem:[%s6518_s9 + $0x70] sm:$0xff] }
 0x39f   : > { %3587 = vmatprep.subr.bf16.mxu1 %v3586_v59  ;;  %v1773_v54 = vld [vmem:[%s6516_s7 + $0xf78] sm:$0xff]  ;;  %v1766_v59 = vld [vmem:[%s6516_s7 + $0xf40] sm:$0xff]  ;;  %v2478_v48 = vld [vmem:[%s6518_s9 + $0x1a8] sm:$0xff] }
 0x3a0   : > { %v3606_v62 = vpack.c.bf16 %v1773_v54, %v1769_v53  ;;  %v3352_v3 = vpack.c.bf16 %v1770_v60, %v1766_v59  ;;  %v2442_v53 = vld [vmem:[%s6518_s9 + $0x88] sm:$0xff]  ;;  %v2444_v54 = vld [vmem:[%s6518_s9 + $0x98] sm:$0xff]  ;;  %v2443_v59 = vld [vmem:[%s6518_s9 + $0x90] sm:$0xff] }
 0x3a1   : > { %3333 = vmatpush1.bf16.msra.mxu0 %v3332_v0  ;;  %v1779_v0 = vld [vmem:[%s6516_s7 + $0xfa8] sm:$0xff] }
 0x3a2   : > { %3589 = vmatpush1.bf16.msra.mxu1 %v3588_v1  ;;  %3335 = vmatprep.subr.bf16.mxu0 %v3334_v2  ;;  %v1777_v1 = vld [vmem:[%s6516_s7 + $0xf98] sm:$0xff]  ;;  %v3354_v11 = vpack.c.bf16 %v1779_v0, %v1775_v42  ;;  %v2446_v60 = vld [vmem:[%s6518_s9 + $0xa8] sm:$0xff]  ;;  %v2445_v42 = vld [vmem:[%s6518_s9 + $0xa0] sm:$0xff] }
 0x3a3   : > { %3591 = vmatprep.subr.bf16.mxu1 %v3590_v5  ;;  %v1781_v2 = vld [vmem:[%s6516_s7 + $0xfb8] sm:$0xff]  ;;  %v1774_v5 = vld [vmem:[%s6516_s7 + $0xf80] sm:$0xff]  ;;  %v3638_v63 = vpack.c.bf16 %v2448_v61, %v2446_v60  ;;  %v2447_v0 = vld [vmem:[%s6518_s9 + $0xb0] sm:$0xff] }
 0x3a4   : > { %v3610_v8 = vpack.c.bf16 %v1781_v2, %v1777_v1  ;;  %v3356_v15 = vpack.c.bf16 %v1778_v6, %v1774_v5  ;;  %v2450_v1 = vld [vmem:[%s6518_s9 + $0xc8] sm:$0xff]  ;;  %v2452_v2 = vld [vmem:[%s6518_s9 + $0xd8] sm:$0xff]  ;;  %v2451_v5 = vld [vmem:[%s6518_s9 + $0xd0] sm:$0xff] }
 0x3a5   : > { %3337 = vmatpush1.bf16.msra.mxu0 %v3336_v12  ;;  %v1787_v12 = vld [vmem:[%s6516_s7 + $0xfe8] sm:$0xff] }
 0x3a6   : > { %3593 = vmatpush1.bf16.msra.mxu1 %v3592_v13  ;;  %3339 = vmatprep.subr.bf16.mxu0 %v3338_v14  ;;  %v1785_v13 = vld [vmem:[%s6516_s7 + $0xfd8] sm:$0xff]  ;;  %v3358_v17 = vpack.c.bf16 %v1787_v12, %v1783_v10  ;;  %v2454_v6 = vld [vmem:[%s6518_s9 + $0xe8] sm:$0xff]  ;;  %v2453_v10 = vld [vmem:[%s6518_s9 + $0xe0] sm:$0xff] }
 0x3a7   : > { %3595 = vmatprep.subr.bf16.mxu1 %v3594_v18  ;;  %v1789_v14 = vld [vmem:[%s6516_s7 + $0xff8] sm:$0xff]  ;;  %v1782_v18 = vld [vmem:[%s6516_s7 + $0xfc0] sm:$0xff]  ;;  %v3646_v9 = vpack.c.bf16 %v2456_v7, %v2454_v6  ;;  %v2455_v12 = vld [vmem:[%s6518_s9 + $0xf0] sm:$0xff] }
 0x3a8   : > { %v3614_v23 = vpack.c.bf16 %v1789_v14, %v1785_v13  ;;  %v2458_v13 = vld [vmem:[%s6518_s9 + $0x108] sm:$0xff]  ;;  %v2460_v14 = vld [vmem:[%s6518_s9 + $0x118] sm:$0xff]  ;;  %v2709_v6 = vld [vmem:[%s6520_s11] sm:$0xff] }
 0x3a9   : > { %3341 = vmatpush1.bf16.msra.mxu0 %v3340_v25  ;;  %v2428_v25 = vld [vmem:[%s6518_s9 + $0x18] sm:$0xff]  ;;  %v2486_v61 = vld [vmem:[%s6518_s9 + $0x1e8] sm:$0xff] }
 0x3aa   : > { %3597 = vmatpush1.bf16.msra.mxu1 %v3596_v26  ;;  %3343 = vmatprep.subr.bf16.mxu0 %v3342_v27  ;;  %v3360_v26 = vpack.c.bf16 %v1786_v20, %v1782_v18  ;;  %v3616_v27 = vpack.c.bf16 %v1788_v24, %v1784_v22  ;;  %v3618_v28 = vpack.c.bf16 %v2428_v25, %v2426_v39  ;;  %v2459_v18 = vld [vmem:[%s6518_s9 + $0x110] sm:$0xff]  ;;  %v2462_v20 = vld [vmem:[%s6518_s9 + $0x128] sm:$0xff]  ;;  %v2464_v22 = vld [vmem:[%s6518_s9 + $0x138] sm:$0xff] }
 0x3ab   : > { %3599 = vmatprep.subr.bf16.mxu1 %v3598_v31  ;;  %v2430_v31 = vld [vmem:[%s6518_s9 + $0x28] sm:$0xff]  ;;  %v3654_v24 = vpack.c.bf16 %v2464_v22, %v2462_v20  ;;  %v2461_v39 = vld [vmem:[%s6518_s9 + $0x120] sm:$0xff]  ;;  %v2463_v25 = vld [vmem:[%s6518_s9 + $0x130] sm:$0xff] }
 0x3ac   : > { %v3622_v34 = vpack.c.bf16 %v2432_v32, %v2430_v31  ;;  %v2467_v31 = vld [vmem:[%s6518_s9 + $0x150] sm:$0xff]  ;;  %v2470_v32 = vld [vmem:[%s6518_s9 + $0x168] sm:$0xff]  ;;  %v2713_v22 = vld [vmem:[%s6520_s11 + $0x20] sm:$0xff] }
 0x3ad   : > { %3345 = vmatpush1.bf16.msra.mxu0 %v3344_v57  ;;  %v2431_v57 = vld [vmem:[%s6518_s9 + $0x30] sm:$0xff] }
 0x3ae   : > { %3601 = vmatpush1.bf16.msra.mxu1 %v3600_v45  ;;  %3347 = vmatprep.subr.bf16.mxu0 %v3346_v46  ;;  %v2434_v45 = vld [vmem:[%s6518_s9 + $0x48] sm:$0xff]  ;;  %v3624_v19 = vpack.c.bf16 %v2431_v57, %v2429_v36  ;;  %v2433_v46 = vld [vmem:[%s6518_s9 + $0x40] sm:$0xff]  ;;  %v2471_v57 = vld [vmem:[%s6518_s9 + $0x170] sm:$0xff] }
 0x3af   : > { %3603 = vmatprep.subr.bf16.mxu1 %v3602_v50  ;;  %v3626_v4 = vpack.c.bf16 %v2436_v37, %v2434_v45  ;;  %v3628_v50 = vpack.c.bf16 %v2435_v47, %v2433_v46  ;;  %v2469_v36 = vld [vmem:[%s6518_s9 + $0x160] sm:$0xff]  ;;  %v2474_v45 = vld [vmem:[%s6518_s9 + $0x188] sm:$0xff]  ;;  %v2476_v37 = vld [vmem:[%s6518_s9 + $0x198] sm:$0xff] }
 0x3b0   : > { %v2473_v46 = vld [vmem:[%s6518_s9 + $0x180] sm:$0xff]  ;;  %v2475_v47 = vld [vmem:[%s6518_s9 + $0x190] sm:$0xff] }
 0x3b1   : > { %3349 = vmatpush1.bf16.msra.mxu0 %v3348_v55  ;;  %v3632_v55 = vpack.c.bf16 %v2439_v52, %v2437_v40  ;;  %v2477_v40 = vld [vmem:[%s6518_s9 + $0x1a0] sm:$0xff]  ;;  %v2479_v52 = vld [vmem:[%s6518_s9 + $0x1b0] sm:$0xff] }
 0x3b2   : > { %3605 = vmatpush1.bf16.msra.mxu1 %v3604_v56  ;;  %3351 = vmatprep.subr.bf16.mxu0 %v3350_v58  ;;  %v3634_v56 = vpack.c.bf16 %v2444_v54, %v2442_v53  ;;  %v2441_v58 = vld [vmem:[%s6518_s9 + $0x80] sm:$0xff]  ;;  %v2482_v53 = vld [vmem:[%s6518_s9 + $0x1c8] sm:$0xff]  ;;  %v2484_v54 = vld [vmem:[%s6518_s9 + $0x1d8] sm:$0xff] }
 0x3b3   : > { %3607 = vmatprep.subr.bf16.mxu1 %v3606_v62  ;;  %v3636_v62 = vpack.c.bf16 %v2443_v59, %v2441_v58  ;;  %v2481_v58 = vld [vmem:[%s6518_s9 + $0x1c0] sm:$0xff]  ;;  %v2483_v59 = vld [vmem:[%s6518_s9 + $0x1d0] sm:$0xff] }
 0x3b4   : > { %v3676_v60 = vpack.c.bf16 %v2483_v59, %v2481_v58  ;;  %v2491_v58 = vld [vmem:[%s6518_s9 + $0x210] sm:$0xff] }
 0x3b5   : > { %3353 = vmatpush1.bf16.msra.mxu0 %v3352_v3  ;;  %v3640_v3 = vpack.c.bf16 %v2447_v0, %v2445_v42  ;;  %v2485_v42 = vld [vmem:[%s6518_s9 + $0x1e0] sm:$0xff]  ;;  %v2487_v0 = vld [vmem:[%s6518_s9 + $0x1f0] sm:$0xff] }
 0x3b6   : > { %3609 = vmatpush1.bf16.msra.mxu1 %v3608_v35  ;;  %3355 = vmatprep.subr.bf16.mxu0 %v3354_v11  ;;  %v3642_v35 = vpack.c.bf16 %v2452_v2, %v2450_v1  ;;  %v2449_v11 = vld [vmem:[%s6518_s9 + $0xc0] sm:$0xff]  ;;  %v3680_v1 = vpack.c.bf16 %v2487_v0, %v2485_v42  ;;  %v2490_v2 = vld [vmem:[%s6518_s9 + $0x208] sm:$0xff] }
 0x3b7   : > { %3611 = vmatprep.subr.bf16.mxu1 %v3610_v8  ;;  %v3644_v8 = vpack.c.bf16 %v2451_v5, %v2449_v11  ;;  %v2725_v11 = vld [vmem:[%s6520_s11 + $0x80] sm:$0xff]  ;;  %v2726_v5 = vld [vmem:[%s6520_s11 + $0x88] sm:$0xff] }
 0x3b8   : > { %v3746_v7 = vpack.c.bf16 %v2726_v5, %v2725_v11  ;;  %v2498_v11 = vld [vmem:[%s6518_s9 + $0x248] sm:$0xff]  ;;  %v2500_v5 = vld [vmem:[%s6518_s9 + $0x258] sm:$0xff] }
 0x3b9   : > { %3357 = vmatpush1.bf16.msra.mxu0 %v3356_v15  ;;  %v3648_v15 = vpack.c.bf16 %v2455_v12, %v2453_v10  ;;  %v2728_v10 = vld [vmem:[%s6520_s11 + $0x98] sm:$0xff] }
 0x3ba   : > { %3613 = vmatpush1.bf16.msra.mxu1 %v3612_v16  ;;  %3359 = vmatprep.subr.bf16.mxu0 %v3358_v17  ;;  %v3650_v16 = vpack.c.bf16 %v2460_v14, %v2458_v13  ;;  %v2457_v17 = vld [vmem:[%s6518_s9 + $0x100] sm:$0xff]  ;;  %v2711_v14 = vld [vmem:[%s6520_s11 + $0x10] sm:$0xff] }
 0x3bb   : > { %3615 = vmatprep.subr.bf16.mxu1 %v3614_v23  ;;  %v3652_v23 = vpack.c.bf16 %v2459_v18, %v2457_v17  ;;  %v2730_v17 = vld [vmem:[%s6520_s11 + $0xa8] sm:$0xff] }
 0x3bd   : > { %3361 = vmatpush1.bf16.msra.mxu0 %v3360_v26  ;;  %v2466_v26 = vld [vmem:[%s6518_s9 + $0x148] sm:$0xff] }
 0x3be   : > { %3617 = vmatpush1.bf16.msra.mxu1 %v3616_v27  ;;  %3619 = vmatprep.subr.bf16.mxu0 %v3618_v28  ;;  %v2468_v27 = vld [vmem:[%s6518_s9 + $0x158] sm:$0xff]  ;;  %v3656_v28 = vpack.c.bf16 %v2463_v25, %v2461_v39 }
 0x3bf   : > { %v3658_v29 = vpack.c.bf16 %v2468_v27, %v2466_v26  ;;  %3747 = vmatprep.subr.bf16.mxu1 %v3746_v7  ;;  %v2732_v39 = vld [vmem:[%s6520_s11 + $0xb8] sm:$0xff]  ;;  %v2715_v27 = vld [vmem:[%s6520_s11 + $0x30] sm:$0xff]  ;;  %v3690_v7 = vpack.c.bf16 %v2500_v5, %v2498_v11  ;;  %v2538_v5 = vld [vmem:[%s6518_s9 + $0x388] sm:$0xff] }
 0x3c0   : > { %2131 = vmatmul.mubr.f32.vlgmr.msra.gmra.mrb[4].mxu0 %v1819_v21  ;;  %v2535_v11 = vld [vmem:[%s6518_s9 + $0x370] sm:$0xff] }
 0x3c1   : > { %2415 = vmatmul.mubr.f32.vlgmr.msra.gmra.mrb[16].mxu1 %v1819_v21  ;;  %3621 = vmatpush1.bf16.msra.mxu0 %v3620_v33  ;;  %v2472_v33 = vld [vmem:[%s6518_s9 + $0x178] sm:$0xff]  ;;  %v3660_v21 = vpack.c.bf16 %v2467_v31, %v2465_v30  ;;  %v2734_v30 = vld [vmem:[%s6520_s11 + $0xc8] sm:$0xff] }
 0x3c2   : > { %3623 = vmatprep.subr.bf16.mxu0 %v3622_v34  ;;  %v3662_v34 = vpack.c.bf16 %v2472_v33, %v2470_v32  ;;  %v2717_v33 = vld [vmem:[%s6520_s11 + $0x40] sm:$0xff] }
 0x3c5   : > { %3625 = vmatpush1.bf16.msra.mxu0 %v3624_v19  ;;  %v3664_v19 = vpack.c.bf16 %v2471_v57, %v2469_v36  ;;  %v2736_v36 = vld [vmem:[%s6520_s11 + $0xd8] sm:$0xff] }
 0x3c6   : > { %3627 = vmatprep.subr.bf16.mxu0 %v3626_v4  ;;  %v3666_v4 = vpack.c.bf16 %v2476_v37, %v2474_v45  ;;  %v2719_v37 = vld [vmem:[%s6520_s11 + $0x50] sm:$0xff] }
 0x3c9   : > { %3629 = vmatpush1.bf16.msra.mxu0 %v3628_v50  ;;  %v3668_v50 = vpack.c.bf16 %v2475_v47, %v2473_v46  ;;  %v2738_v46 = vld [vmem:[%s6520_s11 + $0xe8] sm:$0xff] }
 0x3ca   : > { %3631 = vmatprep.subr.bf16.mxu0 %v3630_v51  ;;  %v3670_v51 = vpack.c.bf16 %v2480_v49, %v2478_v48  ;;  %v6271_v49 = vld [vmem:[%s6517_s8] sm:$0xf] }
 0x3cd   : > { %3633 = vmatpush1.bf16.msra.mxu0 %v3632_v55  ;;  %v3672_v55 = vpack.c.bf16 %v2479_v52, %v2477_v40  ;;  %v1848_v40 = vrot.slane %v6271_v49, %v4812_v44  ;;  %v2496_v44 = vld [vmem:[%s6518_s9 + $0x238] sm:$0xff] }
 0x3ce   : > { %3635 = vmatprep.subr.bf16.mxu0 %v3634_v56  ;;  %v3674_v56 = vpack.c.bf16 %v2484_v54, %v2482_v53 }
 0x3d1   : > { %3637 = vmatpush1.bf16.msra.mxu0 %v3636_v62  ;;  %v2488_v62 = vld [vmem:[%s6518_s9 + $0x1f8] sm:$0xff] }
 0x3d2   : > { %3639 = vmatprep.subr.bf16.mxu0 %v3638_v63  ;;  %v3678_v63 = vpack.c.bf16 %v2488_v62, %v2486_v61  ;;  %v2494_v61 = vld [vmem:[%s6518_s9 + $0x228] sm:$0xff] }
 0x3d5   : > { %3641 = vmatpush1.bf16.msra.mxu0 %v3640_v3  ;;  %v2492_v3 = vld [vmem:[%s6518_s9 + $0x218] sm:$0xff] }
 0x3d6   : > { %3643 = vmatprep.subr.bf16.mxu0 %v3642_v35  ;;  %v3682_v35 = vpack.c.bf16 %v2492_v3, %v2490_v2  ;;  %v2493_v2 = vld [vmem:[%s6518_s9 + $0x220] sm:$0xff]  ;;  %v2495_v3 = vld [vmem:[%s6518_s9 + $0x230] sm:$0xff] }
 0x3d9   : > { %3645 = vmatpush1.bf16.msra.mxu0 %v3644_v8  ;;  %v2710_v8 = vld [vmem:[%s6520_s11 + $0x8] sm:$0xff] }
 0x3da   : > { %3647 = vmatprep.subr.bf16.mxu0 %v3646_v9  ;;  %v2727_v9 = vld [vmem:[%s6520_s11 + $0x90] sm:$0xff]  ;;  %v3748_v12 = vpack.c.bf16 %v2710_v8, %v2709_v6  ;;  %v3688_v6 = vpack.c.bf16 %v2495_v3, %v2493_v2  ;;  %v2497_v8 = vld [vmem:[%s6518_s9 + $0x240] sm:$0xff] }
 0x3db   : > { %v3750_v13 = vpack.c.bf16 %v2728_v10, %v2727_v9  ;;  %v2499_v9 = vld [vmem:[%s6518_s9 + $0x250] sm:$0xff]  ;;  %v2502_v10 = vld [vmem:[%s6518_s9 + $0x268] sm:$0xff] }
 0x3dc   : > { %3749 = vmatpush3.bf16.msra.mxu1 %v3748_v12  ;;  %v2504_v12 = vld [vmem:[%s6518_s9 + $0x278] sm:$0xff] }
 0x3dd   : > { %3649 = vmatpush1.bf16.msra.mxu0 %v3648_v15  ;;  %v2712_v15 = vld [vmem:[%s6520_s11 + $0x18] sm:$0xff]  ;;  %3751 = vmatprep.subr.bf16.mxu1 %v3750_v13  ;;  %v3692_v13 = vpack.c.bf16 %v2499_v9, %v2497_v8  ;;  %v2537_v9 = vld [vmem:[%s6518_s9 + $0x380] sm:$0xff] }
 0x3de   : > { %3651 = vmatprep.subr.bf16.mxu0 %v3650_v16  ;;  %v2729_v16 = vld [vmem:[%s6520_s11 + $0xa0] sm:$0xff]  ;;  %v3752_v18 = vpack.c.bf16 %v2712_v15, %v2711_v14  ;;  %v3694_v14 = vpack.c.bf16 %v2504_v12, %v2502_v10  ;;  %v2539_v10 = vld [vmem:[%s6518_s9 + $0x390] sm:$0xff]  ;;  %v2542_v12 = vld [vmem:[%s6518_s9 + $0x3a8] sm:$0xff] }
 0x3df   : > { %v3754_v20 = vpack.c.bf16 %v2730_v17, %v2729_v16  ;;  %v2501_v15 = vld [vmem:[%s6518_s9 + $0x260] sm:$0xff]  ;;  %v2503_v16 = vld [vmem:[%s6518_s9 + $0x270] sm:$0xff]  ;;  %v2506_v17 = vld [vmem:[%s6518_s9 + $0x288] sm:$0xff] }
 0x3e0   : > { %3753 = vmatpush3.bf16.msra.mxu1 %v3752_v18  ;;  %v2508_v18 = vld [vmem:[%s6518_s9 + $0x298] sm:$0xff] }
 0x3e1   : > { %3653 = vmatpush1.bf16.msra.mxu0 %v3652_v23  ;;  %v2714_v23 = vld [vmem:[%s6520_s11 + $0x28] sm:$0xff]  ;;  %3755 = vmatprep.subr.bf16.mxu1 %v3754_v20  ;;  %v3696_v20 = vpack.c.bf16 %v2503_v16, %v2501_v15  ;;  %v2541_v16 = vld [vmem:[%s6518_s9 + $0x3a0] sm:$0xff] }
 0x3e2   : > { %3655 = vmatprep.subr.bf16.mxu0 %v3654_v24  ;;  %v2731_v24 = vld [vmem:[%s6520_s11 + $0xb0] sm:$0xff]  ;;  %v3756_v25 = vpack.c.bf16 %v2714_v23, %v2713_v22  ;;  %v3698_v22 = vpack.c.bf16 %v2508_v18, %v2506_v17  ;;  %v2505_v23 = vld [vmem:[%s6518_s9 + $0x280] sm:$0xff]  ;;  %v2546_v18 = vld [vmem:[%s6518_s9 + $0x3c8] sm:$0xff] }
 0x3e3   : > { %v3758_v26 = vpack.c.bf16 %v2732_v39, %v2731_v24  ;;  %v2507_v24 = vld [vmem:[%s6518_s9 + $0x290] sm:$0xff]  ;;  %v2510_v39 = vld [vmem:[%s6518_s9 + $0x2a8] sm:$0xff] }
 0x3e4   : > { %3757 = vmatpush3.bf16.msra.mxu1 %v3756_v25  ;;  %v2512_v25 = vld [vmem:[%s6518_s9 + $0x2b8] sm:$0xff]  ;;  %v2543_v17 = vld [vmem:[%s6518_s9 + $0x3b0] sm:$0xff] }
 0x3e5   : > { %3657 = vmatpush1.bf16.msra.mxu0 %v3656_v28  ;;  %v2716_v28 = vld [vmem:[%s6520_s11 + $0x38] sm:$0xff]  ;;  %3759 = vmatprep.subr.bf16.mxu1 %v3758_v26  ;;  %v3700_v26 = vpack.c.bf16 %v2507_v24, %v2505_v23  ;;  %v2545_v24 = vld [vmem:[%s6518_s9 + $0x3c0] sm:$0xff] }
 0x3e6   : > { %3659 = vmatprep.subr.bf16.mxu0 %v3658_v29  ;;  %v2733_v29 = vld [vmem:[%s6520_s11 + $0xc0] sm:$0xff]  ;;  %v3760_v31 = vpack.c.bf16 %v2716_v28, %v2715_v27  ;;  %v3702_v27 = vpack.c.bf16 %v2512_v25, %v2510_v39  ;;  %v2547_v39 = vld [vmem:[%s6518_s9 + $0x3d0] sm:$0xff]  ;;  %v2550_v25 = vld [vmem:[%s6518_s9 + $0x3e8] sm:$0xff] }
 0x3e7   : > { %v3762_v32 = vpack.c.bf16 %v2734_v30, %v2733_v29  ;;  %v2509_v28 = vld [vmem:[%s6518_s9 + $0x2a0] sm:$0xff]  ;;  %v2511_v29 = vld [vmem:[%s6518_s9 + $0x2b0] sm:$0xff]  ;;  %v2514_v30 = vld [vmem:[%s6518_s9 + $0x2c8] sm:$0xff] }
 0x3e8   : > { %3761 = vmatpush3.bf16.msra.mxu1 %v3760_v31  ;;  %v2516_v31 = vld [vmem:[%s6518_s9 + $0x2d8] sm:$0xff] }
 0x3e9   : > { %3661 = vmatpush1.bf16.msra.mxu0 %v3660_v21  ;;  %v2718_v21 = vld [vmem:[%s6520_s11 + $0x48] sm:$0xff]  ;;  %3763 = vmatprep.subr.bf16.mxu1 %v3762_v32  ;;  %v3704_v32 = vpack.c.bf16 %v2511_v29, %v2509_v28  ;;  %v1844_v28 = vrot.slane %v6271_v49, %v4809_v43  ;;  %v2721_v43 = vld [vmem:[%s6520_s11 + $0x60] sm:$0xff] }
 0x3ea   : > { %3663 = vmatprep.subr.bf16.mxu0 %v3662_v34  ;;  %v2735_v34 = vld [vmem:[%s6520_s11 + $0xd0] sm:$0xff]  ;;  %v3764_v57 = vpack.c.bf16 %v2718_v21, %v2717_v33  ;;  %v3706_v33 = vpack.c.bf16 %v2516_v31, %v2514_v30  ;;  %v2513_v21 = vld [vmem:[%s6518_s9 + $0x2c0] sm:$0xff] }
 0x3eb   : > { %v3766_v45 = vpack.c.bf16 %v2736_v36, %v2735_v34  ;;  %v2515_v34 = vld [vmem:[%s6518_s9 + $0x2d0] sm:$0xff]  ;;  %v2518_v36 = vld [vmem:[%s6518_s9 + $0x2e8] sm:$0xff]  ;;  %v2549_v30 = vld [vmem:[%s6518_s9 + $0x3e0] sm:$0xff] }
 0x3ec   : > { %3765 = vmatpush3.bf16.msra.mxu1 %v3764_v57  ;;  %v2520_v57 = vld [vmem:[%s6518_s9 + $0x2f8] sm:$0xff]  ;;  %v2551_v31 = vld [vmem:[%s6518_s9 + $0x3f0] sm:$0xff] }
 0x3ed   : > { %3665 = vmatpush1.bf16.msra.mxu0 %v3664_v19  ;;  %v2720_v19 = vld [vmem:[%s6520_s11 + $0x58] sm:$0xff]  ;;  %3767 = vmatprep.subr.bf16.mxu1 %v3766_v45  ;;  %v3708_v45 = vpack.c.bf16 %v2515_v34, %v2513_v21 }
 0x3ee   : > { %3667 = vmatprep.subr.bf16.mxu0 %v3666_v4  ;;  %v2737_v4 = vld [vmem:[%s6520_s11 + $0xe0] sm:$0xff]  ;;  %v3768_v47 = vpack.c.bf16 %v2720_v19, %v2719_v37  ;;  %v3710_v37 = vpack.c.bf16 %v2520_v57, %v2518_v36  ;;  %v2739_v36 = vld [vmem:[%s6520_s11 + $0xf0] sm:$0xff] }
 0x3ef   : > { %v3770_v48 = vpack.c.bf16 %v2738_v46, %v2737_v4  ;;  %v2517_v19 = vld [vmem:[%s6518_s9 + $0x2e0] sm:$0xff]  ;;  %v2519_v4 = vld [vmem:[%s6518_s9 + $0x2f0] sm:$0xff]  ;;  %v2522_v46 = vld [vmem:[%s6518_s9 + $0x308] sm:$0xff] }
 0x3f0   : > { %3769 = vmatpush3.bf16.msra.mxu1 %v3768_v47  ;;  %v2524_v47 = vld [vmem:[%s6518_s9 + $0x318] sm:$0xff] }
 0x3f1   : > { %3669 = vmatpush1.bf16.msra.mxu0 %v3668_v50  ;;  %3771 = vmatprep.subr.bf16.mxu1 %v3770_v48  ;;  %v1836_v50 = vrot.slane %v6271_v49, %v4780_v38  ;;  %v3712_v48 = vpack.c.bf16 %v2519_v4, %v2517_v19  ;;  %v2553_v4 = vld [vmem:[%s6519_s10] sm:$0x3] }
 0x3f2   : > { %3671 = vmatprep.subr.bf16.mxu0 %v3670_v51  ;;  %v1840_v51 = vrot.slane %v6271_v49, %v4789_v41  ;;  %v2722_v49 = vld [vmem:[%s6520_s11 + $0x68] sm:$0xff] }
 0x3f3   : > { %v3772_v34 = vpack.c.bf16 %v2722_v49, %v2721_v43 }
 0x3f5   : > { %3673 = vmatpush1.bf16.msra.mxu0 %v3672_v55  ;;  %3773 = vmatpush3.bf16.msra.mxu1 %v3772_v34 }
 0x3f6   : > { %3675 = vmatprep.subr.bf16.mxu0 %v3674_v56  ;;  %v2489_v56 = vld [vmem:[%s6518_s9 + $0x200] sm:$0xff] }
 0x3f7   : > { %v3684_v42 = vpack.c.bf16 %v2491_v58, %v2489_v56  ;;  %v2525_v58 = vld [vmem:[%s6518_s9 + $0x320] sm:$0xff] }
 0x3f9   : > { %3677 = vmatpush1.bf16.msra.mxu0 %v3676_v60 }
 0x3fa   : > { %3679 = vmatprep.subr.bf16.mxu0 %v3678_v63 }
 0x3fd   : > { %3681 = vmatpush1.bf16.msra.mxu0 %v3680_v1  ;;  %v3686_v1 = vpack.c.bf16 %v2496_v44, %v2494_v61  ;;  %v2532_v61 = vld [vmem:[%s6518_s9 + $0x358] sm:$0xff] }
 0x3fe   : > { %3683 = vmatprep.subr.bf16.mxu0 %v3682_v35 }
 0x493   : > { %v2132_v52 = vpop.f32.mrb[4].mxu0 }
 0x494   : > { %v3778_v53 = vadd.f32 %v2132_v52, %v1836_v50  ;;  %v6279_v54 = vpop.f32.mrb[16].mxu1  ;;  %v2134_v55 = vpop.f32.mrb[5].mxu0  ;;  %v3714_v50 = vpack.c.bf16 %v2524_v47, %v2522_v46  ;;  %v2526_v52 = vld [vmem:[%s6518_s9 + $0x328] sm:$0xff]  ;;  %v2558_v46 = vrot.slane %v2553_v4, %v4780_v38  ;;  %v2562_v47 = vrot.slane %v2553_v4, %v4789_v41 }
 0x495   : > { %v3779_v59 = vadd.f32 %v2134_v55, %v1840_v51  ;;  %v2418_v60 = vpop.f32.mrb[17].mxu1  ;;  %v2521_v51 = vld [vmem:[%s6518_s9 + $0x300] sm:$0xff] }
 0x496   : > { %v3781_v62 = vadd.f32 %v2418_v60, %v1848_v40  ;;  %v2421_v0 = vmax.f32 %v3778_v53, 0.0  ;;  %v2523_v40 = vld [vmem:[%s6518_s9 + $0x310] sm:$0xff]  ;;  %v2528_v53 = vld [vmem:[%s6518_s9 + $0x338] sm:$0xff]  ;;  %v2530_v60 = vld [vmem:[%s6518_s9 + $0x348] sm:$0xff] }
 0x497   : > { %v2422_v63 = vmax.f32 %v3779_v59, 0.0  ;;  %v3716_v55 = vpack.c.bf16 %v2523_v40, %v2521_v51  ;;  %v3718_v56 = vpack.c.bf16 %v2528_v53, %v2526_v52  ;;  %v2527_v59 = vld [vmem:[%s6518_s9 + $0x330] sm:$0xff] }
 0x498   : > { %v2424_v35 = vmax.f32 %v3781_v62, 0.0  ;;  %v3720_v44 = vpack.c.bf16 %v2527_v59, %v2525_v58  ;;  %v3722_v62 = vpack.c.bf16 %v2532_v61, %v2530_v60 }
 0x499   : > { %2629 = vmatprep.mubr.f32.mxu0 %v2422_v63  ;;  %v2529_v63 = vld [vmem:[%s6518_s9 + $0x340] sm:$0xff] }
 0x49a   : > { %2630 = vmatmul.mubr.f32.vlgmr.msra.gmra.mrb[6].mxu0 %v2421_v0  ;;  %v2534_v0 = vld [vmem:[%s6518_s9 + $0x368] sm:$0xff] }
 0x49b   : > { %3685 = vmatpush1.bf16.msra.mxu0 %v3684_v42  ;;  %2700 = vmatprep.mubr.f32.mxu0 %v2424_v35  ;;  %v2531_v42 = vld [vmem:[%s6518_s9 + $0x350] sm:$0xff]  ;;  %v2533_v35 = vld [vmem:[%s6518_s9 + $0x360] sm:$0xff] }
 0x49c   : > { %3687 = vmatprep.subr.bf16.mxu0 %v3686_v1  ;;  %v2536_v1 = vld [vmem:[%s6518_s9 + $0x378] sm:$0xff]  ;;  %v3724_v2 = vpack.c.bf16 %v2531_v42, %v2529_v63 }
 0x49d   : > { %v3726_v3 = vpack.c.bf16 %v2536_v1, %v2534_v0 }
 0x49f   : > { %3689 = vmatpush1.bf16.msra.mxu0 %v3688_v6  ;;  %v2540_v6 = vld [vmem:[%s6518_s9 + $0x398] sm:$0xff] }
 0x4a0   : > { %3691 = vmatprep.subr.bf16.mxu0 %v3690_v7  ;;  %v3728_v7 = vpack.c.bf16 %v2535_v11, %v2533_v35  ;;  %v3730_v8 = vpack.c.bf16 %v2540_v6, %v2538_v5 }
 0x4a3   : > { %3693 = vmatpush1.bf16.msra.mxu0 %v3692_v13  ;;  %v2544_v13 = vld [vmem:[%s6518_s9 + $0x3b8] sm:$0xff] }
 0x4a4   : > { %3695 = vmatprep.subr.bf16.mxu0 %v3694_v14  ;;  %v3732_v14 = vpack.c.bf16 %v2539_v10, %v2537_v9  ;;  %v3734_v15 = vpack.c.bf16 %v2544_v13, %v2542_v12 }
 0x4a7   : > { %3697 = vmatpush1.bf16.msra.mxu0 %v3696_v20  ;;  %v2548_v20 = vld [vmem:[%s6518_s9 + $0x3d8] sm:$0xff] }
 0x4a8   : > { %3699 = vmatprep.subr.bf16.mxu0 %v3698_v22  ;;  %v3736_v22 = vpack.c.bf16 %v2543_v17, %v2541_v16  ;;  %v3738_v23 = vpack.c.bf16 %v2548_v20, %v2546_v18 }
 0x4ab   : > { %3701 = vmatpush1.bf16.msra.mxu0 %v3700_v26  ;;  %v2552_v26 = vld [vmem:[%s6518_s9 + $0x3f8] sm:$0xff] }
 0x4ac   : > { %3703 = vmatprep.subr.bf16.mxu0 %v3702_v27  ;;  %v3740_v27 = vpack.c.bf16 %v2547_v39, %v2545_v24  ;;  %v3742_v29 = vpack.c.bf16 %v2552_v26, %v2550_v25 }
 0x4af   : > { %3705 = vmatpush1.bf16.msra.mxu0 %v3704_v32  ;;  %v3744_v32 = vpack.c.bf16 %v2551_v31, %v2549_v30 }
 0x4b0   : > { %3707 = vmatprep.subr.bf16.mxu0 %v3706_v33  ;;  %v3780_v33 = vadd.f32 %v6279_v54, %v1844_v28  ;;  %v2740_v54 = vld [vmem:[%s6520_s11 + $0xf8] sm:$0xff] }
 0x4b1   : > { %v3774_v57 = vpack.c.bf16 %v2740_v54, %v2739_v36 }
 0x4b2   : > { %v2423_v21 = vmax.f32 %v3780_v33, 0.0 }
 0x4b3   : > { %3709 = vmatpush1.bf16.msra.mxu0 %v3708_v45  ;;  %v2723_v45 = vld [vmem:[%s6520_s11 + $0x70] sm:$0xff]  ;;  %3775 = vmatprep.subr.bf16.mxu1 %v3774_v57 }
 0x4b4   : > { %3711 = vmatprep.subr.bf16.mxu0 %v3710_v37  ;;  %v2724_v37 = vld [vmem:[%s6520_s11 + $0x78] sm:$0xff] }
 0x4b5   : > { %v3776_v19 = vpack.c.bf16 %v2724_v37, %v2723_v45 }
 0x4b7   : > { %3713 = vmatpush1.bf16.msra.mxu0 %v3712_v48  ;;  %3777 = vmatpush3.bf16.msra.mxu1 %v3776_v19 }
 0x4b8   : > { %3715 = vmatprep.subr.bf16.mxu0 %v3714_v50 }
 0x4bb   : > { %3717 = vmatpush1.bf16.msra.mxu0 %v3716_v55 }
 0x4bc   : > { %3719 = vmatprep.subr.bf16.mxu0 %v3718_v56  ;;  %v2741_v56 = vld [vmem:[%s6521_s12] sm:$0x1] }
 0x4bf   : > { %3721 = vmatpush1.bf16.msra.mxu0 %v3720_v44 }
 0x4c0   : > { %3723 = vmatprep.subr.bf16.mxu0 %v3722_v62 }
 0x4c3   : > { %3725 = vmatpush1.bf16.msra.mxu0 %v3724_v2 }
 0x4c4   : > { %3727 = vmatprep.subr.bf16.mxu0 %v3726_v3 }
 0x4c7   : > { %3729 = vmatpush1.bf16.msra.mxu0 %v3728_v7 }
 0x4c8   : > { %3731 = vmatprep.subr.bf16.mxu0 %v3730_v8 }
 0x4cb   : > { %3733 = vmatpush1.bf16.msra.mxu0 %v3732_v14 }
 0x4cc   : > { %3735 = vmatprep.subr.bf16.mxu0 %v3734_v15 }
 0x4cf   : > { %3737 = vmatpush1.bf16.msra.mxu0 %v3736_v22 }
 0x4d0   : > { %3739 = vmatprep.subr.bf16.mxu0 %v3738_v23 }
 0x4d3   : > { %3741 = vmatpush1.bf16.msra.mxu0 %v3740_v27 }
 0x4d4   : > { %3743 = vmatprep.subr.bf16.mxu0 %v3742_v29 }
 0x4d7   : > { %3745 = vmatpush1.bf16.msra.mxu0 %v3744_v32 }
 0x4da   : > { %2701 = vmatmul.mubr.f32.vlgmr.msra.gmra.mrb[6].mxu0 %v2423_v21 }
 0x5ad   : > { %v2702_v48 = vpop.f32.mrb[6].mxu0 }
 0x5ae   : > { %v3782_v50 = vadd.f32 %v2702_v48, %v2558_v46  ;;  %v2704_v51 = vpop.f32.mrb[7].mxu0 }
 0x5af   : > { %v3783_v40 = vadd.f32 %v2704_v51, %v2562_v47 }
 0x5b0   : > { %v2707_v53 = vmax.f32 %v3782_v50, 0.0 }
 0x5b1   : > { %v2708_v52 = vmax.f32 %v3783_v40, 0.0 }
 0x5b3   : > { %2806 = vmatprep.mubr.f32.mxu1 %v2708_v52 }
 0x5b4   : > { %2807 = vmatmul.mubr.f32.vlgmr.msra.gmra.mrb[18].mxu1 %v2707_v53 }
 0x687   : > { %v2935_v55 = vpop.f32.mrb[18].mxu1 }
 0x688   : > { %v2936_v58 = vpop.f32.mrb[19].mxu1 }
 0x689   : > { %v2937_v59 = vadd.f32 %v2936_v58, %v2935_v55 }
 0x68b   : > { %v2809_v38 = vadd.f32 %v2937_v59, %v2741_v56 }
 0x68d   : > { %2812 = vst [vmem:[%s464_s23] sm:$0x1] %v2809_v38 }
 0x68e PF: > { %s23_s27 = sadd.s32 1, %s3846_s27   ;;  %s6523_s25 = smov %s3842_s26 }
 0x68f   : > { %p20_p5 = scmp.ge.s32.totalorder %s23_s27, 4   ;;  %s6524_s26 = smov %s6526_s28 }
 0x691   :  { %22 = sbr.rel (!%p20_p5) target bundleno = 2 (0x2), region = 110 }

</bundles_post_ra>
